<compile_context>
chip_gen: v7x
topology: tpu7x:2x2x1
jax: 0.10.0
libtpu: 0.0.40
codegen_flags: <defaults>
</compile_context>

<pallas_src>
import functools

import jax
import jax.numpy as jnp
from jax.experimental import pallas as pl
from jax.experimental.pallas import tpu as pltpu


def _round_up(x, m):
    return (x + m - 1) // m * m


def _pad2d(a, rows, cols):
    return jnp.pad(a, ((0, rows - a.shape[0]), (0, cols - a.shape[1])))


def vae_kernel(x_ref, eps_ref,
               w1_ref, b1_ref, w23_ref, b23_ref,
               w4_ref, b4_ref, w5_ref, b5_ref,
               recon_ref, mu_ref, logvar_ref, *, z_pad):
    # ---- encode: h = relu(x @ W1 + b1); bf16 operands, f32 accumulation ----
    h = jnp.dot(x_ref[...], w1_ref[...],
                preferred_element_type=jnp.float32) + b1_ref[...]
    h = jnp.maximum(h, 0.0)

    # ---- fused mu / log_var projection: single lane-dense (H, 2*Zp) matmul ----
    fused = jnp.dot(h.astype(jnp.bfloat16), w23_ref[...],
                    preferred_element_type=jnp.float32) + b23_ref[...]
    mu = fused[:, :z_pad]
    log_var = fused[:, z_pad:]

    # ---- reparameterize: z = mu + eps * exp(log_var / 2)  (f32, exp on EUP) ----
    eps = eps_ref[...].astype(jnp.float32)
    z = mu + eps * jnp.exp(log_var * 0.5)

    # ---- decode ----
    h2 = jnp.dot(z.astype(jnp.bfloat16), w4_ref[...],
                 preferred_element_type=jnp.float32) + b4_ref[...]
    h2 = jnp.maximum(h2, 0.0)
    logits = jnp.dot(h2.astype(jnp.bfloat16), w5_ref[...],
                     preferred_element_type=jnp.float32) + b5_ref[...]

    # bf16 writeback for the reconstruction (largest output); mu/log_var stay f32.
    recon_ref[...] = jax.nn.sigmoid(logits).astype(recon_ref.dtype)
    mu_ref[...] = mu
    logvar_ref[...] = log_var


def _choose_batch_tile(B, tb_req):
    """Batch tile: multiple of 16 (bf16 sublane pack); keep >= 2 grid steps when
    the batch allows it so both v7x TensorCores get work under ("parallel",)."""
    tb = _round_up(max(16, min(tb_req, B)), 16)
    if B > 16:
        half = _round_up(pl.cdiv(B, 2), 16)
        tb = min(tb, half)
    Bp = _round_up(B, tb)
    return tb, Bp


def vae_forward(x, eps, params, *, tb=512):
    """x: (B, D) f32, eps: (B, Z) f32 (the torch.randn_like noise).

    params: weights stored (in, out), biases (1, out), all f32.
    Returns (x_reconst[bf16], mu[f32], log_var[f32]) with original unpadded shapes.
    """
    B, D = x.shape
    H = params["w1"].shape[1]
    Z = params["w2"].shape[1]

    # Pad feature dims to lane multiples; choose batch tile / padded batch.
    Dp = _round_up(D, 128)
    Hp = _round_up(H, 128)
    Zp = _round_up(Z, 128)
    tb, Bp = _choose_batch_tile(B, tb)

    # Activations streamed in bf16 (halves DMA bytes); math stays f32 in-kernel.
    x_p = _pad2d(x, Bp, Dp).astype(jnp.bfloat16)
    eps_p = _pad2d(eps, Bp, Zp).astype(jnp.bfloat16)

    # Weights in bf16 (padded regions are exact zeros -> no semantic change).
    w1 = _pad2d(params["w1"], Dp, Hp).astype(jnp.bfloat16)
    w23 = jnp.concatenate([_pad2d(params["w2"], Hp, Zp),
                           _pad2d(params["w3"], Hp, Zp)], axis=1).astype(jnp.bfloat16)
    w4 = _pad2d(params["w4"], Zp, Hp).astype(jnp.bfloat16)
    w5 = _pad2d(params["w5"], Hp, Dp).astype(jnp.bfloat16)
    # Biases stay f32 (added after f32 accumulation).
    b1 = _pad2d(params["b1"], 1, Hp)
    b23 = jnp.concatenate([_pad2d(params["b2"], 1, Zp),
                           _pad2d(params["b3"], 1, Zp)], axis=1)
    b4 = _pad2d(params["b4"], 1, Zp * 0 + Hp)
    b5 = _pad2d(params["b5"], 1, Dp)

    grid = (Bp // tb,)

    def batch_spec(cols):
        return pl.BlockSpec((tb, cols), lambda i: (i, 0))

    def resident_spec(arr):
        # Constant block index -> VMEM-resident across grid steps; single-buffered
        # (no re-DMA ever happens, so a second buffer is pure VMEM waste).
        return pl.BlockSpec(arr.shape, lambda i: (0, 0),
                            pipeline_mode=pl.Buffered(1))

    in_specs = [
        batch_spec(Dp),                       # x tile (pipelined over the grid)
        batch_spec(Zp),                       # eps tile
        resident_spec(w1), resident_spec(b1),
        resident_spec(w23), resident_spec(b23),
        resident_spec(w4), resident_spec(b4),
        resident_spec(w5), resident_spec(b5),
    ]
    out_specs = (batch_spec(Dp), batch_spec(Zp), batch_spec(Zp))
    out_shapes = (
        jax.ShapeDtypeStruct((Bp, Dp), jnp.bfloat16),  # x_reconst (padded, bf16)
        jax.ShapeDtypeStruct((Bp, Zp), jnp.float32),   # mu (padded)
        jax.ShapeDtypeStruct((Bp, Zp), jnp.float32),   # log_var (padded)
    )

    weight_bytes = sum(int(a.size) * a.dtype.itemsize
                       for a in (w1, b1, w23, b23, w4, b4, w5, b5))
    cost = pl.CostEstimate(
        flops=int(2 * Bp * (Dp * Hp + Hp * 2 * Zp + Zp * Hp + Hp * Dp)),
        transcendentals=int(Bp * (Zp + Dp)),
        bytes_accessed=int(
            x_p.size * 2 + eps_p.size * 2 + weight_bytes
            + Bp * Dp * 2            # recon (bf16)
            + Bp * 2 * Zp * 4),      # mu + log_var (f32)
    )

    recon, mu, log_var = pl.pallas_call(
        functools.partial(vae_kernel, z_pad=Zp),
        out_shape=out_shapes,
        grid=grid,
        in_specs=in_specs,
        out_specs=out_specs,
        compiler_params=pltpu.CompilerParams(
            dimension_semantics=("parallel",),    # shard batch tiles across TCs (v7x)
            vmem_limit_bytes=48 * 1024 * 1024,    # headroom under v7x's 64 MiB
        ),
        cost_estimate=cost,
    )(x_p, eps_p, w1, b1, w23, b23, w4, b4, w5, b5)

    return recon[:B, :D], mu[:B, :Z], log_var[:B, :Z]


def xavier_normal(key, fan_in, fan_out):
    std = jnp.sqrt(2.0 / (fan_in + fan_out))
    # Stored as (in, out) — already the transpose of PyTorch's (out, in).
    return std * jax.random.normal(key, (fan_in, fan_out), dtype=jnp.float32)


def init_params(key, input_dim, h_dim, z_dim):
    ks = jax.random.split(key, 10)

    def bias(k, fan_in, out):
        bound = 1.0 / jnp.sqrt(fan_in)
        return jax.random.uniform(k, (1, out), jnp.float32, -bound, bound)

    return {
        "w1": xavier_normal(ks[0], input_dim, h_dim), "b1": bias(ks[1], input_dim, h_dim),
        "w2": xavier_normal(ks[2], h_dim, z_dim),     "b2": bias(ks[3], h_dim, z_dim),
        "w3": xavier_normal(ks[4], h_dim, z_dim),     "b3": bias(ks[5], h_dim, z_dim),
        "w4": xavier_normal(ks[6], z_dim, h_dim),     "b4": bias(ks[7], z_dim, h_dim),
        "w5": xavier_normal(ks[8], h_dim, input_dim), "b5": bias(ks[9], h_dim, input_dim),
    }


if __name__ == "__main__":
    # Shapes consistent with VAE(input_dim=784, h_dim=400, z_dim=20), scaled down
    # but deliberately NOT lane-aligned so the padding path is exercised.
    # B=512 with the >=2-step tile rule gives a 2-step batch grid (pipelining +
    # megacore sharding exercised).
    B, INPUT_DIM, H_DIM, Z_DIM = 512, 200, 100, 20

    key = jax.random.PRNGKey(0)
    k_param, k_x, k_eps = jax.random.split(key, 3)

    params = init_params(k_param, INPUT_DIM, H_DIM, Z_DIM)
    x = jax.random.uniform(k_x, (B, INPUT_DIM), dtype=jnp.float32)
    # TODO(synk): noise is host-generated (matches torch.randn_like semantics but is
    # passed explicitly instead of being sampled inside the kernel).
    eps = jax.random.normal(k_eps, (B, Z_DIM), dtype=jnp.float32)

    x_reconst, mu, log_var = vae_forward(x, eps, params, tb=512)
    jax.block_until_ready((x_reconst, mu, log_var))
    recon32 = x_reconst.astype(jnp.float32)

    # --- reference 1: same bf16-operand / f32-accumulate precision, bf16 eps ---
    eps_q = eps.astype(jnp.bfloat16).astype(jnp.float32)

    def bdot(a, w):
        return jnp.dot(a.astype(jnp.bfloat16), w.astype(jnp.bfloat16),
                       preferred_element_type=jnp.float32)

    h_ref = jnp.maximum(bdot(x, params["w1"]) + params["b1"], 0.0)
    mu_ref = bdot(h_ref, params["w2"]) + params["b2"]
    lv_ref = bdot(h_ref, params["w3"]) + params["b3"]
    z_ref = mu_ref + eps_q * jnp.exp(lv_ref * 0.5)
    h2_ref = jnp.maximum(bdot(z_ref, params["w4"]) + params["b4"], 0.0)
    rec_ref = jax.nn.sigmoid(bdot(h2_ref, params["w5"]) + params["b5"])

    assert jnp.allclose(mu, mu_ref, atol=1e-2, rtol=1e-2)
    assert jnp.allclose(log_var, lv_ref, atol=1e-2, rtol=1e-2)
    assert jnp.allclose(recon32, rec_ref, atol=1.5e-2, rtol=1.5e-2)

    # --- reference 2: full-f32 semantic sanity (loose tolerance for bf16 path) ---
    h32 = jnp.maximum(x @ params["w1"] + params["b1"], 0.0)
    mu32 = h32 @ params["w2"] + params["b2"]
    lv32 = h32 @ params["w3"] + params["b3"]
    z32 = mu32 + eps * jnp.exp(lv32 * 0.5)
    rec32 = jax.nn.sigmoid(jnp.maximum(z32 @ params["w4"] + params["b4"], 0.0)
                           @ params["w5"] + params["b5"])
    assert jnp.allclose(mu, mu32, atol=3e-2, rtol=3e-2)
    assert jnp.allclose(log_var, lv32, atol=3e-2, rtol=3e-2)
    assert jnp.allclose(recon32, rec32, atol=3e-2, rtol=3e-2)

    assert bool(jnp.all(jnp.isfinite(recon32)))
    print("KERNEL_OK")
</pallas_src>

<mosaic_0001>
module attributes {stable_mosaic.version = 11 : i64} {
  func.func @vae_kernel(%arg0: i32, %arg1: memref<256x256xbf16, #tpu.memory_space<vmem>>, %arg2: memref<256x128xbf16, #tpu.memory_space<vmem>>, %arg3: memref<256x128xbf16, #tpu.memory_space<vmem>>, %arg4: memref<1x128xf32, #tpu.memory_space<vmem>>, %arg5: memref<128x256xbf16, #tpu.memory_space<vmem>>, %arg6: memref<1x256xf32, #tpu.memory_space<vmem>>, %arg7: memref<128x128xbf16, #tpu.memory_space<vmem>>, %arg8: memref<1x128xf32, #tpu.memory_space<vmem>>, %arg9: memref<128x256xbf16, #tpu.memory_space<vmem>>, %arg10: memref<1x256xf32, #tpu.memory_space<vmem>>, %arg11: memref<256x256xbf16, #tpu.memory_space<vmem>>, %arg12: memref<256x128xf32, #tpu.memory_space<vmem>>, %arg13: memref<256x128xf32, #tpu.memory_space<vmem>>) attributes {dimension_semantics = [#tpu.dimension_semantics<parallel>], iteration_bounds = array<i64: 2>, scalar_prefetch = 0 : i64, scratch_operands = 0 : i64, tpu.core_type = #tpu.core_type<tc>, window_params = [{transform_indices = @transform_0, window_bounds = array<i64: 256, 256>}, {transform_indices = @transform_1, window_bounds = array<i64: 256, 128>}, {pipeline_mode = #tpu.pipeline_mode<synchronous>, transform_indices = @transform_2, window_bounds = array<i64: 256, 128>}, {pipeline_mode = #tpu.pipeline_mode<synchronous>, transform_indices = @transform_3, window_bounds = array<i64: 1, 128>}, {pipeline_mode = #tpu.pipeline_mode<synchronous>, transform_indices = @transform_4, window_bounds = array<i64: 128, 256>}, {pipeline_mode = #tpu.pipeline_mode<synchronous>, transform_indices = @transform_5, window_bounds = array<i64: 1, 256>}, {pipeline_mode = #tpu.pipeline_mode<synchronous>, transform_indices = @transform_6, window_bounds = array<i64: 128, 128>}, {pipeline_mode = #tpu.pipeline_mode<synchronous>, transform_indices = @transform_7, window_bounds = array<i64: 1, 128>}, {pipeline_mode = #tpu.pipeline_mode<synchronous>, transform_indices = @transform_8, window_bounds = array<i64: 128, 256>}, {pipeline_mode = #tpu.pipeline_mode<synchronous>, transform_indices = @transform_9, window_bounds = array<i64: 1, 256>}, {transform_indices = @transform_10, window_bounds = array<i64: 256, 256>}, {transform_indices = @transform_11, window_bounds = array<i64: 256, 128>}, {transform_indices = @transform_12, window_bounds = array<i64: 256, 128>}]} {
    %c0 = arith.constant 0 : index
    %c0_0 = arith.constant 0 : index
    %0 = vector.load %arg1[%c0, %c0_0] : memref<256x256xbf16, #tpu.memory_space<vmem>>, vector<256x256xbf16>
    %c0_1 = arith.constant 0 : index
    %c0_2 = arith.constant 0 : index
    %1 = vector.load %arg3[%c0_1, %c0_2] : memref<256x128xbf16, #tpu.memory_space<vmem>>, vector<256x128xbf16>
    %cst = arith.constant dense<0.000000e+00> : vector<256x128xf32>
    %2 = tpu.matmul %0, %1, %cst {dimension_numbers = #tpu.dot_dimension_numbers<[1], [0], [0], [1], [0, 0, 1, 1], [], []>} : vector<256x256xbf16>, vector<256x128xbf16>, vector<256x128xf32> -> vector<256x128xf32>
    %c0_3 = arith.constant 0 : index
    %c0_4 = arith.constant 0 : index
    %3 = vector.load %arg4[%c0_3, %c0_4] : memref<1x128xf32, #tpu.memory_space<vmem>>, vector<1x128xf32>
    %4 = vector.broadcast %3 : vector<1x128xf32> to vector<256x128xf32>
    %5 = arith.addf %2, %4 : vector<256x128xf32>
    %cst_5 = arith.constant 0.000000e+00 : f32
    %6 = vector.broadcast %cst_5 : f32 to vector<256x128xf32>
    %7 = arith.maximumf %5, %6 : vector<256x128xf32>
    %8 = arith.truncf %7 : vector<256x128xf32> to vector<256x128xbf16>
    %c0_6 = arith.constant 0 : index
    %c0_7 = arith.constant 0 : index
    %9 = vector.load %arg5[%c0_6, %c0_7] : memref<128x256xbf16, #tpu.memory_space<vmem>>, vector<128x256xbf16>
    %cst_8 = arith.constant dense<0.000000e+00> : vector<256x256xf32>
    %10 = tpu.matmul %8, %9, %cst_8 {dimension_numbers = #tpu.dot_dimension_numbers<[1], [0], [0], [1], [0, 0, 1, 1], [], []>} : vector<256x128xbf16>, vector<128x256xbf16>, vector<256x256xf32> -> vector<256x256xf32>
    %c0_9 = arith.constant 0 : index
    %c0_10 = arith.constant 0 : index
    %11 = vector.load %arg6[%c0_9, %c0_10] : memref<1x256xf32, #tpu.memory_space<vmem>>, vector<1x256xf32>
    %12 = vector.broadcast %11 : vector<1x256xf32> to vector<256x256xf32>
    %13 = arith.addf %10, %12 : vector<256x256xf32>
    %14 = vector.extract_strided_slice %13 {offsets = [0, 0], sizes = [256, 128], strides = [1, 1]} : vector<256x256xf32> to vector<256x128xf32>
    %15 = vector.extract_strided_slice %13 {offsets = [0, 128], sizes = [256, 128], strides = [1, 1]} : vector<256x256xf32> to vector<256x128xf32>
    %c0_11 = arith.constant 0 : index
    %c0_12 = arith.constant 0 : index
    %16 = vector.load %arg2[%c0_11, %c0_12] : memref<256x128xbf16, #tpu.memory_space<vmem>>, vector<256x128xbf16>
    %17 = arith.extf %16 : vector<256x128xbf16> to vector<256x128xf32>
    %cst_13 = arith.constant 5.000000e-01 : f32
    %18 = vector.broadcast %cst_13 : f32 to vector<256x128xf32>
    %19 = arith.mulf %15, %18 : vector<256x128xf32>
    %20 = math.exp %19 : vector<256x128xf32>
    %21 = arith.mulf %17, %20 : vector<256x128xf32>
    %22 = arith.addf %14, %21 : vector<256x128xf32>
    %23 = arith.truncf %22 : vector<256x128xf32> to vector<256x128xbf16>
    %c0_14 = arith.constant 0 : index
    %c0_15 = arith.constant 0 : index
    %24 = vector.load %arg7[%c0_14, %c0_15] : memref<128x128xbf16, #tpu.memory_space<vmem>>, vector<128x128xbf16>
    %cst_16 = arith.constant dense<0.000000e+00> : vector<256x128xf32>
    %25 = tpu.matmul %23, %24, %cst_16 {dimension_numbers = #tpu.dot_dimension_numbers<[1], [0], [0], [1], [0, 0, 1, 1], [], []>} : vector<256x128xbf16>, vector<128x128xbf16>, vector<256x128xf32> -> vector<256x128xf32>
    %c0_17 = arith.constant 0 : index
    %c0_18 = arith.constant 0 : index
    %26 = vector.load %arg8[%c0_17, %c0_18] : memref<1x128xf32, #tpu.memory_space<vmem>>, vector<1x128xf32>
    %27 = vector.broadcast %26 : vector<1x128xf32> to vector<256x128xf32>
    %28 = arith.addf %25, %27 : vector<256x128xf32>
    %cst_19 = arith.constant 0.000000e+00 : f32
    %29 = vector.broadcast %cst_19 : f32 to vector<256x128xf32>
    %30 = arith.maximumf %28, %29 : vector<256x128xf32>
    %31 = arith.truncf %30 : vector<256x128xf32> to vector<256x128xbf16>
    %c0_20 = arith.constant 0 : index
    %c0_21 = arith.constant 0 : index
    %32 = vector.load %arg9[%c0_20, %c0_21] : memref<128x256xbf16, #tpu.memory_space<vmem>>, vector<128x256xbf16>
    %cst_22 = arith.constant dense<0.000000e+00> : vector<256x256xf32>
    %33 = tpu.matmul %31, %32, %cst_22 {dimension_numbers = #tpu.dot_dimension_numbers<[1], [0], [0], [1], [0, 0, 1, 1], [], []>} : vector<256x128xbf16>, vector<128x256xbf16>, vector<256x256xf32> -> vector<256x256xf32>
    %c0_23 = arith.constant 0 : index
    %c0_24 = arith.constant 0 : index
    %34 = vector.load %arg10[%c0_23, %c0_24] : memref<1x256xf32, #tpu.memory_space<vmem>>, vector<1x256xf32>
    %35 = vector.broadcast %34 : vector<1x256xf32> to vector<256x256xf32>
    %36 = arith.addf %33, %35 : vector<256x256xf32>
    %37 = arith.negf %36 : vector<256x256xf32>
    %38 = math.exp %37 : vector<256x256xf32>
    %cst_25 = arith.constant 1.000000e+00 : f32
    %39 = vector.broadcast %cst_25 : f32 to vector<256x256xf32>
    %40 = arith.addf %39, %38 : vector<256x256xf32>
    %41 = arith.divf %39, %40 : vector<256x256xf32>
    %42 = arith.truncf %41 : vector<256x256xf32> to vector<256x256xbf16>
    %c0_26 = arith.constant 0 : index
    %c0_27 = arith.constant 0 : index
    %43 = vector.load %arg11[%c0_26, %c0_27] : memref<256x256xbf16, #tpu.memory_space<vmem>>, vector<256x256xbf16>
    tpu.vector_store %arg11[%c0_26, %c0_27], %42 {strides = array<i32>} : memref<256x256xbf16, #tpu.memory_space<vmem>>, vector<256x256xbf16>,
    %c0_28 = arith.constant 0 : index
    %c0_29 = arith.constant 0 : index
    %44 = vector.load %arg12[%c0_28, %c0_29] : memref<256x128xf32, #tpu.memory_space<vmem>>, vector<256x128xf32>
    tpu.vector_store %arg12[%c0_28, %c0_29], %14 {strides = array<i32>} : memref<256x128xf32, #tpu.memory_space<vmem>>, vector<256x128xf32>,
    %c0_30 = arith.constant 0 : index
    %c0_31 = arith.constant 0 : index
    %45 = vector.load %arg13[%c0_30, %c0_31] : memref<256x128xf32, #tpu.memory_space<vmem>>, vector<256x128xf32>
    tpu.vector_store %arg13[%c0_30, %c0_31], %15 {strides = array<i32>} : memref<256x128xf32, #tpu.memory_space<vmem>>, vector<256x128xf32>,
    return
  }
  func.func @transform_0(%arg0: i32) -> (i32, i32) {
    %c0_i32 = arith.constant 0 : i32
    %c0_i32_0 = arith.constant 0 : i32
    return %arg0, %c0_i32 : i32, i32
  }
  func.func @transform_1(%arg0: i32) -> (i32, i32) {
    %c0_i32 = arith.constant 0 : i32
    %c0_i32_0 = arith.constant 0 : i32
    return %arg0, %c0_i32 : i32, i32
  }
  func.func @transform_2(%arg0: i32) -> (i32, i32) {
    %c0_i32 = arith.constant 0 : i32
    %c0_i32_0 = arith.constant 0 : i32
    %c0_i32_1 = arith.constant 0 : i32
    return %c0_i32, %c0_i32_0 : i32, i32
  }
  func.func @transform_3(%arg0: i32) -> (i32, i32) {
    %c0_i32 = arith.constant 0 : i32
    %c0_i32_0 = arith.constant 0 : i32
    %c0_i32_1 = arith.constant 0 : i32
    return %c0_i32, %c0_i32_0 : i32, i32
  }
  func.func @transform_4(%arg0: i32) -> (i32, i32) {
    %c0_i32 = arith.constant 0 : i32
    %c0_i32_0 = arith.constant 0 : i32
    %c0_i32_1 = arith.constant 0 : i32
    return %c0_i32, %c0_i32_0 : i32, i32
  }
  func.func @transform_5(%arg0: i32) -> (i32, i32) {
    %c0_i32 = arith.constant 0 : i32
    %c0_i32_0 = arith.constant 0 : i32
    %c0_i32_1 = arith.constant 0 : i32
    return %c0_i32, %c0_i32_0 : i32, i32
  }
  func.func @transform_6(%arg0: i32) -> (i32, i32) {
    %c0_i32 = arith.constant 0 : i32
    %c0_i32_0 = arith.constant 0 : i32
    %c0_i32_1 = arith.constant 0 : i32
    return %c0_i32, %c0_i32_0 : i32, i32
  }
  func.func @transform_7(%arg0: i32) -> (i32, i32) {
    %c0_i32 = arith.constant 0 : i32
    %c0_i32_0 = arith.constant 0 : i32
    %c0_i32_1 = arith.constant 0 : i32
    return %c0_i32, %c0_i32_0 : i32, i32
  }
  func.func @transform_8(%arg0: i32) -> (i32, i32) {
    %c0_i32 = arith.constant 0 : i32
    %c0_i32_0 = arith.constant 0 : i32
    %c0_i32_1 = arith.constant 0 : i32
    return %c0_i32, %c0_i32_0 : i32, i32
  }
  func.func @transform_9(%arg0: i32) -> (i32, i32) {
    %c0_i32 = arith.constant 0 : i32
    %c0_i32_0 = arith.constant 0 : i32
    %c0_i32_1 = arith.constant 0 : i32
    return %c0_i32, %c0_i32_0 : i32, i32
  }
  func.func @transform_10(%arg0: i32) -> (i32, i32) {
    %c0_i32 = arith.constant 0 : i32
    %c0_i32_0 = arith.constant 0 : i32
    return %arg0, %c0_i32 : i32, i32
  }
  func.func @transform_11(%arg0: i32) -> (i32, i32) {
    %c0_i32 = arith.constant 0 : i32
    %c0_i32_0 = arith.constant 0 : i32
    return %arg0, %c0_i32 : i32, i32
  }
  func.func @transform_12(%arg0: i32) -> (i32, i32) {
    %c0_i32 = arith.constant 0 : i32
    %c0_i32_0 = arith.constant 0 : i32
    return %arg0, %c0_i32 : i32, i32
  }
}

</mosaic_0001>

<bundles_post_ra>
// kernel: tpu_custom_call.1
= control target key start
LH: loop header
LB: loop body
LE: loop exit
PB: predicated region body
PF: predicated region fallthrough
CT: control target
= control target key end

     0   :  { %s5588_s0 = inlined_call_operand.hbm [shape: bf16[512,256], index: 0, kind: input, shape index: {}]   ;;  %s5589_s1 = inlined_call_operand.hbm [shape: bf16[512,128], index: 1, kind: input, shape index: {}]   ;;  %s5590_s2 = inlined_call_operand.hbm [shape: bf16[256,128], index: 2, kind: input, shape index: {}]   ;;  %s5591_s3 = inlined_call_operand.vmem [shape: f32[1,128], index: 3, kind: input, shape index: {}]   ;;  %s5592_s4 = inlined_call_operand.hbm [shape: bf16[128,256], index: 4, kind: input, shape index: {}]   ;;  %s5593_s5 = inlined_call_operand.vmem [shape: f32[1,256], index: 5, kind: input, shape index: {}]   ;;  %s5594_s6 = inlined_call_operand.hbm [shape: bf16[128,128], index: 6, kind: input, shape index: {}]   ;;  %s5595_s7 = inlined_call_operand.vmem [shape: f32[1,128], index: 7, kind: input, shape index: {}]   ;;  %s5596_s8 = inlined_call_operand.hbm [shape: bf16[128,256], index: 8, kind: input, shape index: {}]   ;;  %s5597_s9 = inlined_call_operand.vmem [shape: f32[1,256], index: 9, kind: input, shape index: {}]   ;;  %s5598_s10 = inlined_call_operand.hbm [shape: bf16[512,256], index: 10, kind: output, shape index: {0}]   ;;  %s5599_s11 = inlined_call_operand.hbm [shape: f32[512,128], index: 11, kind: output, shape index: {1}]   ;;  %s5600_s12 = inlined_call_operand.hbm [shape: f32[512,128], index: 12, kind: output, shape index: {2}]  }
   0x1   :  { %5618 = sst [smem:[#allocation28_spill]] %s5588_s0 }
   0x2   :  { %5619 = sst [smem:[#allocation29_spill]] %s5590_s2 }
   0x3   :  { %5620 = sst [smem:[#allocation30_spill]] %s5592_s4 }
   0x4   :  { %5621 = sst [smem:[#allocation31_spill]] %s5594_s6 }
   0x5   :  { %5622 = sst [smem:[#allocation32_spill]] %s5596_s8 }
   0x6   :  { %5623 = sst [smem:[#allocation33_spill]] %s5598_s10 }
   0x7   :  { %5624 = sst [smem:[#allocation34_spill]] %s5599_s11 }
   0x8   :  { %5625 = sst [smem:[#allocation35_spill]] %s5600_s12 }
   0x9   :  { %18 = vsyncpa [#allocation3], 0 }
   0xa   :  { %20 = vsyncpa [#allocation3 + $0x1], 0 }
   0xb   :  { %21 = vsyncpa [#allocation6], 0 }
   0xc   :  { %23 = vsyncpa [#allocation6 + $0x1], 0 }
   0xd   :  { %24 = vsyncpa [#allocation9], 0 }
   0xe   :  { %25 = vsyncpa [#allocation12], 0 }
   0xf   :  { %26 = vsyncpa [#allocation4], 0 }
  0x10   :  { %28 = vsyncpa [#allocation4 + $0x1], 0 }
  0x11   :  { %29 = vsyncpa [#allocation15], 0 }
  0x12   :  { %31 = vsyncpa [#allocation15 + $0x1], 0  ;;  %s4623_s21 = smov 0   ;;  %s4625_s22 = smov 0  }
  0x13   :  { %s4627_s23 = smov 0   ;;  %s4629_s24 = smov 0  }
  0x14 LB: > { %5626 = sst [smem:[#allocation24_spill]] %s4528_s21  ;;  %s4644_s25 = sadd.s32 4294967295, %s4540_s24   ;;  %s4540_s24 = sphi %s4629_s24, %s5669_s24   ;;  %s4536_s23 = sphi %s4627_s23, %s5668_s23   ;;  %s4532_s22 = sphi %s4625_s22, %s5667_s22   ;;  %s4528_s21 = sphi %s4623_s21, %s5666_s21  }
  0x15   : > { %5627 = sst [smem:[#allocation25_spill]] %s4536_s23  ;;  %s5601_s26 = sadd.s32 4294967294, %s4540_s24  }
  0x16   : > { %p57_p0 = scmp.ne.s32.totalorder %s4532_s22, %s4528_s21  ;;  %p5603_p1 = scmp.eq.s32.totalorder %s4644_s25, 0 }
  0x17   : > { %p281_p3 = scmp.eq.s32.totalorder %s5601_s26, 1  ;;  %p3138_p5 = scmp.ge.s32.totalorder %s4540_s24, 1 }
  0x18   : > { %p4655_p4 = por %p5603_p1, %p57_p0  ;;  %p340_p7 = scmp.lt.s32.totalorder %s4540_s24, 3 }
  0x19   : > { %p4660_p6 = por %p281_p3, %p57_p0  ;;  %s4542_s30 = smov [#allocation7]  }
  0x1a   : > { %s5628_s27 = scalar_select %p4655_p4, 1, 0 }
  0x1b   : > { %s5629_s28 = scalar_select %p4660_p6, 1, 0 }
  0x1c   : > { %p4665_p8 = pnand %p3138_p5, %p340_p7  ;;  %s352_s13 = sshll.u32 %s4542_s30, 4  ;;  %s4669_s13 = int_to_ptr.vmem [resolvable:$true] %s352_s13 }
  0x1d   : > { %5630 = sst [smem:[#allocation26_spill]] %s5629_s28  ;;  %s4543_s15 = smov [#allocation8]  }
  0x1e   : > { %s5631_s29 = scalar_select %p4665_p8, 1, 0 }
  0x1f   : > { %p3703_p9 = pneg %p4665_p8  ;;  %s368_s16 = sshll.u32 %s4543_s15, 4  ;;  %s4680_s16 = int_to_ptr.vmem [resolvable:$true] %s368_s16 }
  0x20   : > { %s5633_s2 = sld [smem:[#allocation29_spill]] }
  0x21   : > { %p4676_p11 = pnand %p3703_p9, %p5603_p1 }
  0x23   : > { %p4690_p13 = pneg %p4676_p11 }
  0x26   : > { %s4226_s19 = scalar_lea.hbm %s5633_s2, 2048 }
  0x27   : > { %p4227_p12 = scmp.ne.s32.totalorder %s5633_s2, %s4226_s19  ;;  %p4233_p5 = scmp.lt.u32.totalorder %s4226_s19, %s5633_s2 }
  0x29   : > { %p4229_p0 = pnand %p4690_p13, %p4227_p12 }
  0x2b   : > { %p4230_p3 = pneg %p4229_p0 }
  0x2d   : > { %p4235_p7 = pnand %p4233_p5, %p4230_p3 }
  0x2f   : > { %4238 = shalt.err (!%p4235_p7)
}
  0x30   : > { %s4239_s17 = scalar_lea.vmem %s4669_s13, 2048  ;;  %p4247_p2 = scmp.lt.s32.totalorder %s4669_s13, %s4669_s13 }
  0x31   : > { %p4240_p9 = scmp.ne.s32.totalorder %s4669_s13, %s4239_s17  ;;  %p4248_p6 = scmp.lt.s32.totalorder %s4239_s17, %s4239_s17 }
  0x33   : > { %p4242_p10 = pnand %p4240_p9, %p4690_p13  ;;  %p4249_p12 = por %p4248_p6, %p4247_p2 }
  0x35   : > { %p4243_p1 = pneg %p4242_p10 }
  0x37   : > { %p4250_p0 = pnand %p4249_p12, %p4243_p1 }
  0x39   : > { %4253 = shalt.err (!%p4250_p0)
}
  0x3a   : > { %s5608_s18 = smov 64   ;;  %s5610_s28 = smov 4  }
  0x3b   : > { %3706 = dma.hbm_to_vmem [thread:$0]  (!%p4676_p11), %s5633_s2, 2048, %s4669_s13, [#allocation6], %s5608_s18, %s5608_s18, %s5610_s28  }
  0x3c   : > { %s5635_s4 = sld [smem:[#allocation30_spill]] }
  0x42   : > { %s4254_s17 = scalar_lea.hbm %s5635_s4, 2048 }
  0x43   : > { %p4255_p1 = scmp.ne.s32.totalorder %s5635_s4, %s4254_s17  ;;  %p4261_p10 = scmp.lt.u32.totalorder %s4254_s17, %s5635_s4 }
  0x45   : > { %p4257_p2 = pnand %p4255_p1, %p4690_p13 }
  0x47   : > { %p4258_p6 = pneg %p4257_p2 }
  0x49   : > { %p4263_p3 = pnand %p4261_p10, %p4258_p6 }
  0x4b   : > { %4266 = shalt.err (!%p4263_p3)
}
  0x4c   : > { %s4267_s13 = scalar_lea.vmem %s4680_s16, 2048  ;;  %p4275_p12 = scmp.lt.s32.totalorder %s4680_s16, %s4680_s16 }
  0x4d   : > { %p4268_p5 = scmp.ne.s32.totalorder %s4680_s16, %s4267_s13  ;;  %p4276_p0 = scmp.lt.s32.totalorder %s4267_s13, %s4267_s13 }
  0x4f   : > { %p4270_p7 = pnand %p4268_p5, %p4690_p13  ;;  %p4277_p1 = por %p4276_p0, %p4275_p12 }
  0x51   : > { %p4271_p9 = pneg %p4270_p7 }
  0x53   : > { %p4278_p2 = pnand %p4277_p1, %p4271_p9 }
  0x55   : > { %4281 = shalt.err (!%p4278_p2)
}
  0x56   : > { %s5614_s10 = smov 128   ;;  %s5616_s11 = smov 8  }
  0x57   : > { %3709 = dma.hbm_to_vmem [thread:$0]  (!%p4676_p11), %s5635_s4, 2048, %s4680_s16, [#allocation9], %s5614_s10, %s5614_s10, %s5616_s11  }
  0x58   : > { %s4548_s19 = smov [#allocation10]   ;;  %s4549_s30 = smov [#allocation11]  }
  0x59   : > { %s384_s20 = sshll.u32 %s4548_s19, 4  ;;  %s400_s15 = sshll.u32 %s4549_s30, 4  ;;  %s385_s20 = int_to_ptr.vmem [resolvable:$true] %s384_s20  ;;  %s4740_s15 = int_to_ptr.vmem [resolvable:$true] %s400_s15 }
  0x5a   : > { %s5636_s6 = sld [smem:[#allocation31_spill]] }
  0x60   : > { %s4282_s18 = scalar_lea.hbm %s5636_s6, 1024 }
  0x61   : > { %p4283_p6 = scmp.ne.s32.totalorder %s5636_s6, %s4282_s18  ;;  %p4289_p5 = scmp.lt.u32.totalorder %s4282_s18, %s5636_s6 }
  0x63   : > { %p4285_p10 = pnand %p4283_p6, %p4690_p13 }
  0x65   : > { %p4286_p3 = pneg %p4285_p10 }
  0x67   : > { %p4291_p7 = pnand %p4289_p5, %p4286_p3 }
  0x69   : > { %4294 = shalt.err (!%p4291_p7)
}
  0x6a   : > { %s4295_s21 = scalar_lea.vmem %s385_s20, 1024  ;;  %p4303_p1 = scmp.lt.s32.totalorder %s385_s20, %s385_s20 }
  0x6b   : > { %p4296_p9 = scmp.ne.s32.totalorder %s385_s20, %s4295_s21  ;;  %p4304_p2 = scmp.lt.s32.totalorder %s4295_s21, %s4295_s21 }
  0x6d   : > { %p4298_p12 = pnand %p4296_p9, %p4690_p13  ;;  %p4305_p4 = por %p4304_p2, %p4303_p1 }
  0x6f   : > { %p4299_p0 = pneg %p4298_p12 }
  0x71   : > { %p4306_p8 = pnand %p4305_p4, %p4299_p0 }
  0x73   : > { %4309 = shalt.err (!%p4306_p8)
}
  0x74   : > { %s5637_s2 = smov 4   ;;  %s5638_s28 = smov 64  }
  0x75   : > { %3712 = dma.hbm_to_vmem [thread:$0]  (!%p4676_p11), %s5636_s6, 1024, %s385_s20, [#allocation9], %s5638_s28, %s5638_s28, %s5637_s2  }
  0x76   : > { %s5639_s8 = sld [smem:[#allocation32_spill]] }
  0x7c   : > { %s4310_s13 = scalar_lea.hbm %s5639_s8, 2048 }
  0x7d   : > { %p4311_p6 = scmp.ne.s32.totalorder %s5639_s8, %s4310_s13  ;;  %p4317_p10 = scmp.lt.u32.totalorder %s4310_s13, %s5639_s8 }
  0x7f   : > { %p4313_p4 = pnand %p4311_p6, %p4690_p13 }
  0x81   : > { %p4314_p8 = pneg %p4313_p4 }
  0x83   : > { %p4319_p3 = pnand %p4317_p10, %p4314_p8 }
  0x85   : > { %4322 = shalt.err (!%p4319_p3)
}
  0x86   : > { %s4323_s20 = scalar_lea.vmem %s4740_s15, 2048  ;;  %p4331_p12 = scmp.lt.s32.totalorder %s4740_s15, %s4740_s15 }
  0x87   : > { %p4324_p5 = scmp.ne.s32.totalorder %s4740_s15, %s4323_s20  ;;  %p4332_p0 = scmp.lt.s32.totalorder %s4323_s20, %s4323_s20 }
  0x89   : > { %p4326_p7 = pnand %p4324_p5, %p4690_p13  ;;  %p4333_p1 = por %p4332_p0, %p4331_p12 }
  0x8b   : > { %p4327_p9 = pneg %p4326_p7 }
  0x8d   : > { %p4334_p2 = pnand %p4333_p1, %p4327_p9 }
  0x8f   : > { %4337 = shalt.err (!%p4334_p2)
}
  0x90   : > { %s5640_s10 = smov 128   ;;  %s4790_s26 = sadd.s32 1, %s4540_s24  }
  0x91   : > { %3715 = dma.hbm_to_vmem [thread:$0]  (!%p4676_p11), %s5639_s8, 2048, %s4740_s15, [#allocation12], %s5640_s10, %s5640_s10, %s5616_s11  }
  0x92   : > { %s41_s14 = ssub.s32 %s4540_s24, %s4790_s26  ;;  %s44_s30 = sadd.s32 1, %s4536_s23 }
  0x93   : > { %p42_p13 = scmp.eq.s32.totalorder %s41_s14, 0  ;;  %p51_p6 = scmp.ne.s32.totalorder %s4536_s23, %s4532_s22 }
  0x94   : > { %p52_p4 = scmp.eq.s32.totalorder %s4540_s24, 0  ;;  %p5642_p10 = scmp.eq.s32.totalorder %s4644_s25, 1 }
  0x95   : > { %s4799_s17 = scalar_select %p42_p13, %s4536_s23, %s44_s30  }
  0x96   : > { %p53_p8 = por %p52_p4, %p51_p6  ;;  %p4803_p3 = por %p5642_p10, %p51_p6 }
  0x97   : > { %5641 = sst [smem:[#allocation27_spill]] %s4799_s17  ;;  %p3737_p5 = scmp.lt.s32.totalorder %s4540_s24, 2 }
  0x98   : > { %s4809_s12 = sand.u32 1, %s4536_s23   ;;  %s3360_s16 = sshll.u32 %s4540_s24, 12 }
  0x99   : > { %s3144_s15 = sshll.u32 %s4809_s12, 8  ;;  %s5644_s0 = sld [smem:[#allocation28_spill]] }
  0x9a   : > { %s421_s18 = scalar_lea.vmem [#allocation2], %s3144_s15  ;;  %p4820_p11 = pnand %p3737_p5, %p53_p8 }
  0x9b   : > { %s429_s14 = sshll.u32 %s421_s18, 4  ;;  %s3148_s4 = sshll.u32 %s4809_s12, 7  ;;  %s4818_s14 = int_to_ptr.vmem [resolvable:$true] %s429_s14 }
  0x9c   : > { %s418_s6 = scalar_lea.sflag [#allocation3], %s4809_s12  ;;  %p4340_p9 = pneg %p4820_p11 }
  0x9f   : > { %s4816_s19 = scalar_lea.hbm %s5644_s0, %s3360_s16  ;;  %s4343_s20 = scalar_lea.hbm %s5644_s0, 8192 }
  0xa0   : > { %s4338_s21 = scalar_lea.hbm %s4816_s19, 4096  ;;  %p4344_p1 = scmp.lt.u32.totalorder %s4816_s19, %s5644_s0 }
  0xa1   : > { %p4339_p7 = scmp.ne.s32.totalorder %s4816_s19, %s4338_s21  ;;  %p4345_p2 = scmp.lt.u32.totalorder %s4343_s20, %s4338_s21 }
  0xa2   : > { %p4347_p6 = scmp.lt.u32.totalorder %s4338_s21, %s4816_s19 }
  0xa3   : > { %p4341_p12 = pnand %p4340_p9, %p4339_p7  ;;  %p4346_p13 = por %p4345_p2, %p4344_p1 }
  0xa5   : > { %p4342_p0 = pneg %p4341_p12  ;;  %p4348_p4 = por %p4347_p6, %p4346_p13 }
  0xa7   : > { %p4349_p8 = pnand %p4348_p4, %p4342_p0 }
  0xa9   : > { %4352 = shalt.err (!%p4349_p8)
}
  0xaa   : > { %s4353_s11 = scalar_lea.vmem %s4818_s14, 4096  ;;  %s4550_s15 = smov [#allocation2]  }
  0xab   : > { %p4354_p10 = scmp.ne.s32.totalorder %s4818_s14, %s4353_s11  ;;  %s4358_s16 = sshll.u32 %s4550_s15, 4  ;;  %s4359_s16 = int_to_ptr.vmem [resolvable:$false] %s4358_s16 }
  0xac   : > { %s4360_s8 = scalar_lea.vmem %s4359_s16, 8192  ;;  %p4361_p12 = scmp.lt.s32.totalorder %s4818_s14, %s4359_s16 }
  0xad   : > { %p4356_p5 = pnand %p4354_p10, %p4340_p9  ;;  %p4362_p1 = scmp.lt.s32.totalorder %s4360_s8, %s4353_s11 }
  0xaf   : > { %p4357_p7 = pneg %p4356_p5  ;;  %p4363_p2 = por %p4362_p1, %p4361_p12 }
  0xb1   : > { %p4364_p13 = pnand %p4363_p2, %p4357_p7 }
  0xb3   : > { %4367 = shalt.err (!%p4364_p13)
}
  0xb4   : > { %s5646_s21 = smov 8   ;;  %s3361_s20 = sshll.u32 %s4540_s24, 11 }
  0xb5   : > { %3719 = dma.hbm_to_vmem [thread:$0]  (!%p4820_p11), %s4816_s19, 4096, %s4818_s14, %s418_s6, %s5640_s10, %s5640_s10, %s5646_s21  }
  0xb6   : > { %s4861_s15 = scalar_lea.hbm %s5589_s1, %s3361_s20  ;;  %s443_s16 = scalar_lea.vmem [#allocation5], %s3148_s4 }
  0xb7   : > { %s450_s8 = sshll.u32 %s443_s16, 4  ;;  %s5647_s0 = sand.u32 1, %s4540_s24   ;;  %s4865_s8 = int_to_ptr.vmem [resolvable:$true] %s450_s8 }
  0xb8   : > { %s4869_s17 = scalar_lea.sflag [#allocation6], %s5647_s0  ;;  %s4368_s23 = scalar_lea.hbm %s4861_s15, 2048 }
  0xb9   : > { %p4369_p0 = scmp.ne.s32.totalorder %s4861_s15, %s4368_s23  ;;  %s4373_s12 = scalar_lea.hbm %s5589_s1, 4096 }
  0xba   : > { %p4374_p8 = scmp.lt.u32.totalorder %s4861_s15, %s5589_s1  ;;  %p4375_p10 = scmp.lt.u32.totalorder %s4373_s12, %s4368_s23 }
  0xbb   : > { %p4371_p6 = pnand %p4369_p0, %p4340_p9  ;;  %p4377_p7 = scmp.lt.u32.totalorder %s4368_s23, %s4861_s15 }
  0xbc   : > { %p4376_p5 = por %p4375_p10, %p4374_p8 }
  0xbd   : > { %p4372_p4 = pneg %p4371_p6 }
  0xbe   : > { %p4378_p12 = por %p4377_p7, %p4376_p5 }
  0xc0   : > { %p4379_p1 = pnand %p4378_p12, %p4372_p4 }
  0xc2   : > { %4382 = shalt.err (!%p4379_p1)
}
  0xc3   : > { %s4383_s0 = scalar_lea.vmem %s4865_s8, 2048  ;;  %s4551_s4 = smov [#allocation5]  }
  0xc4   : > { %p4384_p2 = scmp.ne.s32.totalorder %s4865_s8, %s4383_s0  ;;  %s4388_s21 = sshll.u32 %s4551_s4, 4  ;;  %s4389_s21 = int_to_ptr.vmem [resolvable:$false] %s4388_s21 }
  0xc5   : > { %s4390_s20 = scalar_lea.vmem %s4389_s21, 4096  ;;  %p4391_p6 = scmp.lt.s32.totalorder %s4865_s8, %s4389_s21 }
  0xc6   : > { %p4386_p13 = pnand %p4384_p2, %p4340_p9  ;;  %p4392_p8 = scmp.lt.s32.totalorder %s4390_s20, %s4383_s0 }
  0xc8   : > { %p4387_p0 = pneg %p4386_p13  ;;  %p4393_p10 = por %p4392_p8, %p4391_p6 }
  0xca   : > { %p4394_p5 = pnand %p4393_p10, %p4387_p0 }
  0xcc   : > { %4397 = shalt.err (!%p4394_p5)
}
  0xcd   : > { %3722 = dma.hbm_to_vmem [thread:$0]  (!%p4820_p11), %s4861_s15, 2048, %s4865_s8, %s4869_s17, %s5638_s28, %s5638_s28, %s5637_s2  }
  0xce   : > { %p5648_p9 = scmp.ne.s32.totalorder %s5631_s29, 0 }
  0xcf   : > { %s4901_s23 = sand.u32 (!%p5648_p9), 1, %s4532_s22   ;;  %p5649_p4 = scmp.ne.s32.totalorder (!%p5648_p9), %s5628_s27, 0 }
  0xd0   : > { %462 = sbr.rel (%p5648_p9) target bundleno = 1370 (0x55a), region = 60  ;;  %s4904_s18 = sshll.u32 (!%p5648_p9), %s4901_s23, 8 }
  0xd1   : > { %s465_s30 = scalar_lea.sflag (!%p5648_p9), [#allocation3], %s4901_s23  ;;  %s4908_s11 = scalar_lea.vmem (!%p5648_p9), [#allocation2], %s4904_s18 }
  0xd7   : > { %4499 = dma.done.wait (%p5649_p4), %s465_s30, 4096  }
  0xd8   : > { %4501 = vsyncadd (%p5649_p4), %s465_s30, 4294963200  ;;  %s473_s29 = sand.u32 1, %s4644_s25   ;;  %s3153_s2 = sshll.u32 %s4901_s23, 7 }
  0xd9   : > { %s474_s28 = scalar_lea.sflag [#allocation6], %s473_s29  ;;  %s4918_s17 = scalar_lea.vmem [#allocation5], %s3153_s2 }
  0xda   : > { %4503 = dma.done.wait (%p5649_p4), %s474_s28, 2048  }
  0xdb   : > { %4505 = vsyncadd (%p5649_p4), %s474_s28, 4294965248  ;;  %p5650_p11 = scmp.eq.s32.totalorder %s4644_s25, 0 }
  0xdd   : > { %4507 = dma.done.wait (%p5650_p11), [#allocation6], 2048   ;;  %p5651_p7 = pmov %p5650_p11 }
  0xdf   : > { %4509 = vsyncadd (%p5651_p7), [#allocation6], 4294965248  ;;  %p5652_p12 = pmov %p5651_p7 }
  0xe0   : > { %p5653_p1 = pmov %p5651_p7 }
  0xe1   : > { %4511 = dma.done.wait (%p5652_p12), [#allocation9], 3072  }
  0xe2   : > { %4513 = vsyncadd (%p5653_p1), [#allocation9], 4294964224  ;;  %p5654_p2 = pmov %p5653_p1 }
  0xe3   : > { %p5655_p13 = pmov %p5653_p1 }
  0xe4   : > { %4515 = dma.done.wait (%p5654_p2), [#allocation12], 2048  }
  0xe5   : > { %4517 = vsyncadd (%p5655_p13), [#allocation12], 4294965248  ;;  %v3786_v0 = vld [vmem:[#allocation7 + $0x40] sm:$0xff]   ;;  %v3788_v2 = vld [vmem:[#allocation7 + $0x48] sm:$0xff]   ;;  %v4552_v59 = vmov 0   ;;  %s5040_s6 = scalar_lea.vmem [#allocation14], %s4904_s18 }
  0xe6   : > { %v3787_v1 = vld [vmem:[#allocation7] sm:$0xff]   ;;  %3477 = vmatprep.subr.bf16.mxu0 %v3786_v0  ;;  %v3789_v3 = vld [vmem:[#allocation7 + $0x8] sm:$0xff]   ;;  %v3790_v4 = vld [vmem:[#allocation7 + $0x50] sm:$0xff]   ;;  %1271 = vmatprep.mubr.bf16.mxu1 %v4552_v59  ;;  %s5045_s10 = scalar_lea.vmem [#allocation16], %s4904_s18  ;;  %s5375_s4 = sshll.u32 %s4644_s25, 12 }
  0xe7   : > { %3478 = vmatpush3.bf16.msra.mxu0 %v3787_v1  ;;  %v3791_v5 = vld [vmem:[#allocation7 + $0x10] sm:$0xff]   ;;  %v3792_v6 = vld [vmem:[#allocation7 + $0x58] sm:$0xff]   ;;  %v3794_v8 = vld [vmem:[#allocation7 + $0x60] sm:$0xff]   ;;  %s2926_s21 = sshll.u32 %s5040_s6, 4  ;;  %s5379_s20 = scalar_lea.vmem [#allocation13], %s4904_s18  ;;  %s5389_s21 = int_to_ptr.vmem [resolvable:$true] %s2926_s21 }
  0xe8   : > { %3479 = vmatprep.subr.bf16.mxu0 %v3788_v2  ;;  %v3793_v7 = vld [vmem:[#allocation7 + $0x18] sm:$0xff]   ;;  %v3795_v9 = vld [vmem:[#allocation7 + $0x20] sm:$0xff]   ;;  %v3796_v10 = vld [vmem:[#allocation7 + $0x68] sm:$0xff]   ;;  %s5656_s2 = sld [smem:[#allocation34_spill]]  ;;  %s5395_s18 = scalar_lea.sflag [#allocation15], %s473_s29 }
  0xe9   : > { %v3804_v11 = vld [vmem:[%s4908_s11 + $0x4] ss:$8 sps:$4 sm:$0xff]   ;;  %v3798_v13 = vld [vmem:[#allocation7 + $0x70] sm:$0xff]   ;;  %v3800_v15 = vld [vmem:[#allocation7 + $0x78] sm:$0xff]   ;;  %s4553_s27 = smov [#allocation14]  }
  0xea   : > { %v3797_v12 = vld [vmem:[#allocation7 + $0x28] sm:$0xff]   ;;  %914 = vmatprep.mubr.bf16.mxu0 %v3804_v11  ;;  %v3799_v14 = vld [vmem:[#allocation7 + $0x30] sm:$0xff]   ;;  %v3801_v16 = vld [vmem:[#allocation7 + $0x38] sm:$0xff]   ;;  %s4402_s15 = sshll.u32 %s4553_s27, 4  ;;  %s4403_s15 = int_to_ptr.vmem [resolvable:$false] %s4402_s15 }
  0xeb   : > { %3480 = vmatpush3.bf16.msra.mxu0 %v3789_v3  ;;  %v3802_v17 = vld [vmem:[%s4908_s11] ss:$8 sps:$4 sm:$0xff]   ;;  %v3805_v18 = vld [vmem:[%s4908_s11 + $0x14] ss:$8 sps:$4 sm:$0xff]   ;;  %v3840_v20 = vld [vmem:[#allocation8 + $0x4] ss:$8 sps:$4 sm:$0xff]   ;;  %p4405_p10 = scmp.lt.s32.totalorder %s5389_s21, %s4403_s15 }
  0xec   : > { %3481 = vmatprep.subr.bf16.mxu0 %v3790_v4  ;;  %v3838_v19 = vld [vmem:[#allocation8] ss:$8 sps:$4 sm:$0xff]   ;;  %v3847_v21 = vld [vmem:[#allocation8 + $0x10] ss:$8 sps:$4 sm:$0xff]   ;;  %3661 = vmatprep.subr.bf16.mxu1 %v3840_v20  ;;  %v3849_v22 = vld [vmem:[#allocation8 + $0x14] ss:$8 sps:$4 sm:$0xff]  }
  0xed   : > { %3669 = vmatpush1.bf16.msra.mxu1 %v3838_v19  ;;  %v3807_v23 = vld [vmem:[%s4908_s11 + $0x10] ss:$8 sps:$4 sm:$0xff]   ;;  %v3808_v24 = vld [vmem:[%s4908_s11 + $0x24] ss:$8 sps:$4 sm:$0xff]   ;;  %v3856_v25 = vld [vmem:[#allocation8 + $0x20] ss:$8 sps:$4 sm:$0xff]  }
  0xee   : > { %3662 = vmatprep.subr.bf16.mxu1 %v3849_v22  ;;  %v3858_v26 = vld [vmem:[#allocation8 + $0x24] ss:$8 sps:$4 sm:$0xff]   ;;  %v3861_v27 = vld [vmem:[#allocation8 + $0x34] ss:$8 sps:$4 sm:$0xff]   ;;  %v3859_v28 = vld [vmem:[#allocation8 + $0x30] ss:$8 sps:$4 sm:$0xff]   ;;  %s5386_s28 = scalar_lea.hbm %s5656_s2, %s5375_s4 }
  0xef   : > { %3482 = vmatpush3.bf16.msra.mxu0 %v3791_v5  ;;  %v3864_v29 = vld [vmem:[#allocation8 + $0x44] ss:$8 sps:$4 sm:$0xff]   ;;  %v3810_v30 = vld [vmem:[%s4908_s11 + $0x20] ss:$8 sps:$4 sm:$0xff]   ;;  %v3811_v31 = vld [vmem:[%s4908_s11 + $0x34] ss:$8 sps:$4 sm:$0xff]  }
  0xf0   : > { %3483 = vmatprep.subr.bf16.mxu0 %v3792_v6  ;;  %v3862_v32 = vld [vmem:[#allocation8 + $0x40] ss:$8 sps:$4 sm:$0xff]   ;;  %v3867_v33 = vld [vmem:[#allocation8 + $0x54] ss:$8 sps:$4 sm:$0xff]   ;;  %v3865_v34 = vld [vmem:[#allocation8 + $0x50] ss:$8 sps:$4 sm:$0xff]  }
  0xf1   : > { %3670 = vmatpush1.bf16.msra.mxu1 %v3847_v21  ;;  %v3870_v35 = vld [vmem:[#allocation8 + $0x64] ss:$8 sps:$4 sm:$0xff]   ;;  %v3813_v36 = vld [vmem:[%s4908_s11 + $0x30] ss:$8 sps:$4 sm:$0xff]   ;;  %v3868_v38 = vld [vmem:[#allocation8 + $0x60] ss:$8 sps:$4 sm:$0xff]  }
  0xf2   : > { %3663 = vmatprep.subr.bf16.mxu1 %v3858_v26  ;;  %v3814_v37 = vld [vmem:[%s4908_s11 + $0x44] ss:$8 sps:$4 sm:$0xff]   ;;  %v3873_v39 = vld [vmem:[#allocation8 + $0x74] ss:$8 sps:$4 sm:$0xff]   ;;  %v3871_v40 = vld [vmem:[#allocation8 + $0x70] ss:$8 sps:$4 sm:$0xff]  }
  0xf3   : > { %3484 = vmatpush3.bf16.msra.mxu0 %v3793_v7  ;;  %v3816_v41 = vld [vmem:[%s4908_s11 + $0x40] ss:$8 sps:$4 sm:$0xff]   ;;  %v3817_v42 = vld [vmem:[%s4908_s11 + $0x54] ss:$8 sps:$4 sm:$0xff]   ;;  %v3819_v43 = vld [vmem:[%s4908_s11 + $0x50] ss:$8 sps:$4 sm:$0xff]  }
  0xf4   : > { %3485 = vmatprep.subr.bf16.mxu0 %v3794_v8  ;;  %v3820_v44 = vld [vmem:[%s4908_s11 + $0x64] ss:$8 sps:$4 sm:$0xff]   ;;  %v3822_v45 = vld [vmem:[%s4908_s11 + $0x60] ss:$8 sps:$4 sm:$0xff]   ;;  %v3823_v46 = vld [vmem:[%s4908_s11 + $0x74] ss:$8 sps:$4 sm:$0xff]  }
  0xf5   : > { %3671 = vmatpush1.bf16.msra.mxu1 %v3856_v25  ;;  %v3825_v47 = vld [vmem:[%s4908_s11 + $0x70] ss:$8 sps:$4 sm:$0xff]   ;;  %v3826_v48 = vld [vmem:[%s4908_s11 + $0x84] ss:$8 sps:$4 sm:$0xff]   ;;  %v3828_v49 = vld [vmem:[%s4908_s11 + $0x80] ss:$8 sps:$4 sm:$0xff]  }
  0xf6   : > { %3664 = vmatprep.subr.bf16.mxu1 %v3861_v27  ;;  %v3829_v50 = vld [vmem:[%s4908_s11 + $0x94] ss:$8 sps:$4 sm:$0xff]   ;;  %v3831_v51 = vld [vmem:[%s4908_s11 + $0x90] ss:$8 sps:$4 sm:$0xff]   ;;  %v3832_v52 = vld [vmem:[%s4908_s11 + $0xa4] ss:$8 sps:$4 sm:$0xff]  }
  0xf7   : > { %3486 = vmatpush3.bf16.msra.mxu0 %v3795_v9  ;;  %v3834_v53 = vld [vmem:[%s4908_s11 + $0xa0] ss:$8 sps:$4 sm:$0xff]   ;;  %v3835_v54 = vld [vmem:[%s4908_s11 + $0xb4] ss:$8 sps:$4 sm:$0xff]   ;;  %v3837_v55 = vld [vmem:[%s4908_s11 + $0xb0] ss:$8 sps:$4 sm:$0xff]  }
  0xf8   : > { %3487 = vmatprep.subr.bf16.mxu0 %v3796_v10  ;;  %v3841_v56 = vld [vmem:[%s4908_s11 + $0xc4] ss:$8 sps:$4 sm:$0xff]   ;;  %v3843_v57 = vld [vmem:[%s4908_s11 + $0xc0] ss:$8 sps:$4 sm:$0xff]   ;;  %v3844_v58 = vld [vmem:[%s4908_s11 + $0xd4] ss:$8 sps:$4 sm:$0xff]  }
  0xf9   : > { %3672 = vmatpush1.bf16.msra.mxu1 %v3859_v28  ;;  %v3846_v60 = vld [vmem:[%s4908_s11 + $0xd0] ss:$8 sps:$4 sm:$0xff]   ;;  %v3850_v61 = vld [vmem:[%s4908_s11 + $0xe4] ss:$8 sps:$4 sm:$0xff]   ;;  %v3852_v62 = vld [vmem:[%s4908_s11 + $0xe0] ss:$8 sps:$4 sm:$0xff]  }
  0xfa   : > { %3665 = vmatprep.subr.bf16.mxu1 %v3864_v29  ;;  %v3853_v63 = vld [vmem:[%s4908_s11 + $0xf4] ss:$8 sps:$4 sm:$0xff]   ;;  %v3855_v0 = vld [vmem:[%s4908_s11 + $0xf0] ss:$8 sps:$4 sm:$0xff]   ;;  %v4973_v2 = vld [vmem:[%s5591_s3] ss:$0 sm:$0xff] }
  0xfb   : > { %3488 = vmatpush3.bf16.msra.mxu0 %v3797_v12  ;;  %s4404_s16 = scalar_lea.vmem %s4403_s15, 8192 }
  0xfc   : > { %3489 = vmatprep.subr.bf16.mxu0 %v3798_v13 }
  0xfd   : > { %3673 = vmatpush1.bf16.msra.mxu1 %v3862_v32 }
  0xfe   : > { %3666 = vmatprep.subr.bf16.mxu1 %v3867_v33 }
  0xff   : > { %3490 = vmatpush3.bf16.msra.mxu0 %v3799_v14 }
 0x100   : > { %3491 = vmatprep.subr.bf16.mxu0 %v3800_v15 }
 0x101   : > { %3674 = vmatpush1.bf16.msra.mxu1 %v3865_v34 }
 0x102   : > { %3667 = vmatprep.subr.bf16.mxu1 %v3870_v35 }
 0x103   : > { %3492 = vmatpush3.bf16.msra.mxu0 %v3801_v16 }
 0x104   : > { %1199 = vmatprep.subr.bf16.mxu0 %v3840_v20 }
 0x105   : > { %3675 = vmatpush1.bf16.msra.mxu1 %v3868_v38 }
 0x106   : > { %915 = vmatmul.mubr.bf16.vlgmr.msra.gmra.mrb[0].mxu0 %v3802_v17  ;;  %3668 = vmatprep.subr.bf16.mxu1 %v3873_v39 }
 0x107   : > { %922 = vmatprep.mubr.bf16.mxu0 %v3805_v18  ;;  %1200 = vmatpush1.bf16.msra.mxu0 %v3838_v19 }
 0x108   : > { %1201 = vmatprep.subr.bf16.mxu0 %v3849_v22 }
 0x109   : > { %3676 = vmatpush1.bf16.msra.mxu1 %v3871_v40 }
 0x10b   : > { %1202 = vmatpush1.bf16.msra.mxu0 %v3847_v21 }
 0x10c   : > { %1203 = vmatprep.subr.bf16.mxu0 %v3858_v26 }
 0x10e   : > { %923 = vmatmul.mubr.bf16.gmra.mrb[4].mxu0 %v3807_v23 }
 0x10f   : > { %930 = vmatprep.mubr.bf16.mxu0 %v3808_v24  ;;  %1204 = vmatpush1.bf16.msra.mxu0 %v3856_v25 }
 0x110   : > { %1205 = vmatprep.subr.bf16.mxu0 %v3861_v27 }
 0x113   : > { %1206 = vmatpush1.bf16.msra.mxu0 %v3859_v28 }
 0x114   : > { %1207 = vmatprep.subr.bf16.mxu0 %v3864_v29 }
 0x116   : > { %931 = vmatmul.mubr.bf16.gmra.mrb[8].mxu0 %v3810_v30 }
 0x117   : > { %938 = vmatprep.mubr.bf16.mxu0 %v3811_v31  ;;  %1208 = vmatpush1.bf16.msra.mxu0 %v3862_v32 }
 0x118   : > { %1209 = vmatprep.subr.bf16.mxu0 %v3867_v33 }
 0x11b   : > { %1210 = vmatpush1.bf16.msra.mxu0 %v3865_v34 }
 0x11c   : > { %1211 = vmatprep.subr.bf16.mxu0 %v3870_v35 }
 0x11e   : > { %939 = vmatmul.mubr.bf16.gmra.mrb[12].mxu0 %v3813_v36 }
 0x11f   : > { %946 = vmatprep.mubr.bf16.mxu0 %v3814_v37  ;;  %1212 = vmatpush1.bf16.msra.mxu0 %v3868_v38 }
 0x120   : > { %1213 = vmatprep.subr.bf16.mxu0 %v3873_v39 }
 0x123   : > { %1214 = vmatpush1.bf16.msra.mxu0 %v3871_v40 }
 0x126   : > { %947 = vmatmul.mubr.bf16.gmra.mrb[16].mxu0 %v3816_v41 }
 0x127   : > { %954 = vmatprep.mubr.bf16.mxu0 %v3817_v42 }
 0x12e   : > { %955 = vmatmul.mubr.bf16.gmra.mrb[20].mxu0 %v3819_v43 }
 0x12f   : > { %962 = vmatprep.mubr.bf16.mxu0 %v3820_v44 }
 0x136   : > { %963 = vmatmul.mubr.bf16.gmra.mrb[24].mxu0 %v3822_v45 }
 0x137   : > { %970 = vmatprep.mubr.bf16.mxu0 %v3823_v46 }
 0x13e   : > { %971 = vmatmul.mubr.bf16.gmra.mrb[28].mxu0 %v3825_v47 }
 0x13f   : > { %978 = vmatprep.mubr.bf16.mxu0 %v3826_v48 }
 0x146   : > { %979 = vmatmul.mubr.bf16.gmra.mrb[32].mxu0 %v3828_v49 }
 0x147   : > { %986 = vmatprep.mubr.bf16.mxu0 %v3829_v50 }
 0x14e   : > { %987 = vmatmul.mubr.bf16.gmra.mrb[36].mxu0 %v3831_v51 }
 0x14f   : > { %994 = vmatprep.mubr.bf16.mxu0 %v3832_v52 }
 0x156   : > { %995 = vmatmul.mubr.bf16.gmra.mrb[40].mxu0 %v3834_v53 }
 0x157   : > { %1002 = vmatprep.mubr.bf16.mxu0 %v3835_v54 }
 0x15e   : > { %1003 = vmatmul.mubr.bf16.gmra.mrb[44].mxu0 %v3837_v55 }
 0x15f   : > { %1010 = vmatprep.mubr.bf16.mxu0 %v3841_v56 }
 0x166   : > { %1011 = vmatmul.mubr.bf16.gmra.mrb[48].mxu0 %v3843_v57 }
 0x167   : > { %1018 = vmatprep.mubr.bf16.mxu0 %v3844_v58 }
 0x16e   : > { %1019 = vmatmul.mubr.bf16.gmra.mrb[52].mxu0 %v3846_v60 }
 0x16f   : > { %1026 = vmatprep.mubr.bf16.mxu0 %v3850_v61 }
 0x176   : > { %1027 = vmatmul.mubr.bf16.gmra.mrb[56].mxu0 %v3852_v62 }
 0x177   : > { %1034 = vmatprep.mubr.bf16.mxu0 %v3853_v63 }
 0x17e   : > { %1035 = vmatmul.mubr.bf16.gmra.mrb[60].mxu0 %v3855_v0 }
 0x17f   : > { %1231 = vmatprep.mubr.bf16.mxu0 %v4552_v59 }
 0x1d9   : > { %v3493_v1 = vpop.f32.mrb[0].mxu0 }
 0x1da   : > { %v3494_v3 = vpop.f32.mrb[1].mxu0 }
 0x1db   : > { %v3495_v4 = vadd.f32 %v3494_v3, %v3493_v1  ;;  %v3496_v5 = vpop.f32.mrb[2].mxu0 }
 0x1dc   : > { %v3497_v6 = vpop.f32.mrb[3].mxu0 }
 0x1dd   : > { %v917_v7 = vadd.f32 %v3495_v4, %v4973_v2  ;;  %v3498_v8 = vadd.f32 %v3497_v6, %v3496_v5 }
 0x1df   : > { %v920_v9 = vadd.f32 %v3498_v8, %v4973_v2  ;;  %v1043_v10 = vmax.f32 %v917_v7, 0.0 }
 0x1e1   : > { %v1044_v11 = vmax.f32 %v920_v9, 0.0  ;;  %v3499_v12 = vpop.f32.mrb[4].mxu0 }
 0x1e2   : > { %v3500_v13 = vpop.f32.mrb[5].mxu0 }
 0x1e3   : > { %v1075_v14 = vpack.c.bf16 %v1044_v11, %v1043_v10  ;;  %v3501_v15 = vadd.f32 %v3500_v13, %v3499_v12  ;;  %v3502_v16 = vpop.f32.mrb[6].mxu0 }
 0x1e4   : > { %v3503_v17 = vpop.f32.mrb[7].mxu0 }
 0x1e5   : > { %v925_v18 = vadd.f32 %v3501_v15, %v4973_v2  ;;  %v3504_v19 = vadd.f32 %v3503_v17, %v3502_v16  ;;  %1232 = vmatmul.mubr.bf16.vlgmr.msra.gmra.mrb[64].mxu0 %v1075_v14 }
 0x1e6   : > { %1241 = vmatprep.mubr.bf16.mxu0 %v4552_v59 }
 0x1e7   : > { %v928_v20 = vadd.f32 %v3504_v19, %v4973_v2  ;;  %v1045_v21 = vmax.f32 %v925_v18, 0.0 }
 0x1e9   : > { %v1046_v22 = vmax.f32 %v928_v20, 0.0  ;;  %v3505_v23 = vpop.f32.mrb[8].mxu0 }
 0x1ea   : > { %v3506_v24 = vpop.f32.mrb[9].mxu0 }
 0x1eb   : > { %v3507_v25 = vadd.f32 %v3506_v24, %v3505_v23  ;;  %v3508_v26 = vpop.f32.mrb[10].mxu0  ;;  %v1076_v27 = vpack.c.bf16 %v1046_v22, %v1045_v21 }
 0x1ec   : > { %v3509_v28 = vpop.f32.mrb[11].mxu0 }
 0x1ed   : > { %v933_v29 = vadd.f32 %v3507_v25, %v4973_v2  ;;  %v3510_v30 = vadd.f32 %v3509_v28, %v3508_v26  ;;  %1242 = vmatmul.mubr.bf16.gmra.mrb[68].mxu0 %v1076_v27 }
 0x1ee   : > { %1251 = vmatprep.mubr.bf16.mxu0 %v4552_v59 }
 0x1ef   : > { %v936_v31 = vadd.f32 %v3510_v30, %v4973_v2  ;;  %v1047_v32 = vmax.f32 %v933_v29, 0.0 }
 0x1f1   : > { %v1048_v33 = vmax.f32 %v936_v31, 0.0  ;;  %v3511_v34 = vpop.f32.mrb[12].mxu0 }
 0x1f2   : > { %v3512_v35 = vpop.f32.mrb[13].mxu0 }
 0x1f3   : > { %v3513_v36 = vadd.f32 %v3512_v35, %v3511_v34  ;;  %v3514_v37 = vpop.f32.mrb[14].mxu0  ;;  %v1077_v38 = vpack.c.bf16 %v1048_v33, %v1047_v32 }
 0x1f4   : > { %v3515_v39 = vpop.f32.mrb[15].mxu0 }
 0x1f5   : > { %v941_v40 = vadd.f32 %v3513_v36, %v4973_v2  ;;  %v3516_v41 = vadd.f32 %v3515_v39, %v3514_v37  ;;  %1252 = vmatmul.mubr.bf16.gmra.mrb[72].mxu0 %v1077_v38 }
 0x1f6   : > { %1261 = vmatprep.mubr.bf16.mxu0 %v4552_v59 }
 0x1f7   : > { %v944_v42 = vadd.f32 %v3516_v41, %v4973_v2  ;;  %v1049_v43 = vmax.f32 %v941_v40, 0.0 }
 0x1f9   : > { %v1050_v44 = vmax.f32 %v944_v42, 0.0  ;;  %v3517_v45 = vpop.f32.mrb[16].mxu0 }
 0x1fa   : > { %v3518_v46 = vpop.f32.mrb[17].mxu0 }
 0x1fb   : > { %v3519_v47 = vadd.f32 %v3518_v46, %v3517_v45  ;;  %v3520_v48 = vpop.f32.mrb[18].mxu0  ;;  %v1078_v49 = vpack.c.bf16 %v1050_v44, %v1049_v43 }
 0x1fc   : > { %v3521_v50 = vpop.f32.mrb[19].mxu0 }
 0x1fd   : > { %v949_v51 = vadd.f32 %v3519_v47, %v4973_v2  ;;  %v3522_v52 = vadd.f32 %v3521_v50, %v3520_v48  ;;  %1262 = vmatmul.mubr.bf16.gmra.mrb[76].mxu0 %v1078_v49 }
 0x1ff   : > { %v952_v53 = vadd.f32 %v3522_v52, %v4973_v2  ;;  %v1051_v54 = vmax.f32 %v949_v51, 0.0 }
 0x201   : > { %v1052_v55 = vmax.f32 %v952_v53, 0.0  ;;  %v3523_v56 = vpop.f32.mrb[20].mxu0 }
 0x202   : > { %v3524_v57 = vpop.f32.mrb[21].mxu0 }
 0x203   : > { %v3525_v58 = vadd.f32 %v3524_v57, %v3523_v56  ;;  %v3526_v60 = vpop.f32.mrb[22].mxu0  ;;  %v1079_v61 = vpack.c.bf16 %v1052_v55, %v1051_v54 }
 0x204   : > { %v3527_v62 = vpop.f32.mrb[23].mxu0 }
 0x205   : > { %v957_v63 = vadd.f32 %v3525_v58, %v4973_v2  ;;  %v3528_v0 = vadd.f32 %v3527_v62, %v3526_v60  ;;  %1272 = vmatmul.mubr.bf16.vlgmr.msra.gmra.mrb[0].mxu1 %v1079_v61 }
 0x206   : > { %1281 = vmatprep.mubr.bf16.mxu1 %v4552_v59 }
 0x207   : > { %v960_v1 = vadd.f32 %v3528_v0, %v4973_v2  ;;  %v1053_v3 = vmax.f32 %v957_v63, 0.0 }
 0x209   : > { %v1054_v4 = vmax.f32 %v960_v1, 0.0  ;;  %v3529_v5 = vpop.f32.mrb[24].mxu0 }
 0x20a   : > { %v3530_v6 = vpop.f32.mrb[25].mxu0 }
 0x20b   : > { %v3531_v7 = vadd.f32 %v3530_v6, %v3529_v5  ;;  %v3532_v8 = vpop.f32.mrb[26].mxu0  ;;  %v1080_v9 = vpack.c.bf16 %v1054_v4, %v1053_v3 }
 0x20c   : > { %v3533_v10 = vpop.f32.mrb[27].mxu0 }
 0x20d   : > { %v965_v11 = vadd.f32 %v3531_v7, %v4973_v2  ;;  %v3534_v12 = vadd.f32 %v3533_v10, %v3532_v8  ;;  %1282 = vmatmul.mubr.bf16.gmra.mrb[4].mxu1 %v1080_v9  ;;  %v3874_v10 = vld [vmem:[#allocation10] sm:$0xff]  }
 0x20e   : > { %1291 = vmatprep.mubr.bf16.mxu1 %v4552_v59  ;;  %3613 = vmatprep.subr.bf16.mxu0 %v3874_v10 }
 0x20f   : > { %v968_v13 = vadd.f32 %v3534_v12, %v4973_v2  ;;  %v1055_v14 = vmax.f32 %v965_v11, 0.0  ;;  %3614 = vmatpush3.bf16.msra.mxu0 %v3874_v10 }
 0x211   : > { %v1056_v15 = vmax.f32 %v968_v13, 0.0  ;;  %v3535_v16 = vpop.f32.mrb[28].mxu0 }
 0x212   : > { %v3536_v17 = vpop.f32.mrb[29].mxu0 }
 0x213   : > { %v3537_v18 = vadd.f32 %v3536_v17, %v3535_v16  ;;  %v3538_v19 = vpop.f32.mrb[30].mxu0  ;;  %v1081_v20 = vpack.c.bf16 %v1056_v15, %v1055_v14 }
 0x214   : > { %v3539_v21 = vpop.f32.mrb[31].mxu0 }
 0x215   : > { %v973_v22 = vadd.f32 %v3537_v18, %v4973_v2  ;;  %v3540_v23 = vadd.f32 %v3539_v21, %v3538_v19  ;;  %1292 = vmatmul.mubr.bf16.gmra.mrb[8].mxu1 %v1081_v20  ;;  %v3875_v18 = vld [vmem:[#allocation10 + $0x8] sm:$0xff]  }
 0x216   : > { %1301 = vmatprep.mubr.bf16.mxu1 %v4552_v59  ;;  %3615 = vmatprep.subr.bf16.mxu0 %v3875_v18 }
 0x217   : > { %v976_v24 = vadd.f32 %v3540_v23, %v4973_v2  ;;  %v1057_v25 = vmax.f32 %v973_v22, 0.0  ;;  %3616 = vmatpush3.bf16.msra.mxu0 %v3875_v18  ;;  %v3876_v23 = vld [vmem:[#allocation10 + $0x10] sm:$0xff]  }
 0x218   : > { %3617 = vmatprep.subr.bf16.mxu0 %v3876_v23 }
 0x219   : > { %v1058_v26 = vmax.f32 %v976_v24, 0.0  ;;  %v3541_v27 = vpop.f32.mrb[32].mxu0 }
 0x21a   : > { %v3542_v28 = vpop.f32.mrb[33].mxu0 }
 0x21b   : > { %v3543_v29 = vadd.f32 %v3542_v28, %v3541_v27  ;;  %v3544_v30 = vpop.f32.mrb[34].mxu0  ;;  %v1082_v31 = vpack.c.bf16 %v1058_v26, %v1057_v25  ;;  %3618 = vmatpush3.bf16.msra.mxu0 %v3876_v23 }
 0x21c   : > { %v3545_v32 = vpop.f32.mrb[35].mxu0 }
 0x21d   : > { %v981_v33 = vadd.f32 %v3543_v29, %v4973_v2  ;;  %v3546_v34 = vadd.f32 %v3545_v32, %v3544_v30  ;;  %1302 = vmatmul.mubr.bf16.gmra.mrb[12].mxu1 %v1082_v31  ;;  %v3877_v31 = vld [vmem:[#allocation10 + $0x18] sm:$0xff]  }
 0x21e   : > { %1311 = vmatprep.mubr.bf16.mxu1 %v4552_v59  ;;  %3619 = vmatprep.subr.bf16.mxu0 %v3877_v31 }
 0x21f   : > { %v984_v35 = vadd.f32 %v3546_v34, %v4973_v2  ;;  %v1059_v36 = vmax.f32 %v981_v33, 0.0  ;;  %3620 = vmatpush3.bf16.msra.mxu0 %v3877_v31 }
 0x221   : > { %v1060_v37 = vmax.f32 %v984_v35, 0.0  ;;  %v3547_v38 = vpop.f32.mrb[36].mxu0 }
 0x222   : > { %v3548_v39 = vpop.f32.mrb[37].mxu0 }
 0x223   : > { %v3549_v40 = vadd.f32 %v3548_v39, %v3547_v38  ;;  %v3550_v41 = vpop.f32.mrb[38].mxu0  ;;  %v1083_v42 = vpack.c.bf16 %v1060_v37, %v1059_v36  ;;  %v3878_v36 = vld [vmem:[#allocation10 + $0x20] sm:$0xff]  }
 0x224   : > { %v3551_v43 = vpop.f32.mrb[39].mxu0  ;;  %3621 = vmatprep.subr.bf16.mxu0 %v3878_v36 }
 0x225   : > { %v989_v44 = vadd.f32 %v3549_v40, %v4973_v2  ;;  %v3552_v45 = vadd.f32 %v3551_v43, %v3550_v41  ;;  %1312 = vmatmul.mubr.bf16.gmra.mrb[16].mxu1 %v1083_v42  ;;  %3622 = vmatpush3.bf16.msra.mxu0 %v3878_v36 }
 0x226   : > { %1321 = vmatprep.mubr.bf16.mxu1 %v4552_v59 }
 0x227   : > { %v992_v46 = vadd.f32 %v3552_v45, %v4973_v2  ;;  %v1061_v47 = vmax.f32 %v989_v44, 0.0  ;;  %v3879_v44 = vld [vmem:[#allocation10 + $0x28] sm:$0xff]  }
 0x228   : > { %3623 = vmatprep.subr.bf16.mxu0 %v3879_v44 }
 0x229   : > { %v1062_v48 = vmax.f32 %v992_v46, 0.0  ;;  %v3553_v49 = vpop.f32.mrb[40].mxu0  ;;  %3624 = vmatpush3.bf16.msra.mxu0 %v3879_v44 }
 0x22a   : > { %v3554_v50 = vpop.f32.mrb[41].mxu0 }
 0x22b   : > { %v3555_v51 = vadd.f32 %v3554_v50, %v3553_v49  ;;  %v3556_v52 = vpop.f32.mrb[42].mxu0  ;;  %v1084_v53 = vpack.c.bf16 %v1062_v48, %v1061_v47  ;;  %v3880_v49 = vld [vmem:[#allocation10 + $0x30] sm:$0xff]  }
 0x22c   : > { %v3557_v54 = vpop.f32.mrb[43].mxu0  ;;  %3625 = vmatprep.subr.bf16.mxu0 %v3880_v49 }
 0x22d   : > { %v997_v55 = vadd.f32 %v3555_v51, %v4973_v2  ;;  %v3558_v56 = vadd.f32 %v3557_v54, %v3556_v52  ;;  %1322 = vmatmul.mubr.bf16.gmra.mrb[20].mxu1 %v1084_v53  ;;  %3626 = vmatpush3.bf16.msra.mxu0 %v3880_v49 }
 0x22e   : > { %1331 = vmatprep.mubr.bf16.mxu1 %v4552_v59 }
 0x22f   : > { %v1000_v57 = vadd.f32 %v3558_v56, %v4973_v2  ;;  %v1063_v58 = vmax.f32 %v997_v55, 0.0 }
 0x231   : > { %v1064_v60 = vmax.f32 %v1000_v57, 0.0  ;;  %v3559_v61 = vpop.f32.mrb[44].mxu0  ;;  %v3881_v57 = vld [vmem:[#allocation10 + $0x38] sm:$0xff]  }
 0x232   : > { %v3560_v62 = vpop.f32.mrb[45].mxu0  ;;  %3627 = vmatprep.subr.bf16.mxu0 %v3881_v57 }
 0x233   : > { %v3561_v63 = vadd.f32 %v3560_v62, %v3559_v61  ;;  %v3562_v0 = vpop.f32.mrb[46].mxu0  ;;  %v1085_v1 = vpack.c.bf16 %v1064_v60, %v1063_v58  ;;  %3628 = vmatpush3.bf16.msra.mxu0 %v3881_v57 }
 0x234   : > { %v3563_v3 = vpop.f32.mrb[47].mxu0 }
 0x235   : > { %v1005_v4 = vadd.f32 %v3561_v63, %v4973_v2  ;;  %v3564_v5 = vadd.f32 %v3563_v3, %v3562_v0  ;;  %1332 = vmatmul.mubr.bf16.gmra.mrb[24].mxu1 %v1085_v1  ;;  %v1109_v63 = vlaneseq  ;;  %v1107_v3 = vld [vmem:[%s5593_s5] sm:$0x3] }
 0x236   : > { %1341 = vmatprep.mubr.bf16.mxu1 %v4552_v59 }
 0x237   : > { %v1008_v6 = vadd.f32 %v3564_v5, %v4973_v2  ;;  %v1065_v7 = vmax.f32 %v1005_v4, 0.0  ;;  %v5022_v0 = vshrl.u32 %v1109_v63, 7 }
 0x239   : > { %v1066_v8 = vmax.f32 %v1008_v6, 0.0  ;;  %v3565_v9 = vpop.f32.mrb[48].mxu0  ;;  %v1111_v1 = vsub.s32 0, %v5022_v0 }
 0x23a   : > { %v3566_v11 = vpop.f32.mrb[49].mxu0 }
 0x23b   : > { %v3567_v12 = vadd.f32 %v3566_v11, %v3565_v9  ;;  %v3568_v13 = vpop.f32.mrb[50].mxu0  ;;  %v1086_v14 = vpack.c.bf16 %v1066_v8, %v1065_v7  ;;  %v5031_v4 = vrot.slane %v1107_v3, %v1111_v1 }
 0x23c   : > { %v3569_v15 = vpop.f32.mrb[51].mxu0 }
 0x23d   : > { %v1013_v16 = vadd.f32 %v3567_v12, %v4973_v2  ;;  %v3570_v17 = vadd.f32 %v3569_v15, %v3568_v13  ;;  %1342 = vmatmul.mubr.bf16.gmra.mrb[28].mxu1 %v1086_v14 }
 0x23e   : > { %1351 = vmatprep.mubr.bf16.mxu1 %v4552_v59 }
 0x23f   : > { %v1016_v19 = vadd.f32 %v3570_v17, %v4973_v2  ;;  %v1067_v20 = vmax.f32 %v1013_v16, 0.0 }
 0x241   : > { %v1068_v21 = vmax.f32 %v1016_v19, 0.0  ;;  %v3571_v22 = vpop.f32.mrb[52].mxu0 }
 0x242   : > { %v3572_v24 = vpop.f32.mrb[53].mxu0 }
 0x243   : > { %v3573_v25 = vadd.f32 %v3572_v24, %v3571_v22  ;;  %v3574_v26 = vpop.f32.mrb[54].mxu0  ;;  %v1087_v27 = vpack.c.bf16 %v1068_v21, %v1067_v20 }
 0x244   : > { %v3575_v28 = vpop.f32.mrb[55].mxu0 }
 0x245   : > { %v1021_v29 = vadd.f32 %v3573_v25, %v4973_v2  ;;  %v3576_v30 = vadd.f32 %v3575_v28, %v3574_v26  ;;  %1352 = vmatmul.mubr.bf16.gmra.mrb[32].mxu1 %v1087_v27  ;;  %v3399_v27 = vld [vmem:[%s4918_s17] sm:$0xff]  }
 0x246   : > { %1361 = vmatprep.mubr.bf16.mxu1 %v4552_v59 }
 0x247   : > { %v1024_v32 = vadd.f32 %v3576_v30, %v4973_v2  ;;  %v1069_v33 = vmax.f32 %v1021_v29, 0.0  ;;  %v3400_v30 = vunpack.c.l.bf16 %v3399_v27 }
 0x249   : > { %v1070_v34 = vmax.f32 %v1024_v32, 0.0  ;;  %v3577_v35 = vpop.f32.mrb[56].mxu0 }
 0x24a   : > { %v3578_v37 = vpop.f32.mrb[57].mxu0 }
 0x24b   : > { %v3579_v38 = vadd.f32 %v3578_v37, %v3577_v35  ;;  %v3580_v39 = vpop.f32.mrb[58].mxu0  ;;  %v1088_v40 = vpack.c.bf16 %v1070_v34, %v1069_v33  ;;  %v3401_v35 = vunpack.c.h.bf16 %v3399_v27 }
 0x24c   : > { %v3581_v41 = vpop.f32.mrb[59].mxu0 }
 0x24d   : > { %v1029_v42 = vadd.f32 %v3579_v38, %v4973_v2  ;;  %v3582_v43 = vadd.f32 %v3581_v41, %v3580_v39  ;;  %1362 = vmatmul.mubr.bf16.gmra.mrb[36].mxu1 %v1088_v40 }
 0x24e   : > { %1371 = vmatprep.mubr.bf16.mxu1 %v4552_v59 }
 0x24f   : > { %v1032_v45 = vadd.f32 %v3582_v43, %v4973_v2  ;;  %v1071_v46 = vmax.f32 %v1029_v42, 0.0  ;;  %v3882_v42 = vld [vmem:[#allocation11] ss:$8 sps:$4 sm:$0xff]   ;;  %v3884_v43 = vld [vmem:[#allocation11 + $0x4] ss:$8 sps:$4 sm:$0xff]  }
 0x250   : > { %2020 = vmatprep.subr.bf16.mxu1 %v3884_v43 }
 0x251   : > { %v1072_v47 = vmax.f32 %v1032_v45, 0.0  ;;  %v3583_v48 = vpop.f32.mrb[60].mxu0  ;;  %v3462_v45 = vld [vmem:[%s4918_s17 + $0x8] sm:$0xff]   ;;  %2021 = vmatpush1.bf16.msra.mxu1 %v3882_v42 }
 0x252   : > { %v3584_v50 = vpop.f32.mrb[61].mxu0 }
 0x253   : > { %v3585_v51 = vadd.f32 %v3584_v50, %v3583_v48  ;;  %v3586_v52 = vpop.f32.mrb[62].mxu0  ;;  %v1089_v53 = vpack.c.bf16 %v1072_v47, %v1071_v46  ;;  %v3887_v48 = vld [vmem:[#allocation11 + $0x14] ss:$8 sps:$4 sm:$0xff]  }
 0x254   : > { %v3587_v54 = vpop.f32.mrb[63].mxu0  ;;  %2022 = vmatprep.subr.bf16.mxu1 %v3887_v48 }
 0x255   : > { %v1037_v55 = vadd.f32 %v3585_v51, %v4973_v2  ;;  %v3588_v56 = vadd.f32 %v3587_v54, %v3586_v52  ;;  %1372 = vmatmul.mubr.bf16.gmra.mrb[40].mxu1 %v1089_v53  ;;  %v3885_v53 = vld [vmem:[#allocation11 + $0x10] ss:$8 sps:$4 sm:$0xff]   ;;  %v3404_v54 = vunpack.c.l.bf16 %v3462_v45 }
 0x256   : > { %1381 = vmatprep.mubr.bf16.mxu1 %v4552_v59  ;;  %2023 = vmatpush1.bf16.msra.mxu1 %v3885_v53 }
 0x257   : > { %v1040_v58 = vadd.f32 %v3588_v56, %v4973_v2  ;;  %v1073_v60 = vmax.f32 %v1037_v55, 0.0  ;;  %v1115_v2 = vsub.s32 1, %v5022_v0  ;;  %v3890_v56 = vld [vmem:[#allocation11 + $0x24] ss:$8 sps:$4 sm:$0xff]  }
 0x258   : > { %2024 = vmatprep.subr.bf16.mxu1 %v3890_v56 }
 0x259   : > { %v1074_v61 = vmax.f32 %v1040_v58, 0.0  ;;  %v5035_v5 = vrot.slane %v1107_v3, %v1115_v2 }
 0x25b   : > { %v1090_v62 = vpack.c.bf16 %v1074_v61, %v1073_v60  ;;  %v3405_v60 = vunpack.c.h.bf16 %v3462_v45 }
 0x25d   : > { %1382 = vmatmul.mubr.bf16.gmra.mrb[44].mxu1 %v1090_v62 }
 0x25e   : > { %2052 = vmatprep.mubr.bf16.mxu1 %v4552_v59 }
 0x2b8   : > { %v1233_v6 = vpop.f32.mrb[64].mxu0 }
 0x2b9   : > { %v1234_v7 = vadd.f32 %v1233_v6, %v5031_v4  ;;  %v1235_v8 = vpop.f32.mrb[65].mxu0 }
 0x2ba   : > { %v1236_v9 = vadd.f32 %v1235_v8, %v5035_v5  ;;  %v1237_v10 = vpop.f32.mrb[66].mxu0  ;;  %v3888_v8 = vld [vmem:[#allocation11 + $0x20] ss:$8 sps:$4 sm:$0xff]  }
 0x2bb   : > { %2821 = vst [vmem:[%s5040_s6] sm:$0xff] %v1234_v7  ;;  %v1238_v11 = vadd.f32 %v1237_v10, %v5031_v4  ;;  %v1239_v12 = vpop.f32.mrb[67].mxu0  ;;  %2025 = vmatpush1.bf16.msra.mxu1 %v3888_v8 }
 0x2bc   : > { %v1456_v13 = vmul.f32 0.5, %v1236_v9  ;;  %2853 = vst [vmem:[%s5045_s10] sm:$0xff] %v1236_v9  ;;  %v1240_v14 = vadd.f32 %v1239_v12, %v5035_v5  ;;  %v3893_v12 = vld [vmem:[#allocation11 + $0x34] ss:$8 sps:$4 sm:$0xff]  }
 0x2bd   : > { %2822 = vst [vmem:[%s5040_s6 + $0x8] sm:$0xff] %v1238_v11  ;;  %2026 = vmatprep.subr.bf16.mxu1 %v3893_v12  ;;  %v3465_v12 = vld [vmem:[%s4918_s17 + $0x20] sm:$0xff]  }
 0x2be   : > { %v1488_v15 = vmul.f32 1.442695, %v1456_v13  ;;  %v1457_v16 = vmul.f32 0.5, %v1240_v14  ;;  %2854 = vst [vmem:[%s5045_s10 + $0x8] sm:$0xff] %v1240_v14 }
 0x2c0   : > { %3906 = vpow2.f32 %v1488_v15  ;;  %v1490_v17 = vmul.f32 1.442695, %v1457_v16  ;;  %v1243_v18 = vpop.f32.mrb[68].mxu0  ;;  %v3463_v16 = vld [vmem:[%s4918_s17 + $0x10] sm:$0xff]  }
 0x2c1   : > { %v5052_v19 = vadd.f32 %v1243_v18, %v5031_v4  ;;  %v1245_v20 = vpop.f32.mrb[69].mxu0 }
 0x2c2   : > { %3908 = vpow2.f32 %v1490_v17  ;;  %v1246_v21 = vadd.f32 %v1245_v20, %v5035_v5  ;;  %v1247_v22 = vpop.f32.mrb[70].mxu0 }
 0x2c3   : > { %2823 = vst [vmem:[%s5040_s6 + $0x10] sm:$0xff] %v5052_v19  ;;  %v5058_v23 = vadd.f32 %v1247_v22, %v5031_v4  ;;  %v1249_v24 = vpop.f32.mrb[71].mxu0  ;;  %v3891_v22 = vld [vmem:[#allocation11 + $0x30] ss:$8 sps:$4 sm:$0xff]  }
 0x2c4   : > { %v1458_v25 = vmul.f32 0.5, %v1246_v21  ;;  %2855 = vst [vmem:[%s5045_s10 + $0x10] sm:$0xff] %v1246_v21  ;;  %v1250_v26 = vadd.f32 %v1249_v24, %v5035_v5  ;;  %2027 = vmatpush1.bf16.msra.mxu1 %v3891_v22 }
 0x2c5   : > { %2824 = vst [vmem:[%s5040_s6 + $0x18] sm:$0xff] %v5058_v23 }
 0x2c6   : > { %v1492_v28 = vmul.f32 1.442695, %v1458_v25  ;;  %v1459_v29 = vmul.f32 0.5, %v1250_v26  ;;  %2856 = vst [vmem:[%s5045_s10 + $0x18] sm:$0xff] %v1250_v26  ;;  %v3408_v25 = vunpack.c.l.bf16 %v3463_v16  ;;  %v3896_v26 = vld [vmem:[#allocation11 + $0x44] ss:$8 sps:$4 sm:$0xff]  }
 0x2c7   : > { %2028 = vmatprep.subr.bf16.mxu1 %v3896_v26 }
 0x2c8   : > { %3910 = vpow2.f32 %v1492_v28  ;;  %v1494_v31 = vmul.f32 1.442695, %v1459_v29  ;;  %v1253_v32 = vpop.f32.mrb[72].mxu0 }
 0x2c9   : > { %v5067_v33 = vadd.f32 %v1253_v32, %v5031_v4  ;;  %v1255_v34 = vpop.f32.mrb[73].mxu0 }
 0x2ca   : > { %v3907_v36 = vpop.eup %3906  ;;  %3912 = vpow2.f32 %v1494_v31  ;;  %v1256_v37 = vadd.f32 %v1255_v34, %v5035_v5  ;;  %v1257_v38 = vpop.f32.mrb[74].mxu0 }
 0x2cb   : > { %2825 = vst [vmem:[%s5040_s6 + $0x20] sm:$0xff] %v5067_v33  ;;  %v5073_v39 = vadd.f32 %v1257_v38, %v5031_v4  ;;  %v1259_v40 = vpop.f32.mrb[75].mxu0  ;;  %v1552_v41 = vmul.f32 %v3907_v36, %v3400_v30 }
 0x2cc   : > { %v3909_v44 = vpop.eup %3908  ;;  %v1460_v46 = vmul.f32 0.5, %v1256_v37  ;;  %2857 = vst [vmem:[%s5045_s10 + $0x20] sm:$0xff] %v1256_v37  ;;  %v1260_v47 = vadd.f32 %v1259_v40, %v5035_v5  ;;  %v3899_v40 = vld [vmem:[#allocation11 + $0x54] ss:$8 sps:$4 sm:$0xff]  }
 0x2cd   : > { %2826 = vst [vmem:[%s5040_s6 + $0x28] sm:$0xff] %v5073_v39  ;;  %v1553_v49 = vmul.f32 %v3909_v44, %v3401_v35  ;;  %v1584_v50 = vadd.f32 %v1552_v41, %v1234_v7  ;;  %v3894_v35 = vld [vmem:[#allocation11 + $0x40] ss:$8 sps:$4 sm:$0xff]   ;;  %v3464_v44 = vld [vmem:[%s4918_s17 + $0x18] sm:$0xff]  }
 0x2ce   : > { %v1496_v51 = vmul.f32 1.442695, %v1460_v46  ;;  %v1461_v52 = vmul.f32 0.5, %v1260_v47  ;;  %2858 = vst [vmem:[%s5045_s10 + $0x28] sm:$0xff] %v1260_v47  ;;  %2029 = vmatpush1.bf16.msra.mxu1 %v3894_v35  ;;  %v3466_v35 = vld [vmem:[%s4918_s17 + $0x28] sm:$0xff]  }
 0x2cf   : > { %v1585_v55 = vadd.f32 %v1553_v49, %v1238_v11  ;;  %v3897_v49 = vld [vmem:[#allocation11 + $0x50] ss:$8 sps:$4 sm:$0xff]   ;;  %2030 = vmatprep.subr.bf16.mxu1 %v3899_v40 }
 0x2d0   : > { %3914 = vpow2.f32 %v1496_v51  ;;  %v1498_v57 = vmul.f32 1.442695, %v1461_v52  ;;  %v1263_v58 = vpop.f32.mrb[76].mxu0  ;;  %v3412_v51 = vunpack.c.l.bf16 %v3464_v44  ;;  %v3902_v52 = vld [vmem:[#allocation11 + $0x64] ss:$8 sps:$4 sm:$0xff]  }
 0x2d1   : > { %v5082_v61 = vadd.f32 %v1263_v58, %v5031_v4  ;;  %v1265_v62 = vpop.f32.mrb[77].mxu0  ;;  %v1616_v63 = vpack.c.bf16 %v1585_v55, %v1584_v50 }
 0x2d2   : > { %v3911_v3 = vpop.eup %3910  ;;  %3916 = vpow2.f32 %v1498_v57  ;;  %v1266_v6 = vadd.f32 %v1265_v62, %v5035_v5  ;;  %v1267_v7 = vpop.f32.mrb[78].mxu0  ;;  %2031 = vmatpush1.bf16.msra.mxu1 %v3897_v49  ;;  %v3900_v62 = vld [vmem:[#allocation11 + $0x60] ss:$8 sps:$4 sm:$0xff]   ;;  %v3421_v49 = vunpack.c.h.bf16 %v3466_v35 }
 0x2d3   : > { %v1554_v9 = vmul.f32 %v3911_v3, %v3404_v54  ;;  %2827 = vst [vmem:[%s5040_s6 + $0x30] sm:$0xff] %v5082_v61  ;;  %v5088_v10 = vadd.f32 %v1267_v7, %v5031_v4  ;;  %v1269_v11 = vpop.f32.mrb[79].mxu0  ;;  %3629 = vmatprep.mubr.bf16.mxu0 %v1616_v63  ;;  %2032 = vmatprep.subr.bf16.mxu1 %v3902_v52  ;;  %v3905_v7 = vld [vmem:[#allocation11 + $0x74] ss:$8 sps:$4 sm:$0xff]  }
 0x2d4   : > { %v3913_v13 = vpop.eup %3912  ;;  %v1462_v14 = vmul.f32 0.5, %v1266_v6  ;;  %2859 = vst [vmem:[%s5045_s10 + $0x30] sm:$0xff] %v1266_v6  ;;  %v1270_v15 = vadd.f32 %v1269_v11, %v5035_v5 }
 0x2d5   : > { %v1555_v17 = vmul.f32 %v3913_v13, %v3405_v60  ;;  %2828 = vst [vmem:[%s5040_s6 + $0x38] sm:$0xff] %v5088_v10  ;;  %v1586_v18 = vadd.f32 %v1554_v9, %v5052_v19  ;;  %v3409_v19 = vunpack.c.h.bf16 %v3463_v16 }
 0x2d6   : > { %v1500_v20 = vmul.f32 1.442695, %v1462_v14  ;;  %v1463_v21 = vmul.f32 0.5, %v1270_v15  ;;  %2860 = vst [vmem:[%s5045_s10 + $0x38] sm:$0xff] %v1270_v15  ;;  %2033 = vmatpush1.bf16.msra.mxu1 %v3900_v62 }
 0x2d7   : > { %v1587_v24 = vadd.f32 %v1555_v17, %v5058_v23  ;;  %v3903_v17 = vld [vmem:[#allocation11 + $0x70] ss:$8 sps:$4 sm:$0xff]   ;;  %2034 = vmatprep.subr.bf16.mxu1 %v3905_v7 }
 0x2d8   : > { %3918 = vpow2.f32 %v1500_v20  ;;  %v1502_v27 = vmul.f32 1.442695, %v1463_v21  ;;  %v1273_v28 = vpop.f32.mrb[0].mxu1  ;;  %v3416_v20 = vunpack.c.l.bf16 %v3465_v12 }
 0x2d9   : > { %v5099_v29 = vadd.f32 %v1273_v28, %v5031_v4  ;;  %v1275_v30 = vpop.f32.mrb[1].mxu1  ;;  %v1617_v31 = vpack.c.bf16 %v1587_v24, %v1586_v18 }
 0x2da   : > { %v3915_v32 = vpop.eup %3914  ;;  %3920 = vpow2.f32 %v1502_v27  ;;  %v1276_v34 = vadd.f32 %v1275_v30, %v5035_v5  ;;  %v1277_v23 = vpop.f32.mrb[2].mxu1  ;;  %2035 = vmatpush1.bf16.msra.mxu1 %v3903_v17 }
 0x2db   : > { %2829 = vst [vmem:[%s5040_s6 + $0x40] sm:$0xff] %v5099_v29  ;;  %v5105_v36 = vadd.f32 %v1277_v23, %v5031_v4  ;;  %v1279_v37 = vpop.f32.mrb[3].mxu1  ;;  %3630 = vmatmul.mubr.bf16.vlgmr.msra.gmra.mrb[80].mxu0 %v1617_v31  ;;  %v1556_v38 = vmul.f32 %v3915_v32, %v3408_v25 }
 0x2dc   : > { %v3917_v41 = vpop.eup %3916  ;;  %v1464_v42 = vmul.f32 0.5, %v1276_v34  ;;  %2861 = vst [vmem:[%s5045_s10 + $0x40] sm:$0xff] %v1276_v34  ;;  %v1280_v43 = vadd.f32 %v1279_v37, %v5035_v5 }
 0x2dd   : > { %2830 = vst [vmem:[%s5040_s6 + $0x48] sm:$0xff] %v5105_v36  ;;  %v1557_v45 = vmul.f32 %v3917_v41, %v3409_v19  ;;  %v1588_v46 = vadd.f32 %v1556_v38, %v5067_v33  ;;  %v3413_v33 = vunpack.c.h.bf16 %v3464_v44 }
 0x2de   : > { %v1504_v47 = vmul.f32 1.442695, %v1464_v42  ;;  %v1465_v48 = vmul.f32 0.5, %v1280_v43  ;;  %2862 = vst [vmem:[%s5045_s10 + $0x48] sm:$0xff] %v1280_v43  ;;  %v3420_v43 = vunpack.c.l.bf16 %v3466_v35 }
 0x2df   : > { %v1589_v50 = vadd.f32 %v1557_v45, %v5073_v39 }
 0x2e0   : > { %3922 = vpow2.f32 %v1504_v47  ;;  %v1506_v53 = vmul.f32 1.442695, %v1465_v48  ;;  %v1283_v54 = vpop.f32.mrb[4].mxu1 }
 0x2e1   : > { %v5116_v55 = vadd.f32 %v1283_v54, %v5031_v4  ;;  %v1285_v56 = vpop.f32.mrb[5].mxu1  ;;  %v1618_v57 = vpack.c.bf16 %v1589_v50, %v1588_v46 }
 0x2e2   : > { %v3919_v58 = vpop.eup %3918  ;;  %3924 = vpow2.f32 %v1506_v53  ;;  %v1286_v60 = vadd.f32 %v1285_v56, %v5035_v5  ;;  %v1287_v39 = vpop.f32.mrb[6].mxu1 }
 0x2e3   : > { %2831 = vst [vmem:[%s5040_s6 + $0x50] sm:$0xff] %v5116_v55  ;;  %v5122_v63 = vadd.f32 %v1287_v39, %v5031_v4  ;;  %v1289_v3 = vpop.f32.mrb[7].mxu1  ;;  %3633 = vmatprep.mubr.bf16.mxu0 %v1618_v57  ;;  %v1558_v6 = vmul.f32 %v3919_v58, %v3412_v51 }
 0x2e4   : > { %v3921_v8 = vpop.eup %3920  ;;  %v1466_v9 = vmul.f32 0.5, %v1286_v60  ;;  %2863 = vst [vmem:[%s5045_s10 + $0x50] sm:$0xff] %v1286_v60  ;;  %v1290_v11 = vadd.f32 %v1289_v3, %v5035_v5 }
 0x2e5   : > { %2832 = vst [vmem:[%s5040_s6 + $0x58] sm:$0xff] %v5122_v63  ;;  %v1559_v13 = vmul.f32 %v3921_v8, %v3413_v33  ;;  %v1590_v14 = vadd.f32 %v1558_v6, %v5082_v61  ;;  %v3417_v61 = vunpack.c.h.bf16 %v3465_v12  ;;  %v3467_v33 = vld [vmem:[%s4918_s17 + $0x30] sm:$0xff]  }
 0x2e6   : > { %v1508_v15 = vmul.f32 1.442695, %v1466_v9  ;;  %v1467_v16 = vmul.f32 0.5, %v1290_v11  ;;  %2864 = vst [vmem:[%s5045_s10 + $0x58] sm:$0xff] %v1290_v11  ;;  %v3424_v6 = vunpack.c.l.bf16 %v3467_v33 }
 0x2e7   : > { %v1591_v18 = vadd.f32 %v1559_v13, %v5088_v10  ;;  %v3425_v13 = vunpack.c.h.bf16 %v3467_v33 }
 0x2e8   : > { %3926 = vpow2.f32 %v1508_v15  ;;  %v1510_v21 = vmul.f32 1.442695, %v1467_v16  ;;  %v1293_v22 = vpop.f32.mrb[8].mxu1 }
 0x2e9   : > { %v5133_v24 = vadd.f32 %v1293_v22, %v5031_v4  ;;  %v1295_v25 = vpop.f32.mrb[9].mxu1  ;;  %v1619_v26 = vpack.c.bf16 %v1591_v18, %v1590_v14  ;;  %v3468_v22 = vld [vmem:[%s4918_s17 + $0x38] sm:$0xff]  }
 0x2ea   : > { %v3923_v27 = vpop.eup %3922  ;;  %3928 = vpow2.f32 %v1510_v21  ;;  %v1296_v28 = vadd.f32 %v1295_v25, %v5035_v5  ;;  %v1297_v30 = vpop.f32.mrb[10].mxu1  ;;  %v3429_v35 = vunpack.c.h.bf16 %v3468_v22 }
 0x2eb   : > { %2833 = vst [vmem:[%s5040_s6 + $0x60] sm:$0xff] %v5133_v24  ;;  %v5139_v10 = vadd.f32 %v1297_v30, %v5031_v4  ;;  %v1299_v31 = vpop.f32.mrb[11].mxu1  ;;  %3634 = vmatmul.mubr.bf16.gmra.mrb[84].mxu0 %v1619_v26  ;;  %v1560_v19 = vmul.f32 %v3923_v27, %v3416_v20  ;;  %v3428_v30 = vunpack.c.l.bf16 %v3468_v22 }
 0x2ec   : > { %v3925_v32 = vpop.eup %3924  ;;  %v1468_v34 = vmul.f32 0.5, %v1296_v28  ;;  %2865 = vst [vmem:[%s5045_s10 + $0x60] sm:$0xff] %v1296_v28  ;;  %v1300_v23 = vadd.f32 %v1299_v31, %v5035_v5 }
 0x2ed   : > { %2834 = vst [vmem:[%s5040_s6 + $0x68] sm:$0xff] %v5139_v10  ;;  %v1561_v37 = vmul.f32 %v3925_v32, %v3417_v61  ;;  %v1592_v38 = vadd.f32 %v1560_v19, %v5099_v29 }
 0x2ee   : > { %v1512_v40 = vmul.f32 1.442695, %v1468_v34  ;;  %v1469_v41 = vmul.f32 0.5, %v1300_v23  ;;  %2866 = vst [vmem:[%s5045_s10 + $0x68] sm:$0xff] %v1300_v23 }
 0x2ef   : > { %v1593_v42 = vadd.f32 %v1561_v37, %v5105_v36 }
 0x2f0   : > { %3930 = vpow2.f32 %v1512_v40  ;;  %v1514_v44 = vmul.f32 1.442695, %v1469_v41  ;;  %v1303_v45 = vpop.f32.mrb[12].mxu1 }
 0x2f1   : > { %v5150_v46 = vadd.f32 %v1303_v45, %v5031_v4  ;;  %v1305_v47 = vpop.f32.mrb[13].mxu1  ;;  %v1620_v48 = vpack.c.bf16 %v1593_v42, %v1592_v38  ;;  %v3469_v45 = vld [vmem:[%s4918_s17 + $0x40] sm:$0xff]  }
 0x2f2   : > { %v3927_v29 = vpop.eup %3926  ;;  %3932 = vpow2.f32 %v1514_v44  ;;  %v1306_v50 = vadd.f32 %v1305_v47, %v5035_v5  ;;  %v1307_v51 = vpop.f32.mrb[14].mxu1  ;;  %v3433_v33 = vunpack.c.h.bf16 %v3469_v45 }
 0x2f3   : > { %2835 = vst [vmem:[%s5040_s6 + $0x70] sm:$0xff] %v5150_v46  ;;  %v5156_v36 = vadd.f32 %v1307_v51, %v5031_v4  ;;  %v1309_v52 = vpop.f32.mrb[15].mxu1  ;;  %3637 = vmatprep.mubr.bf16.mxu0 %v1620_v48  ;;  %v1562_v53 = vmul.f32 %v3927_v29, %v3420_v43  ;;  %v3432_v51 = vunpack.c.l.bf16 %v3469_v45 }
 0x2f4   : > { %v3929_v54 = vpop.eup %3928  ;;  %v1470_v56 = vmul.f32 0.5, %v1306_v50  ;;  %2867 = vst [vmem:[%s5045_s10 + $0x70] sm:$0xff] %v1306_v50  ;;  %v1310_v57 = vadd.f32 %v1309_v52, %v5035_v5 }
 0x2f5   : > { %2836 = vst [vmem:[%s5040_s6 + $0x78] sm:$0xff] %v5156_v36  ;;  %v1563_v58 = vmul.f32 %v3929_v54, %v3421_v49  ;;  %v1594_v60 = vadd.f32 %v1562_v53, %v5116_v55 }
 0x2f6   : > { %v1516_v39 = vmul.f32 1.442695, %v1470_v56  ;;  %v1471_v62 = vmul.f32 0.5, %v1310_v57  ;;  %2868 = vst [vmem:[%s5045_s10 + $0x78] sm:$0xff] %v1310_v57 }
 0x2f7   : > { %v1595_v3 = vadd.f32 %v1563_v58, %v5122_v63 }
 0x2f8   : > { %3934 = vpow2.f32 %v1516_v39  ;;  %v1518_v7 = vmul.f32 1.442695, %v1471_v62  ;;  %v1313_v8 = vpop.f32.mrb[16].mxu1 }
 0x2f9   : > { %v5167_v9 = vadd.f32 %v1313_v8, %v5031_v4  ;;  %v1315_v11 = vpop.f32.mrb[17].mxu1  ;;  %v1621_v12 = vpack.c.bf16 %v1595_v3, %v1594_v60  ;;  %v3470_v8 = vld [vmem:[%s4918_s17 + $0x48] sm:$0xff]  }
 0x2fa   : > { %v3931_v55 = vpop.eup %3930  ;;  %3936 = vpow2.f32 %v1518_v7  ;;  %v1316_v14 = vadd.f32 %v1315_v11, %v5035_v5  ;;  %v1317_v15 = vpop.f32.mrb[18].mxu1  ;;  %v3437_v22 = vunpack.c.h.bf16 %v3470_v8 }
 0x2fb   : > { %2837 = vst [vmem:[%s5040_s6 + $0x80] sm:$0xff] %v5167_v9  ;;  %v5173_v63 = vadd.f32 %v1317_v15, %v5031_v4  ;;  %v1319_v16 = vpop.f32.mrb[19].mxu1  ;;  %3638 = vmatmul.mubr.bf16.gmra.mrb[88].mxu0 %v1621_v12  ;;  %v1564_v17 = vmul.f32 %v3931_v55, %v3424_v6  ;;  %v3436_v15 = vunpack.c.l.bf16 %v3470_v8 }
 0x2fc   : > { %v3933_v18 = vpop.eup %3932  ;;  %v1472_v20 = vmul.f32 0.5, %v1316_v14  ;;  %2869 = vst [vmem:[%s5045_s10 + $0x80] sm:$0xff] %v1316_v14  ;;  %v1320_v21 = vadd.f32 %v1319_v16, %v5035_v5 }
 0x2fd   : > { %2838 = vst [vmem:[%s5040_s6 + $0x88] sm:$0xff] %v5173_v63  ;;  %v1565_v25 = vmul.f32 %v3933_v18, %v3425_v13  ;;  %v1596_v26 = vadd.f32 %v1564_v17, %v5133_v24 }
 0x2fe   : > { %v1520_v61 = vmul.f32 1.442695, %v1472_v20  ;;  %v1473_v27 = vmul.f32 0.5, %v1320_v21  ;;  %2870 = vst [vmem:[%s5045_s10 + $0x88] sm:$0xff] %v1320_v21 }
 0x2ff   : > { %v1597_v28 = vadd.f32 %v1565_v25, %v5139_v10 }
 0x300   : > { %3938 = vpow2.f32 %v1520_v61  ;;  %v1522_v31 = vmul.f32 1.442695, %v1473_v27  ;;  %v1323_v19 = vpop.f32.mrb[20].mxu1 }
 0x301   : > { %v5184_v32 = vadd.f32 %v1323_v19, %v5031_v4  ;;  %v1325_v34 = vpop.f32.mrb[21].mxu1  ;;  %v1622_v23 = vpack.c.bf16 %v1597_v28, %v1596_v26  ;;  %v3471_v19 = vld [vmem:[%s4918_s17 + $0x50] sm:$0xff]  }
 0x302   : > { %v3935_v24 = vpop.eup %3934  ;;  %3940 = vpow2.f32 %v1522_v31  ;;  %v1326_v37 = vadd.f32 %v1325_v34, %v5035_v5  ;;  %v1327_v38 = vpop.f32.mrb[22].mxu1  ;;  %v3441_v45 = vunpack.c.h.bf16 %v3471_v19 }
 0x303   : > { %2839 = vst [vmem:[%s5040_s6 + $0x90] sm:$0xff] %v5184_v32  ;;  %v5190_v10 = vadd.f32 %v1327_v38, %v5031_v4  ;;  %v1329_v40 = vpop.f32.mrb[23].mxu1  ;;  %3641 = vmatprep.mubr.bf16.mxu0 %v1622_v23  ;;  %v1566_v41 = vmul.f32 %v3935_v24, %v3428_v30  ;;  %v3440_v38 = vunpack.c.l.bf16 %v3471_v19 }
 0x304   : > { %v3937_v42 = vpop.eup %3936  ;;  %v1474_v43 = vmul.f32 0.5, %v1326_v37  ;;  %2871 = vst [vmem:[%s5045_s10 + $0x90] sm:$0xff] %v1326_v37  ;;  %v1330_v44 = vadd.f32 %v1329_v40, %v5035_v5 }
 0x305   : > { %2840 = vst [vmem:[%s5040_s6 + $0x98] sm:$0xff] %v5190_v10  ;;  %v1567_v47 = vmul.f32 %v3937_v42, %v3429_v35  ;;  %v1598_v48 = vadd.f32 %v1566_v41, %v5150_v46 }
 0x306   : > { %v1524_v49 = vmul.f32 1.442695, %v1474_v43  ;;  %v1475_v29 = vmul.f32 0.5, %v1330_v44  ;;  %2872 = vst [vmem:[%s5045_s10 + $0x98] sm:$0xff] %v1330_v44 }
 0x307   : > { %v1599_v50 = vadd.f32 %v1567_v47, %v5156_v36 }
 0x308   : > { %3942 = vpow2.f32 %v1524_v49  ;;  %v1526_v52 = vmul.f32 1.442695, %v1475_v29  ;;  %v1333_v53 = vpop.f32.mrb[24].mxu1 }
 0x309   : > { %v5201_v54 = vadd.f32 %v1333_v53, %v5031_v4  ;;  %v1335_v56 = vpop.f32.mrb[25].mxu1  ;;  %v1623_v57 = vpack.c.bf16 %v1599_v50, %v1598_v48  ;;  %v3472_v53 = vld [vmem:[%s4918_s17 + $0x58] sm:$0xff]  }
 0x30a   : > { %v3939_v46 = vpop.eup %3938  ;;  %3944 = vpow2.f32 %v1526_v52  ;;  %v1336_v58 = vadd.f32 %v1335_v56, %v5035_v5  ;;  %v1337_v60 = vpop.f32.mrb[26].mxu1  ;;  %v3445_v8 = vunpack.c.h.bf16 %v3472_v53 }
 0x30b   : > { %2841 = vst [vmem:[%s5040_s6 + $0xa0] sm:$0xff] %v5201_v54  ;;  %v5207_v36 = vadd.f32 %v1337_v60, %v5031_v4  ;;  %v1339_v39 = vpop.f32.mrb[27].mxu1  ;;  %3642 = vmatmul.mubr.bf16.gmra.mrb[92].mxu0 %v1623_v57  ;;  %v1568_v62 = vmul.f32 %v3939_v46, %v3432_v51  ;;  %v3444_v60 = vunpack.c.l.bf16 %v3472_v53 }
 0x30c   : > { %v3941_v3 = vpop.eup %3940  ;;  %v1476_v6 = vmul.f32 0.5, %v1336_v58  ;;  %2873 = vst [vmem:[%s5045_s10 + $0xa0] sm:$0xff] %v1336_v58  ;;  %v1340_v7 = vadd.f32 %v1339_v39, %v5035_v5 }
 0x30d   : > { %2842 = vst [vmem:[%s5040_s6 + $0xa8] sm:$0xff] %v5207_v36  ;;  %v1569_v11 = vmul.f32 %v3941_v3, %v3433_v33  ;;  %v1600_v12 = vadd.f32 %v1568_v62, %v5167_v9 }
 0x30e   : > { %v1528_v13 = vmul.f32 1.442695, %v1476_v6  ;;  %v1477_v55 = vmul.f32 0.5, %v1340_v7  ;;  %2874 = vst [vmem:[%s5045_s10 + $0xa8] sm:$0xff] %v1340_v7 }
 0x30f   : > { %v1601_v14 = vadd.f32 %v1569_v11, %v5173_v63 }
 0x310   : > { %3946 = vpow2.f32 %v1528_v13  ;;  %v1530_v16 = vmul.f32 1.442695, %v1477_v55  ;;  %v1343_v17 = vpop.f32.mrb[28].mxu1 }
 0x311   : > { %v5218_v18 = vadd.f32 %v1343_v17, %v5031_v4  ;;  %v1345_v20 = vpop.f32.mrb[29].mxu1  ;;  %v1624_v21 = vpack.c.bf16 %v1601_v14, %v1600_v12  ;;  %v3473_v17 = vld [vmem:[%s4918_s17 + $0x60] sm:$0xff]  }
 0x312   : > { %v3943_v9 = vpop.eup %3942  ;;  %3948 = vpow2.f32 %v1530_v16  ;;  %v1346_v25 = vadd.f32 %v1345_v20, %v5035_v5  ;;  %v1347_v26 = vpop.f32.mrb[30].mxu1  ;;  %v3449_v19 = vunpack.c.h.bf16 %v3473_v17 }
 0x313   : > { %2843 = vst [vmem:[%s5040_s6 + $0xb0] sm:$0xff] %v5218_v18  ;;  %v5224_v63 = vadd.f32 %v1347_v26, %v5031_v4  ;;  %v1349_v61 = vpop.f32.mrb[31].mxu1  ;;  %3645 = vmatprep.mubr.bf16.mxu0 %v1624_v21  ;;  %v1570_v27 = vmul.f32 %v3943_v9, %v3436_v15  ;;  %v3448_v26 = vunpack.c.l.bf16 %v3473_v17 }
 0x314   : > { %v3945_v28 = vpop.eup %3944  ;;  %v1478_v30 = vmul.f32 0.5, %v1346_v25  ;;  %2875 = vst [vmem:[%s5045_s10 + $0xb0] sm:$0xff] %v1346_v25  ;;  %v1350_v31 = vadd.f32 %v1349_v61, %v5035_v5 }
 0x315   : > { %2844 = vst [vmem:[%s5040_s6 + $0xb8] sm:$0xff] %v5224_v63  ;;  %v1571_v34 = vmul.f32 %v3945_v28, %v3437_v22  ;;  %v1602_v23 = vadd.f32 %v1570_v27, %v5184_v32 }
 0x316   : > { %v1532_v35 = vmul.f32 1.442695, %v1478_v30  ;;  %v1479_v24 = vmul.f32 0.5, %v1350_v31  ;;  %2876 = vst [vmem:[%s5045_s10 + $0xb8] sm:$0xff] %v1350_v31 }
 0x317   : > { %v1603_v37 = vadd.f32 %v1571_v34, %v5190_v10 }
 0x318   : > { %3950 = vpow2.f32 %v1532_v35  ;;  %v1534_v40 = vmul.f32 1.442695, %v1479_v24  ;;  %v1353_v41 = vpop.f32.mrb[32].mxu1 }
 0x319   : > { %v5235_v42 = vadd.f32 %v1353_v41, %v5031_v4  ;;  %v1355_v43 = vpop.f32.mrb[33].mxu1  ;;  %v1625_v44 = vpack.c.bf16 %v1603_v37, %v1602_v23  ;;  %v3474_v41 = vld [vmem:[%s4918_s17 + $0x68] sm:$0xff]  }
 0x31a   : > { %v3947_v32 = vpop.eup %3946  ;;  %3952 = vpow2.f32 %v1534_v40  ;;  %v1356_v47 = vadd.f32 %v1355_v43, %v5035_v5  ;;  %v1357_v48 = vpop.f32.mrb[34].mxu1  ;;  %v3453_v53 = vunpack.c.h.bf16 %v3474_v41 }
 0x31b   : > { %2845 = vst [vmem:[%s5040_s6 + $0xc0] sm:$0xff] %v5235_v42  ;;  %v5241_v10 = vadd.f32 %v1357_v48, %v5031_v4  ;;  %v1359_v49 = vpop.f32.mrb[35].mxu1  ;;  %3646 = vmatmul.mubr.bf16.gmra.mrb[96].mxu0 %v1625_v44  ;;  %v1572_v29 = vmul.f32 %v3947_v32, %v3440_v38  ;;  %v3452_v48 = vunpack.c.l.bf16 %v3474_v41 }
 0x31c   : > { %v3949_v50 = vpop.eup %3948  ;;  %v1480_v51 = vmul.f32 0.5, %v1356_v47  ;;  %2877 = vst [vmem:[%s5045_s10 + $0xc0] sm:$0xff] %v1356_v47  ;;  %v1360_v52 = vadd.f32 %v1359_v49, %v5035_v5 }
 0x31d   : > { %2846 = vst [vmem:[%s5040_s6 + $0xc8] sm:$0xff] %v5241_v10  ;;  %v1573_v56 = vmul.f32 %v3949_v50, %v3441_v45  ;;  %v1604_v57 = vadd.f32 %v1572_v29, %v5201_v54 }
 0x31e   : > { %v1536_v33 = vmul.f32 1.442695, %v1480_v51  ;;  %v1481_v46 = vmul.f32 0.5, %v1360_v52  ;;  %2878 = vst [vmem:[%s5045_s10 + $0xc8] sm:$0xff] %v1360_v52 }
 0x31f   : > { %v1605_v58 = vadd.f32 %v1573_v56, %v5207_v36 }
 0x320   : > { %3954 = vpow2.f32 %v1536_v33  ;;  %v1538_v39 = vmul.f32 1.442695, %v1481_v46  ;;  %v1363_v62 = vpop.f32.mrb[36].mxu1 }
 0x321   : > { %v5252_v3 = vadd.f32 %v1363_v62, %v5031_v4  ;;  %v1365_v6 = vpop.f32.mrb[37].mxu1  ;;  %v1626_v7 = vpack.c.bf16 %v1605_v58, %v1604_v57  ;;  %v3475_v62 = vld [vmem:[%s4918_s17 + $0x70] sm:$0xff]  }
 0x322   : > { %v3951_v54 = vpop.eup %3950  ;;  %3956 = vpow2.f32 %v1538_v39  ;;  %v1366_v11 = vadd.f32 %v1365_v6, %v5035_v5  ;;  %v1367_v12 = vpop.f32.mrb[38].mxu1 }
 0x323   : > { %2847 = vst [vmem:[%s5040_s6 + $0xd0] sm:$0xff] %v5252_v3  ;;  %v5258_v36 = vadd.f32 %v1367_v12, %v5031_v4  ;;  %v1369_v13 = vpop.f32.mrb[39].mxu1  ;;  %3649 = vmatprep.mubr.bf16.mxu0 %v1626_v7  ;;  %v1574_v55 = vmul.f32 %v3951_v54, %v3444_v60 }
 0x324   : > { %v3953_v14 = vpop.eup %3952  ;;  %v1482_v15 = vmul.f32 0.5, %v1366_v11  ;;  %2879 = vst [vmem:[%s5045_s10 + $0xd0] sm:$0xff] %v1366_v11  ;;  %v1370_v16 = vadd.f32 %v1369_v13, %v5035_v5 }
 0x325   : > { %2848 = vst [vmem:[%s5040_s6 + $0xd8] sm:$0xff] %v5258_v36  ;;  %v1575_v20 = vmul.f32 %v3953_v14, %v3445_v8  ;;  %v1606_v21 = vadd.f32 %v1574_v55, %v5218_v18  ;;  %v3457_v55 = vunpack.c.h.bf16 %v3475_v62 }
 0x326   : > { %v1540_v22 = vmul.f32 1.442695, %v1482_v15  ;;  %v1483_v9 = vmul.f32 0.5, %v1370_v16  ;;  %2880 = vst [vmem:[%s5045_s10 + $0xd8] sm:$0xff] %v1370_v16  ;;  %v3476_v16 = vld [vmem:[%s4918_s17 + $0x78] sm:$0xff]   ;;  %s4398_s17 = scalar_lea.vmem %s5389_s21, 4096 }
 0x327   : > { %v1607_v25 = vadd.f32 %v1575_v20, %v5224_v63  ;;  %p4399_p0 = scmp.ne.s32.totalorder %s5389_s21, %s4398_s17  ;;  %p4406_p5 = scmp.lt.s32.totalorder %s4404_s16, %s4398_s17 }
 0x328   : > { %3958 = vpow2.f32 %v1540_v22  ;;  %v1542_v61 = vmul.f32 1.442695, %v1483_v9  ;;  %v1373_v27 = vpop.f32.mrb[40].mxu1  ;;  %v3461_v9 = vunpack.c.h.bf16 %v3476_v16 }
 0x329   : > { %v5269_v28 = vadd.f32 %v1373_v27, %v5031_v4  ;;  %v1375_v30 = vpop.f32.mrb[41].mxu1  ;;  %v1627_v31 = vpack.c.bf16 %v1607_v25, %v1606_v21  ;;  %v3460_v21 = vunpack.c.l.bf16 %v3476_v16  ;;  %p4400_p6 = pnand %p4399_p0, %p4803_p3  ;;  %p4407_p9 = por %p4406_p5, %p4405_p10 }
 0x32a   : > { %v3955_v18 = vpop.eup %3954  ;;  %3960 = vpow2.f32 %v1542_v61  ;;  %v1376_v34 = vadd.f32 %v1375_v30, %v5035_v5  ;;  %v1377_v23 = vpop.f32.mrb[42].mxu1 }
 0x32b   : > { %2849 = vst [vmem:[%s5040_s6 + $0xe0] sm:$0xff] %v5269_v28  ;;  %v1378_v63 = vadd.f32 %v1377_v23, %v5031_v4  ;;  %v1379_v35 = vpop.f32.mrb[43].mxu1  ;;  %3650 = vmatmul.mubr.bf16.gmra.mrb[100].mxu0 %v1627_v31  ;;  %v1576_v24 = vmul.f32 %v3955_v18, %v3448_v26  ;;  %p4401_p8 = pneg %p4400_p6 }
 0x32c   : > { %v3957_v37 = vpop.eup %3956  ;;  %v1484_v38 = vmul.f32 0.5, %v1376_v34  ;;  %2881 = vst [vmem:[%s5045_s10 + $0xe0] sm:$0xff] %v1376_v34  ;;  %v1380_v40 = vadd.f32 %v1379_v35, %v5035_v5 }
 0x32d   : > { %2850 = vst [vmem:[%s5040_s6 + $0xe8] sm:$0xff] %v1378_v63  ;;  %v1577_v43 = vmul.f32 %v3957_v37, %v3449_v19  ;;  %v1608_v44 = vadd.f32 %v1576_v24, %v5235_v42  ;;  %v5298_v19 = vld [vmem:[%s5595_s7] ss:$0 sm:$0xff]  ;;  %p4408_p4 = pnand %p4407_p9, %p4401_p8 }
 0x32e   : > { %v1544_v45 = vmul.f32 1.442695, %v1484_v38  ;;  %v1485_v32 = vmul.f32 0.5, %v1380_v40  ;;  %2882 = vst [vmem:[%s5045_s10 + $0xe8] sm:$0xff] %v1380_v40 }
 0x32f   : > { %v1609_v47 = vadd.f32 %v1577_v43, %v5241_v10 }
 0x330   : > { %3962 = vpow2.f32 %v1544_v45  ;;  %v1546_v49 = vmul.f32 1.442695, %v1485_v32  ;;  %v1383_v29 = vpop.f32.mrb[44].mxu1 }
 0x331   : > { %v1384_v50 = vadd.f32 %v1383_v29, %v5031_v4  ;;  %v1385_v51 = vpop.f32.mrb[45].mxu1  ;;  %v1628_v52 = vpack.c.bf16 %v1609_v47, %v1608_v44 }
 0x332   : > { %v3959_v56 = vpop.eup %3958  ;;  %3964 = vpow2.f32 %v1546_v49  ;;  %v1386_v42 = vadd.f32 %v1385_v51, %v5035_v5  ;;  %v1387_v57 = vpop.f32.mrb[46].mxu1 }
 0x333   : > { %2851 = vst [vmem:[%s5040_s6 + $0xf0] sm:$0xff] %v1384_v50  ;;  %v1388_v10 = vadd.f32 %v1387_v57, %v5031_v4  ;;  %v1389_v33 = vpop.f32.mrb[47].mxu1  ;;  %3653 = vmatprep.mubr.bf16.mxu0 %v1628_v52  ;;  %v1578_v46 = vmul.f32 %v3959_v56, %v3452_v48  ;;  %v3456_v4 = vunpack.c.l.bf16 %v3475_v62 }
 0x334   : > { %v3961_v58 = vpop.eup %3960  ;;  %v1486_v60 = vmul.f32 0.5, %v1386_v42  ;;  %2883 = vst [vmem:[%s5045_s10 + $0xf0] sm:$0xff] %v1386_v42  ;;  %v1390_v39 = vadd.f32 %v1389_v33, %v5035_v5 }
 0x335   : > { %2852 = vst [vmem:[%s5040_s6 + $0xf8] sm:$0xff] %v1388_v10  ;;  %v1579_v6 = vmul.f32 %v3961_v58, %v3453_v53  ;;  %v1610_v7 = vadd.f32 %v1578_v46, %v5252_v3 }
 0x336   : > { %v1548_v8 = vmul.f32 1.442695, %v1486_v60  ;;  %v1487_v54 = vmul.f32 0.5, %v1390_v39  ;;  %2884 = vst [vmem:[%s5045_s10 + $0xf8] sm:$0xff] %v1390_v39 }
 0x337   : > { %v1611_v11 = vadd.f32 %v1579_v6, %v5258_v36 }
 0x338   : > { %3966 = vpow2.f32 %v1548_v8  ;;  %v1550_v12 = vmul.f32 1.442695, %v1487_v54 }
 0x339   : > { %v1629_v13 = vpack.c.bf16 %v1611_v11, %v1610_v7 }
 0x33a   : > { %v3963_v14 = vpop.eup %3962  ;;  %3968 = vpow2.f32 %v1550_v12 }
 0x33b   : > { %3654 = vmatmul.mubr.bf16.gmra.mrb[104].mxu0 %v1629_v13  ;;  %v1580_v5 = vmul.f32 %v3963_v14, %v3456_v4 }
 0x33c   : > { %v3965_v15 = vpop.eup %3964 }
 0x33d   : > { %v1581_v17 = vmul.f32 %v3965_v15, %v3457_v55  ;;  %v1612_v20 = vadd.f32 %v1580_v5, %v5269_v28 }
 0x33f   : > { %v1613_v3 = vadd.f32 %v1581_v17, %v1378_v63 }
 0x341   : > { %v1630_v22 = vpack.c.bf16 %v1613_v3, %v1612_v20 }
 0x342   : > { %v3967_v25 = vpop.eup %3966 }
 0x343   : > { %3657 = vmatprep.mubr.bf16.mxu0 %v1630_v22  ;;  %v1582_v36 = vmul.f32 %v3967_v25, %v3460_v21 }
 0x344   : > { %v3969_v26 = vpop.eup %3968 }
 0x345   : > { %v1583_v61 = vmul.f32 %v3969_v26, %v3461_v9  ;;  %v1614_v27 = vadd.f32 %v1582_v36, %v1384_v50 }
 0x347   : > { %v1615_v30 = vadd.f32 %v1583_v61, %v1388_v10 }
 0x349   : > { %v1631_v31 = vpack.c.bf16 %v1615_v30, %v1614_v27 }
 0x34b   : > { %3658 = vmatmul.mubr.bf16.gmra.mrb[108].mxu0 %v1631_v31 }
 0x3ae   : > { %v3631_v18 = vpop.f32.mrb[80].mxu0 }
 0x3af   : > { %v1746_v28 = vadd.f32 %v3631_v18, %v5298_v19  ;;  %v1737_v34 = vpop.f32.mrb[81].mxu0 }
 0x3b0   : > { %v1738_v23 = vadd.f32 %v5298_v19, %v1737_v34  ;;  %v3632_v63 = vpop.f32.mrb[82].mxu0 }
 0x3b1   : > { %v1749_v35 = vadd.f32 %v3632_v63, %v5298_v19  ;;  %v1740_v24 = vpop.f32.mrb[83].mxu0  ;;  %v1866_v38 = vmax.f32 %v1746_v28, 0.0 }
 0x3b2   : > { %v1741_v37 = vadd.f32 %v5298_v19, %v1740_v24  ;;  %v1864_v41 = vmax.f32 %v1738_v23, 0.0 }
 0x3b3   : > { %v1867_v40 = vmax.f32 %v1749_v35, 0.0 }
 0x3b4   : > { %v1865_v43 = vmax.f32 %v1741_v37, 0.0 }
 0x3b5   : > { %v1897_v44 = vpack.c.bf16 %v1867_v40, %v1866_v38 }
 0x3b6   : > { %v1896_v45 = vpack.c.bf16 %v1865_v43, %v1864_v41 }
 0x3b8   : > { %2053 = vmatmul.mubr.bf16.vlgmr.msra.gmra.mrb[48].mxu1 %v1896_v45 }
 0x3b9   : > { %2062 = vmatprep.mubr.bf16.mxu1 %v4552_v59 }
 0x3be   : > { %v3635_v32 = vpop.f32.mrb[84].mxu0 }
 0x3bf   : > { %v1762_v47 = vadd.f32 %v3635_v32, %v5298_v19  ;;  %v1753_v48 = vpop.f32.mrb[85].mxu0 }
 0x3c0   : > { %v1754_v49 = vadd.f32 %v5298_v19, %v1753_v48  ;;  %v3636_v29 = vpop.f32.mrb[86].mxu0  ;;  %2063 = vmatmul.mubr.bf16.gmra.mrb[52].mxu1 %v1897_v44 }
 0x3c1   : > { %v1765_v50 = vadd.f32 %v3636_v29, %v5298_v19  ;;  %v1756_v51 = vpop.f32.mrb[87].mxu0  ;;  %2072 = vmatprep.mubr.bf16.mxu1 %v4552_v59  ;;  %v1870_v53 = vmax.f32 %v1762_v47, 0.0 }
 0x3c2   : > { %v1757_v52 = vadd.f32 %v5298_v19, %v1756_v51  ;;  %v1868_v42 = vmax.f32 %v1754_v49, 0.0 }
 0x3c3   : > { %v1871_v56 = vmax.f32 %v1765_v50, 0.0 }
 0x3c4   : > { %v1869_v57 = vmax.f32 %v1757_v52, 0.0 }
 0x3c5   : > { %v1899_v10 = vpack.c.bf16 %v1871_v56, %v1870_v53 }
 0x3c6   : > { %v1898_v33 = vpack.c.bf16 %v1869_v57, %v1868_v42 }
 0x3c8   : > { %2073 = vmatmul.mubr.bf16.gmra.mrb[56].mxu1 %v1898_v33 }
 0x3c9   : > { %2082 = vmatprep.mubr.bf16.mxu1 %v4552_v59 }
 0x3ce   : > { %v3639_v46 = vpop.f32.mrb[88].mxu0 }
 0x3cf   : > { %v1778_v58 = vadd.f32 %v3639_v46, %v5298_v19  ;;  %v1769_v60 = vpop.f32.mrb[89].mxu0 }
 0x3d0   : > { %v1770_v39 = vadd.f32 %v5298_v19, %v1769_v60  ;;  %v3640_v62 = vpop.f32.mrb[90].mxu0  ;;  %2083 = vmatmul.mubr.bf16.gmra.mrb[60].mxu1 %v1899_v10 }
 0x3d1   : > { %v1781_v6 = vadd.f32 %v3640_v62, %v5298_v19  ;;  %v1772_v7 = vpop.f32.mrb[91].mxu0  ;;  %2092 = vmatprep.mubr.bf16.mxu1 %v4552_v59  ;;  %v1874_v54 = vmax.f32 %v1778_v58, 0.0 }
 0x3d2   : > { %v1773_v8 = vadd.f32 %v5298_v19, %v1772_v7  ;;  %v1872_v4 = vmax.f32 %v1770_v39, 0.0 }
 0x3d3   : > { %v1875_v11 = vmax.f32 %v1781_v6, 0.0 }
 0x3d4   : > { %v1873_v12 = vmax.f32 %v1773_v8, 0.0 }
 0x3d5   : > { %v1901_v13 = vpack.c.bf16 %v1875_v11, %v1874_v54 }
 0x3d6   : > { %v1900_v55 = vpack.c.bf16 %v1873_v12, %v1872_v4 }
 0x3d8   : > { %2093 = vmatmul.mubr.bf16.gmra.mrb[64].mxu1 %v1900_v55 }
 0x3d9   : > { %2102 = vmatprep.mubr.bf16.mxu1 %v4552_v59 }
 0x3de   : > { %v3643_v14 = vpop.f32.mrb[92].mxu0 }
 0x3df   : > { %v1794_v5 = vadd.f32 %v3643_v14, %v5298_v19  ;;  %v1785_v15 = vpop.f32.mrb[93].mxu0 }
 0x3e0   : > { %v1786_v16 = vadd.f32 %v5298_v19, %v1785_v15  ;;  %v3644_v17 = vpop.f32.mrb[94].mxu0  ;;  %2103 = vmatmul.mubr.bf16.gmra.mrb[68].mxu1 %v1901_v13 }
 0x3e1   : > { %v1797_v20 = vadd.f32 %v3644_v17, %v5298_v19  ;;  %v1788_v3 = vpop.f32.mrb[95].mxu0  ;;  %2112 = vmatprep.mubr.bf16.mxu1 %v4552_v59  ;;  %v1878_v22 = vmax.f32 %v1794_v5, 0.0 }
 0x3e2   : > { %v1789_v21 = vadd.f32 %v5298_v19, %v1788_v3  ;;  %v1876_v25 = vmax.f32 %v1786_v16, 0.0 }
 0x3e3   : > { %v1879_v9 = vmax.f32 %v1797_v20, 0.0 }
 0x3e4   : > { %v1877_v36 = vmax.f32 %v1789_v21, 0.0 }
 0x3e5   : > { %v1903_v26 = vpack.c.bf16 %v1879_v9, %v1878_v22 }
 0x3e6   : > { %v1902_v61 = vpack.c.bf16 %v1877_v36, %v1876_v25  ;;  %v1928_v36 = vld [vmem:[%s5597_s9] sm:$0x3] }
 0x3e8   : > { %2113 = vmatmul.mubr.bf16.gmra.mrb[72].mxu1 %v1902_v61 }
 0x3e9   : > { %2122 = vmatprep.mubr.bf16.mxu1 %v4552_v59 }
 0x3ee   : > { %v3647_v27 = vpop.f32.mrb[96].mxu0 }
 0x3ef   : > { %v1810_v30 = vadd.f32 %v3647_v27, %v5298_v19  ;;  %v1801_v31 = vpop.f32.mrb[97].mxu0 }
 0x3f0   : > { %v1802_v18 = vadd.f32 %v5298_v19, %v1801_v31  ;;  %v3648_v28 = vpop.f32.mrb[98].mxu0  ;;  %2123 = vmatmul.mubr.bf16.gmra.mrb[76].mxu1 %v1903_v26  ;;  %v5352_v26 = vrot.slane %v1928_v36, %v1111_v1 }
 0x3f1   : > { %v1813_v34 = vadd.f32 %v3648_v28, %v5298_v19  ;;  %v1804_v23 = vpop.f32.mrb[99].mxu0  ;;  %2132 = vmatprep.mubr.bf16.mxu1 %v4552_v59  ;;  %v1882_v35 = vmax.f32 %v1810_v30, 0.0 }
 0x3f2   : > { %v1805_v63 = vadd.f32 %v5298_v19, %v1804_v23  ;;  %v1880_v37 = vmax.f32 %v1802_v18, 0.0 }
 0x3f3   : > { %v1883_v24 = vmax.f32 %v1813_v34, 0.0 }
 0x3f4   : > { %v1881_v38 = vmax.f32 %v1805_v63, 0.0 }
 0x3f5   : > { %v1905_v40 = vpack.c.bf16 %v1883_v24, %v1882_v35 }
 0x3f6   : > { %v1904_v41 = vpack.c.bf16 %v1881_v38, %v1880_v37 }
 0x3f8   : > { %2133 = vmatmul.mubr.bf16.gmra.mrb[80].mxu1 %v1904_v41 }
 0x3f9   : > { %2142 = vmatprep.mubr.bf16.mxu1 %v4552_v59 }
 0x3fe   : > { %v3651_v43 = vpop.f32.mrb[100].mxu0 }
 0x3ff   : > { %v1826_v44 = vadd.f32 %v3651_v43, %v5298_v19  ;;  %v1817_v45 = vpop.f32.mrb[101].mxu0 }
 0x400   : > { %v1818_v32 = vadd.f32 %v5298_v19, %v1817_v45  ;;  %v3652_v47 = vpop.f32.mrb[102].mxu0  ;;  %2143 = vmatmul.mubr.bf16.gmra.mrb[84].mxu1 %v1905_v40 }
 0x401   : > { %v1829_v48 = vadd.f32 %v3652_v47, %v5298_v19  ;;  %v1820_v49 = vpop.f32.mrb[103].mxu0  ;;  %2152 = vmatprep.mubr.bf16.mxu1 %v4552_v59  ;;  %v1886_v50 = vmax.f32 %v1826_v44, 0.0 }
 0x402   : > { %v1821_v29 = vadd.f32 %v5298_v19, %v1820_v49  ;;  %v1884_v52 = vmax.f32 %v1818_v32, 0.0 }
 0x403   : > { %v1887_v51 = vmax.f32 %v1829_v48, 0.0 }
 0x404   : > { %v1885_v53 = vmax.f32 %v1821_v29, 0.0 }
 0x405   : > { %v1907_v56 = vpack.c.bf16 %v1887_v51, %v1886_v50 }
 0x406   : > { %v1906_v42 = vpack.c.bf16 %v1885_v53, %v1884_v52 }
 0x408   : > { %2153 = vmatmul.mubr.bf16.gmra.mrb[88].mxu1 %v1906_v42 }
 0x409   : > { %2162 = vmatprep.mubr.bf16.mxu1 %v4552_v59 }
 0x40e   : > { %v3655_v57 = vpop.f32.mrb[104].mxu0 }
 0x40f   : > { %v1842_v10 = vadd.f32 %v3655_v57, %v5298_v19  ;;  %v1833_v33 = vpop.f32.mrb[105].mxu0 }
 0x410   : > { %v1834_v46 = vadd.f32 %v5298_v19, %v1833_v33  ;;  %v3656_v58 = vpop.f32.mrb[106].mxu0  ;;  %2163 = vmatmul.mubr.bf16.gmra.mrb[92].mxu1 %v1907_v56 }
 0x411   : > { %v1845_v60 = vadd.f32 %v3656_v58, %v5298_v19  ;;  %v1836_v39 = vpop.f32.mrb[107].mxu0  ;;  %2172 = vmatprep.mubr.bf16.mxu1 %v4552_v59  ;;  %v1890_v6 = vmax.f32 %v1842_v10, 0.0 }
 0x412   : > { %v1837_v62 = vadd.f32 %v5298_v19, %v1836_v39  ;;  %v1888_v8 = vmax.f32 %v1834_v46, 0.0 }
 0x413   : > { %v1891_v7 = vmax.f32 %v1845_v60, 0.0 }
 0x414   : > { %v1889_v54 = vmax.f32 %v1837_v62, 0.0 }
 0x415   : > { %v1909_v11 = vpack.c.bf16 %v1891_v7, %v1890_v6 }
 0x416   : > { %v1908_v4 = vpack.c.bf16 %v1889_v54, %v1888_v8 }
 0x418   : > { %2173 = vmatmul.mubr.bf16.gmra.mrb[96].mxu1 %v1908_v4 }
 0x419   : > { %2182 = vmatprep.mubr.bf16.mxu1 %v4552_v59 }
 0x41e   : > { %v3659_v12 = vpop.f32.mrb[108].mxu0 }
 0x41f   : > { %v1858_v13 = vadd.f32 %v3659_v12, %v5298_v19  ;;  %v1849_v55 = vpop.f32.mrb[109].mxu0 }
 0x420   : > { %v1850_v14 = vadd.f32 %v5298_v19, %v1849_v55  ;;  %v3660_v5 = vpop.f32.mrb[110].mxu0  ;;  %2183 = vmatmul.mubr.bf16.gmra.mrb[100].mxu1 %v1909_v11 }
 0x421   : > { %v1861_v15 = vadd.f32 %v3660_v5, %v5298_v19  ;;  %v1852_v16 = vpop.f32.mrb[111].mxu0  ;;  %2192 = vmatprep.mubr.bf16.mxu1 %v4552_v59  ;;  %v1894_v20 = vmax.f32 %v1858_v13, 0.0 }
 0x422   : > { %v1853_v17 = vadd.f32 %v5298_v19, %v1852_v16  ;;  %v1892_v21 = vmax.f32 %v1850_v14, 0.0  ;;  %v5356_v19 = vrot.slane %v1928_v36, %v1115_v2 }
 0x423   : > { %v1895_v3 = vmax.f32 %v1861_v15, 0.0 }
 0x424   : > { %v1893_v22 = vmax.f32 %v1853_v17, 0.0 }
 0x425   : > { %v1911_v9 = vpack.c.bf16 %v1895_v3, %v1894_v20 }
 0x426   : > { %v1910_v25 = vpack.c.bf16 %v1893_v22, %v1892_v21 }
 0x428   : > { %2193 = vmatmul.mubr.bf16.gmra.mrb[104].mxu1 %v1910_v25 }
 0x429   : > { %2202 = vmatprep.mubr.bf16.mxu1 %v4552_v59 }
 0x430   : > { %2203 = vmatmul.mubr.bf16.gmra.mrb[108].mxu1 %v1911_v9 }
 0x48b   : > { %v2054_v61 = vpop.f32.mrb[48].mxu1 }
 0x48c   : > { %v2055_v27 = vadd.f32 %v2054_v61, %v5352_v26  ;;  %v2056_v30 = vpop.f32.mrb[49].mxu1 }
 0x48d   : > { %v2057_v31 = vadd.f32 %v2056_v30, %v5356_v19  ;;  %v2058_v59 = vpop.f32.mrb[50].mxu1 }
 0x48e   : > { %v3251_v18 = vmul.f32 -1.442695, %v2055_v27  ;;  %v2059_v28 = vadd.f32 %v2058_v59, %v5352_v26  ;;  %v2060_v34 = vpop.f32.mrb[51].mxu1 }
 0x48f   : > { %v3252_v23 = vmul.f32 -1.442695, %v2057_v31  ;;  %v2061_v63 = vadd.f32 %v2060_v34, %v5356_v19 }
 0x490   : > { %3970 = vpow2.f32 %v3251_v18  ;;  %v3253_v1 = vmul.f32 -1.442695, %v2059_v28 }
 0x491   : > { %3972 = vpow2.f32 %v3252_v23  ;;  %v3254_v0 = vmul.f32 -1.442695, %v2061_v63 }
 0x492   : > { %3974 = vpow2.f32 %v3253_v1 }
 0x493   : > { %3976 = vpow2.f32 %v3254_v0  ;;  %v2064_v2 = vpop.f32.mrb[52].mxu1 }
 0x494   : > { %v2065_v35 = vadd.f32 %v2064_v2, %v5352_v26  ;;  %v2066_v24 = vpop.f32.mrb[53].mxu1 }
 0x495   : > { %v2067_v37 = vadd.f32 %v2066_v24, %v5356_v19  ;;  %v2068_v38 = vpop.f32.mrb[54].mxu1 }
 0x496   : > { %v3255_v40 = vmul.f32 -1.442695, %v2065_v35  ;;  %v2069_v41 = vadd.f32 %v2068_v38, %v5352_v26  ;;  %v2070_v43 = vpop.f32.mrb[55].mxu1 }
 0x497   : > { %v3256_v44 = vmul.f32 -1.442695, %v2067_v37  ;;  %v2071_v45 = vadd.f32 %v2070_v43, %v5356_v19 }
 0x498   : > { %3978 = vpow2.f32 %v3255_v40  ;;  %v3257_v32 = vmul.f32 -1.442695, %v2069_v41 }
 0x499   : > { %3980 = vpow2.f32 %v3256_v44  ;;  %v3258_v47 = vmul.f32 -1.442695, %v2071_v45 }
 0x49a   : > { %v3971_v48 = vpop.eup %3970  ;;  %3982 = vpow2.f32 %v3257_v32 }
 0x49b   : > { %v3973_v49 = vpop.eup %3972  ;;  %v2405_v29 = vadd.f32 1.0, %v3971_v48  ;;  %3984 = vpow2.f32 %v3258_v47  ;;  %v2074_v50 = vpop.f32.mrb[56].mxu1 }
 0x49c   : > { %v3975_v51 = vpop.eup %3974  ;;  %v2406_v52 = vadd.f32 1.0, %v3973_v49  ;;  %v2075_v53 = vadd.f32 %v2074_v50, %v5352_v26  ;;  %v2076_v56 = vpop.f32.mrb[57].mxu1 }
 0x49d   : > { %v3977_v42 = vpop.eup %3976  ;;  %3986 = vrcp.f32 %v2405_v29  ;;  %v2407_v57 = vadd.f32 1.0, %v3975_v51  ;;  %v2077_v10 = vadd.f32 %v2076_v56, %v5356_v19  ;;  %v2078_v33 = vpop.f32.mrb[58].mxu1 }
 0x49e   : > { %3988 = vrcp.f32 %v2406_v52  ;;  %v2408_v46 = vadd.f32 1.0, %v3977_v42  ;;  %v3259_v58 = vmul.f32 -1.442695, %v2075_v53  ;;  %v2079_v60 = vadd.f32 %v2078_v33, %v5352_v26  ;;  %v2080_v39 = vpop.f32.mrb[59].mxu1 }
 0x49f   : > { %3990 = vrcp.f32 %v2407_v57  ;;  %v3260_v62 = vmul.f32 -1.442695, %v2077_v10  ;;  %v2081_v6 = vadd.f32 %v2080_v39, %v5356_v19 }
 0x4a0   : > { %3992 = vrcp.f32 %v2408_v46  ;;  %v3261_v7 = vmul.f32 -1.442695, %v2079_v60 }
 0x4a1   : > { %3994 = vpow2.f32 %v3259_v58  ;;  %v3262_v8 = vmul.f32 -1.442695, %v2081_v6 }
 0x4a2   : > { %v3979_v54 = vpop.eup %3978  ;;  %3996 = vpow2.f32 %v3260_v62 }
 0x4a3   : > { %v3981_v11 = vpop.eup %3980  ;;  %v2409_v4 = vadd.f32 1.0, %v3979_v54  ;;  %3998 = vpow2.f32 %v3261_v7  ;;  %v2084_v12 = vpop.f32.mrb[60].mxu1 }
 0x4a4   : > { %v3983_v13 = vpop.eup %3982  ;;  %v2410_v55 = vadd.f32 1.0, %v3981_v11  ;;  %4000 = vpow2.f32 %v3262_v8  ;;  %v2085_v14 = vadd.f32 %v2084_v12, %v5352_v26  ;;  %v2086_v5 = vpop.f32.mrb[61].mxu1 }
 0x4a5   : > { %v3985_v15 = vpop.eup %3984  ;;  %4002 = vrcp.f32 %v2409_v4  ;;  %v2411_v16 = vadd.f32 1.0, %v3983_v13  ;;  %v2087_v17 = vadd.f32 %v2086_v5, %v5356_v19  ;;  %v2088_v20 = vpop.f32.mrb[62].mxu1 }
 0x4a6   : > { %4004 = vrcp.f32 %v2410_v55  ;;  %v2412_v3 = vadd.f32 1.0, %v3985_v15  ;;  %v3263_v21 = vmul.f32 -1.442695, %v2085_v14  ;;  %v2089_v22 = vadd.f32 %v2088_v20, %v5352_v26  ;;  %v2090_v9 = vpop.f32.mrb[63].mxu1 }
 0x4a7   : > { %v3987_v25 = vpop.eup %3986  ;;  %4006 = vrcp.f32 %v2411_v16  ;;  %v3264_v36 = vmul.f32 -1.442695, %v2087_v17  ;;  %v2091_v61 = vadd.f32 %v2090_v9, %v5356_v19 }
 0x4a8   : > { %v3989_v27 = vpop.eup %3988  ;;  %4008 = vrcp.f32 %v2412_v3  ;;  %v3265_v30 = vmul.f32 -1.442695, %v2089_v22 }
 0x4a9   : > { %v3991_v31 = vpop.eup %3990  ;;  %v3362_v59 = vpack.c.bf16 %v3989_v27, %v3987_v25  ;;  %4010 = vpow2.f32 %v3263_v21  ;;  %v3266_v18 = vmul.f32 -1.442695, %v2091_v61 }
 0x4aa   : > { %v3993_v28 = vpop.eup %3992  ;;  %4012 = vpow2.f32 %v3264_v36 }
 0x4ab   : > { %v3995_v34 = vpop.eup %3994  ;;  %2789 = vst [vmem:[%s5379_s20] sm:$0xff] %v3362_v59  ;;  %v3363_v23 = vpack.c.bf16 %v3993_v28, %v3991_v31  ;;  %4014 = vpow2.f32 %v3265_v30  ;;  %v2094_v63 = vpop.f32.mrb[64].mxu1 }
 0x4ac   : > { %v3997_v1 = vpop.eup %3996  ;;  %v2413_v0 = vadd.f32 1.0, %v3995_v34  ;;  %4016 = vpow2.f32 %v3266_v18  ;;  %v2095_v2 = vadd.f32 %v2094_v63, %v5352_v26  ;;  %v2096_v35 = vpop.f32.mrb[65].mxu1 }
 0x4ad   : > { %v3999_v24 = vpop.eup %3998  ;;  %2790 = vst [vmem:[%s5379_s20 + $0x8] sm:$0xff] %v3363_v23  ;;  %v2414_v37 = vadd.f32 1.0, %v3997_v1  ;;  %v2097_v38 = vadd.f32 %v2096_v35, %v5356_v19  ;;  %v2098_v40 = vpop.f32.mrb[66].mxu1 }
 0x4ae   : > { %4411 = shalt.err (!%p4408_p4)
}
 0x4af   : > { %s4412_s25 = scalar_lea.hbm %s5386_s28, 4096  ;;  %s4416_s6 = scalar_lea.hbm %s5656_s2, 8192 }
 0x4b0   : > { %p4413_p11 = scmp.ne.s32.totalorder %s5386_s28, %s4412_s25  ;;  %p4417_p1 = scmp.lt.u32.totalorder %s5386_s28, %s5656_s2 }
 0x4b1   : > { %p4418_p2 = scmp.lt.u32.totalorder %s4416_s6, %s4412_s25  ;;  %p4420_p0 = scmp.lt.u32.totalorder %s4412_s25, %s5386_s28 }
 0x4b2   : > { %p4414_p7 = pnand %p4413_p11, %p4803_p3 }
 0x4b3   : > { %p4419_p13 = por %p4418_p2, %p4417_p1 }
 0x4b4   : > { %p4415_p12 = pneg %p4414_p7 }
 0x4b5   : > { %p4421_p6 = por %p4420_p0, %p4419_p13 }
 0x4b7   : > { %p4422_p8 = pnand %p4421_p6, %p4415_p12 }
 0x4b9   : > { %4425 = shalt.err (!%p4422_p8)
}
 0x4ba   : > { %s4554_s14 = smov 128   ;;  %s4555_s0 = smov 8   ;;  %v4001_v41 = vpop.eup %4000  ;;  %4018 = vrcp.f32 %v2413_v0  ;;  %v2415_v43 = vadd.f32 1.0, %v3999_v24  ;;  %v3267_v44 = vmul.f32 -1.442695, %v2095_v2  ;;  %v2099_v45 = vadd.f32 %v2098_v40, %v5352_v26  ;;  %v2100_v32 = vpop.f32.mrb[67].mxu1 }
 0x4bb   : > { %3698 = dma.vmem_to_hbm [thread:$0]  (%p4803_p3), %s5389_s21, 4096, %s5386_s28, %s5395_s18, %s4554_s14, %s4554_s14, %s4555_s0   ;;  %v4003_v47 = vpop.eup %4002  ;;  %4020 = vrcp.f32 %v2414_v37  ;;  %v2416_v48 = vadd.f32 1.0, %v4001_v41  ;;  %v3268_v49 = vmul.f32 -1.442695, %v2097_v38  ;;  %v2101_v29 = vadd.f32 %v2100_v32, %v5356_v19 }
 0x4bc   : > { %s5657_s17 = sld [smem:[#allocation35_spill]]  ;;  %s2942_s21 = sshll.u32 %s5045_s10, 4  ;;  %v4005_v50 = vpop.eup %4004  ;;  %4022 = vrcp.f32 %v2415_v43  ;;  %v3269_v51 = vmul.f32 -1.442695, %v2099_v45  ;;  %s5431_s21 = int_to_ptr.vmem [resolvable:$true] %s2942_s21 }
 0x4bd   : > { %v4007_v52 = vpop.eup %4006  ;;  %v3364_v53 = vpack.c.bf16 %v4005_v50, %v4003_v47  ;;  %4024 = vrcp.f32 %v2416_v48  ;;  %v3270_v56 = vmul.f32 -1.442695, %v2101_v29  ;;  %s4426_s28 = scalar_lea.vmem %s5431_s21, 4096  ;;  %s4556_s15 = smov [#allocation16]  }
 0x4be   : > { %p4427_p10 = scmp.ne.s32.totalorder %s5431_s21, %s4426_s28  ;;  %s4430_s16 = sshll.u32 %s4556_s15, 4  ;;  %s4431_s16 = int_to_ptr.vmem [resolvable:$false] %s4430_s16 }
 0x4bf   : > { %s4432_s10 = scalar_lea.vmem %s4431_s16, 8192  ;;  %p4433_p4 = scmp.lt.s32.totalorder %s5431_s21, %s4431_s16 }
 0x4c0   : > { %p4428_p5 = pnand %p4427_p10, %p4803_p3  ;;  %p4434_p11 = scmp.lt.s32.totalorder %s4432_s10, %s4426_s28 }
 0x4c2   : > { %s5427_s27 = scalar_lea.hbm %s5657_s17, %s5375_s4  ;;  %p4429_p9 = pneg %p4428_p5 }
 0x4c3   : > { %p4435_p7 = por %p4434_p11, %p4433_p4 }
 0x4c5   : > { %p4436_p12 = pnand %p4435_p7, %p4429_p9 }
 0x4c7   : > { %4439 = shalt.err (!%p4436_p12)
}
 0x4c8   : > { %s4440_s25 = scalar_lea.hbm %s5427_s27, 4096  ;;  %s4444_s6 = scalar_lea.hbm %s5657_s17, 8192 }
 0x4c9   : > { %p4441_p1 = scmp.ne.s32.totalorder %s5427_s27, %s4440_s25  ;;  %p4445_p0 = scmp.lt.u32.totalorder %s5427_s27, %s5657_s17 }
 0x4ca   : > { %p4446_p6 = scmp.lt.u32.totalorder %s4444_s6, %s4440_s25  ;;  %p4448_p10 = scmp.lt.u32.totalorder %s4440_s25, %s5427_s27 }
 0x4cb   : > { %p4442_p2 = pnand %p4441_p1, %p4803_p3 }
 0x4cc   : > { %p4447_p8 = por %p4446_p6, %p4445_p0 }
 0x4cd   : > { %p4443_p13 = pneg %p4442_p2 }
 0x4ce   : > { %p4449_p5 = por %p4448_p10, %p4447_p8 }
 0x4d0   : > { %p4450_p9 = pnand %p4449_p5, %p4443_p13 }
 0x4d2   : > { %4453 = shalt.err (!%p4450_p9)
}
 0x4d3   : > { %3699 = dma.vmem_to_hbm [thread:$0]  (%p4803_p3), %s5431_s21, 4096, %s5427_s27, %s5395_s18, %s4554_s14, %s4554_s14, %s4555_s0   ;;  %v4009_v42 = vpop.eup %4008  ;;  %4026 = vpow2.f32 %v3267_v44  ;;  %v2104_v33 = vpop.f32.mrb[68].mxu1 }
 0x4d4   : > { %v4011_v57 = vpop.eup %4010  ;;  %2791 = vst [vmem:[%s5379_s20 + $0x10] sm:$0xff] %v3364_v53  ;;  %v3365_v10 = vpack.c.bf16 %v4009_v42, %v4007_v52  ;;  %4028 = vpow2.f32 %v3268_v49  ;;  %v2105_v60 = vadd.f32 %v2104_v33, %v5352_v26  ;;  %v2106_v39 = vpop.f32.mrb[69].mxu1  ;;  %s2910_s18 = sshll.u32 %s5379_s20, 4  ;;  %s5658_s27 = sld [smem:[#allocation33_spill]]  ;;  %s5538_s18 = int_to_ptr.vmem [resolvable:$true] %s2910_s18 }
 0x4d5   : > { %v4013_v46 = vpop.eup %4012  ;;  %v2417_v58 = vadd.f32 1.0, %v4011_v57  ;;  %4030 = vpow2.f32 %v3269_v51  ;;  %v2107_v7 = vadd.f32 %v2106_v39, %v5356_v19  ;;  %v2108_v8 = vpop.f32.mrb[70].mxu1  ;;  %s2886_s28 = scalar_lea.sflag [#allocation4], %s4901_s23  ;;  %s4454_s15 = scalar_lea.vmem %s5538_s18, 4096 }
 0x4d6   : > { %v4015_v62 = vpop.eup %4014  ;;  %2792 = vst [vmem:[%s5379_s20 + $0x18] sm:$0xff] %v3365_v10  ;;  %v2418_v6 = vadd.f32 1.0, %v4013_v46  ;;  %4032 = vpow2.f32 %v3270_v56  ;;  %v3271_v4 = vmul.f32 -1.442695, %v2105_v60  ;;  %v2109_v12 = vadd.f32 %v2108_v8, %v5352_v26  ;;  %v2110_v13 = vpop.f32.mrb[71].mxu1  ;;  %p4455_p4 = scmp.ne.s32.totalorder %s5538_s18, %s4454_s15  ;;  %s4557_s16 = smov [#allocation13]  }
 0x4d7   : > { %v4017_v54 = vpop.eup %4016  ;;  %4034 = vrcp.f32 %v2417_v58  ;;  %v2419_v11 = vadd.f32 1.0, %v4015_v62  ;;  %v3272_v14 = vmul.f32 -1.442695, %v2107_v7  ;;  %v2111_v5 = vadd.f32 %v2110_v13, %v5356_v19  ;;  %v2114_v9 = vpop.f32.mrb[72].mxu1  ;;  %s4458_s10 = sshll.u32 %s4557_s16, 4  ;;  %s4459_s10 = int_to_ptr.vmem [resolvable:$false] %s4458_s10 }
 0x4d8   : > { %4036 = vrcp.f32 %v2418_v6  ;;  %v2420_v55 = vadd.f32 1.0, %v4017_v54  ;;  %v4019_v15 = vpop.eup %4018  ;;  %v3273_v16 = vmul.f32 -1.442695, %v2109_v12  ;;  %v2115_v61 = vadd.f32 %v2114_v9, %v5352_v26  ;;  %v2116_v27 = vpop.f32.mrb[73].mxu1  ;;  %p4456_p11 = pnand %p4455_p4, %p4803_p3  ;;  %s4460_s25 = scalar_lea.vmem %s4459_s10, 8192 }
 0x4d9   : > { %4038 = vrcp.f32 %v2419_v11  ;;  %v4021_v17 = vpop.eup %4020  ;;  %v3274_v20 = vmul.f32 -1.442695, %v2111_v5  ;;  %v2117_v59 = vadd.f32 %v2116_v27, %v5356_v19  ;;  %v2118_v18 = vpop.f32.mrb[74].mxu1  ;;  %p4461_p12 = scmp.lt.s32.totalorder %s5538_s18, %s4459_s10  ;;  %p4462_p1 = scmp.lt.s32.totalorder %s4460_s25, %s4454_s15 }
 0x4da   : > { %4040 = vrcp.f32 %v2420_v55  ;;  %v4023_v3 = vpop.eup %4022  ;;  %v3366_v21 = vpack.c.bf16 %v4021_v17, %v4019_v15  ;;  %v2119_v23 = vadd.f32 %v2118_v18, %v5352_v26  ;;  %v2120_v63 = vpop.f32.mrb[75].mxu1  ;;  %v3275_v2 = vmul.f32 -1.442695, %v2115_v61  ;;  %s5536_s21 = scalar_lea.hbm %s5658_s27, %s5375_s4  ;;  %p4457_p7 = pneg %p4456_p11 }
 0x4db   : > { %4042 = vpow2.f32 %v3271_v4  ;;  %v4025_v22 = vpop.eup %4024  ;;  %v2121_v35 = vadd.f32 %v2120_v63, %v5356_v19  ;;  %v3276_v38 = vmul.f32 -1.442695, %v2117_v59  ;;  %v2124_v47 = vpop.f32.mrb[76].mxu1  ;;  %p4463_p2 = por %p4462_p1, %p4461_p12 }
 0x4dc   : > { %4044 = vpow2.f32 %v3272_v14  ;;  %2793 = vst [vmem:[%s5379_s20 + $0x20] sm:$0xff] %v3366_v21  ;;  %v3367_v36 = vpack.c.bf16 %v4025_v22, %v4023_v3  ;;  %v3277_v41 = vmul.f32 -1.442695, %v2119_v23  ;;  %v2125_v29 = vadd.f32 %v2124_v47, %v5352_v26  ;;  %v2126_v50 = vpop.f32.mrb[77].mxu1 }
 0x4dd   : > { %v4027_v25 = vpop.eup %4026  ;;  %4046 = vpow2.f32 %v3273_v16  ;;  %v3278_v45 = vmul.f32 -1.442695, %v2121_v35  ;;  %v2127_v53 = vadd.f32 %v2126_v50, %v5356_v19  ;;  %v2128_v56 = vpop.f32.mrb[78].mxu1  ;;  %p4464_p13 = pnand %p4463_p2, %p4457_p7 }
 0x4de   : > { %v4029_v30 = vpop.eup %4028  ;;  %v2421_v31 = vadd.f32 1.0, %v4027_v25  ;;  %4048 = vpow2.f32 %v3274_v20  ;;  %2794 = vst [vmem:[%s5379_s20 + $0x28] sm:$0xff] %v3367_v36  ;;  %v2129_v10 = vadd.f32 %v2128_v56, %v5352_v26  ;;  %v2130_v33 = vpop.f32.mrb[79].mxu1  ;;  %v3279_v60 = vmul.f32 -1.442695, %v2125_v29 }
 0x4df   : > { %v4031_v28 = vpop.eup %4030  ;;  %v2422_v34 = vadd.f32 1.0, %v4029_v30  ;;  %v2131_v39 = vadd.f32 %v2130_v33, %v5356_v19  ;;  %v3280_v6 = vmul.f32 -1.442695, %v2127_v53  ;;  %v2134_v13 = vpop.f32.mrb[80].mxu1 }
 0x4e0   : > { %v4033_v1 = vpop.eup %4032  ;;  %4050 = vrcp.f32 %v2421_v31  ;;  %v2423_v0 = vadd.f32 1.0, %v4031_v28  ;;  %v3281_v8 = vmul.f32 -1.442695, %v2129_v10  ;;  %v2135_v14 = vadd.f32 %v2134_v13, %v5352_v26  ;;  %v2136_v5 = vpop.f32.mrb[81].mxu1 }
 0x4e1   : > { %v4035_v24 = vpop.eup %4034  ;;  %4052 = vrcp.f32 %v2422_v34  ;;  %v2424_v37 = vadd.f32 1.0, %v4033_v1  ;;  %v3282_v11 = vmul.f32 -1.442695, %v2131_v39  ;;  %v2137_v17 = vadd.f32 %v2136_v5, %v5356_v19  ;;  %v2138_v20 = vpop.f32.mrb[82].mxu1 }
 0x4e2   : > { %v4037_v40 = vpop.eup %4036  ;;  %4054 = vrcp.f32 %v2423_v0  ;;  %v2139_v22 = vadd.f32 %v2138_v20, %v5352_v26  ;;  %v2140_v9 = vpop.f32.mrb[83].mxu1  ;;  %v3283_v31 = vmul.f32 -1.442695, %v2135_v14 }
 0x4e3   : > { %v4039_v43 = vpop.eup %4038  ;;  %v3368_v44 = vpack.c.bf16 %v4037_v40, %v4035_v24  ;;  %4056 = vrcp.f32 %v2424_v37  ;;  %v2141_v61 = vadd.f32 %v2140_v9, %v5356_v19  ;;  %v3284_v28 = vmul.f32 -1.442695, %v2137_v17 }
 0x4e4   : > { %v4041_v32 = vpop.eup %4040  ;;  %4058 = vpow2.f32 %v3275_v2  ;;  %v3285_v23 = vmul.f32 -1.442695, %v2139_v22  ;;  %v2144_v2 = vpop.f32.mrb[84].mxu1 }
 0x4e5   : > { %v4043_v48 = vpop.eup %4042  ;;  %2795 = vst [vmem:[%s5379_s20 + $0x30] sm:$0xff] %v3368_v44  ;;  %v3369_v49 = vpack.c.bf16 %v4041_v32, %v4039_v43  ;;  %4060 = vpow2.f32 %v3276_v38  ;;  %v3286_v0 = vmul.f32 -1.442695, %v2141_v61  ;;  %v2145_v24 = vadd.f32 %v2144_v2, %v5352_v26  ;;  %v2146_v37 = vpop.f32.mrb[85].mxu1 }
 0x4e6   : > { %v4045_v51 = vpop.eup %4044  ;;  %v2425_v52 = vadd.f32 1.0, %v4043_v48  ;;  %4062 = vpow2.f32 %v3277_v41  ;;  %v2147_v41 = vadd.f32 %v2146_v37, %v5356_v19  ;;  %v2148_v43 = vpop.f32.mrb[86].mxu1 }
 0x4e7   : > { %v4047_v42 = vpop.eup %4046  ;;  %2796 = vst [vmem:[%s5379_s20 + $0x38] sm:$0xff] %v3369_v49  ;;  %v2426_v57 = vadd.f32 1.0, %v4045_v51  ;;  %4064 = vpow2.f32 %v3278_v45  ;;  %v2149_v32 = vadd.f32 %v2148_v43, %v5352_v26  ;;  %v2150_v47 = vpop.f32.mrb[87].mxu1 }
 0x4e8   : > { %v4049_v46 = vpop.eup %4048  ;;  %4066 = vrcp.f32 %v2425_v52  ;;  %v2427_v58 = vadd.f32 1.0, %v4047_v42  ;;  %v2151_v29 = vadd.f32 %v2150_v47, %v5356_v19  ;;  %v3287_v52 = vmul.f32 -1.442695, %v2145_v24 }
 0x4e9   : > { %4068 = vrcp.f32 %v2426_v57  ;;  %v2428_v62 = vadd.f32 1.0, %v4049_v46  ;;  %v3288_v56 = vmul.f32 -1.442695, %v2147_v41  ;;  %v3289_v57 = vmul.f32 -1.442695, %v2149_v32  ;;  %v2154_v46 = vpop.f32.mrb[88].mxu1 }
 0x4ea   : > { %v4051_v7 = vpop.eup %4050  ;;  %4070 = vrcp.f32 %v2427_v58  ;;  %v3290_v33 = vmul.f32 -1.442695, %v2151_v29  ;;  %v2155_v39 = vadd.f32 %v2154_v46, %v5352_v26 }
 0x4eb   : > { %v4053_v54 = vpop.eup %4052  ;;  %4072 = vrcp.f32 %v2428_v62  ;;  %v2156_v62 = vpop.f32.mrb[89].mxu1 }
 0x4ec   : > { %v4055_v4 = vpop.eup %4054  ;;  %v3370_v12 = vpack.c.bf16 %v4053_v54, %v4051_v7  ;;  %4074 = vpow2.f32 %v3279_v60  ;;  %v2157_v7 = vadd.f32 %v2156_v62, %v5356_v19 }
 0x4ed   : > { %v4057_v55 = vpop.eup %4056  ;;  %4076 = vpow2.f32 %v3280_v6 }
 0x4ee   : > { %v4059_v15 = vpop.eup %4058  ;;  %2797 = vst [vmem:[%s5379_s20 + $0x40] sm:$0xff] %v3370_v12  ;;  %v3371_v16 = vpack.c.bf16 %v4057_v55, %v4055_v4  ;;  %4078 = vpow2.f32 %v3281_v8  ;;  %v2158_v8 = vpop.f32.mrb[90].mxu1  ;;  %v3291_v4 = vmul.f32 -1.442695, %v2155_v39 }
 0x4ef   : > { %v4061_v3 = vpop.eup %4060  ;;  %v2429_v21 = vadd.f32 1.0, %v4059_v15  ;;  %4080 = vpow2.f32 %v3282_v11  ;;  %v2159_v12 = vadd.f32 %v2158_v8, %v5352_v26  ;;  %v2160_v13 = vpop.f32.mrb[91].mxu1 }
 0x4f0   : > { %v4063_v25 = vpop.eup %4062  ;;  %2798 = vst [vmem:[%s5379_s20 + $0x48] sm:$0xff] %v3371_v16  ;;  %v2430_v36 = vadd.f32 1.0, %v4061_v3  ;;  %v2161_v5 = vadd.f32 %v2160_v13, %v5356_v19  ;;  %v3292_v3 = vmul.f32 -1.442695, %v2157_v7  ;;  %v2164_v61 = vpop.f32.mrb[92].mxu1 }
 0x4f1   : > { %v4065_v27 = vpop.eup %4064  ;;  %4082 = vrcp.f32 %v2429_v21  ;;  %v2431_v30 = vadd.f32 1.0, %v4063_v25  ;;  %v3293_v9 = vmul.f32 -1.442695, %v2159_v12 }
 0x4f2   : > { %v4067_v59 = vpop.eup %4066  ;;  %4084 = vrcp.f32 %v2430_v36  ;;  %v2432_v18 = vadd.f32 1.0, %v4065_v27  ;;  %v3294_v36 = vmul.f32 -1.442695, %v2161_v5 }
 0x4f3   : > { %v4069_v34 = vpop.eup %4068  ;;  %4086 = vrcp.f32 %v2431_v30 }
 0x4f4   : > { %v4071_v63 = vpop.eup %4070  ;;  %v3372_v1 = vpack.c.bf16 %v4069_v34, %v4067_v59  ;;  %4088 = vrcp.f32 %v2432_v18  ;;  %v2166_v59 = vpop.f32.mrb[93].mxu1 }
 0x4f5   : > { %v4073_v35 = vpop.eup %4072  ;;  %4090 = vpow2.f32 %v3283_v31  ;;  %v2165_v31 = vadd.f32 %v2164_v61, %v5352_v26 }
 0x4f6   : > { %v4075_v38 = vpop.eup %4074  ;;  %2799 = vst [vmem:[%s5379_s20 + $0x50] sm:$0xff] %v3372_v1  ;;  %v3373_v40 = vpack.c.bf16 %v4073_v35, %v4071_v63  ;;  %4092 = vpow2.f32 %v3284_v28  ;;  %v2168_v28 = vpop.f32.mrb[94].mxu1  ;;  %v2167_v1 = vadd.f32 %v2166_v59, %v5356_v19 }
 0x4f7   : > { %v4077_v44 = vpop.eup %4076  ;;  %v2433_v45 = vadd.f32 1.0, %v4075_v38  ;;  %4094 = vpow2.f32 %v3285_v23  ;;  %v3295_v63 = vmul.f32 -1.442695, %v2165_v31  ;;  %v2169_v24 = vadd.f32 %v2168_v28, %v5352_v26 }
 0x4f8   : > { %v4079_v48 = vpop.eup %4078  ;;  %2800 = vst [vmem:[%s5379_s20 + $0x58] sm:$0xff] %v3373_v40  ;;  %v2434_v49 = vadd.f32 1.0, %v4077_v44  ;;  %4096 = vpow2.f32 %v3286_v0  ;;  %v2170_v0 = vpop.f32.mrb[95].mxu1  ;;  %v3296_v32 = vmul.f32 -1.442695, %v2167_v1 }
 0x4f9   : > { %v4081_v50 = vpop.eup %4080  ;;  %4098 = vrcp.f32 %v2433_v45  ;;  %v2435_v51 = vadd.f32 1.0, %v4079_v48  ;;  %v2171_v40 = vadd.f32 %v2170_v0, %v5356_v19  ;;  %v2174_v29 = vpop.f32.mrb[96].mxu1 }
 0x4fa   : > { %4100 = vrcp.f32 %v2434_v49  ;;  %v2436_v53 = vadd.f32 1.0, %v4081_v50  ;;  %v3297_v49 = vmul.f32 -1.442695, %v2169_v24 }
 0x4fb   : > { %v4083_v42 = vpop.eup %4082  ;;  %4102 = vrcp.f32 %v2435_v51  ;;  %v3298_v51 = vmul.f32 -1.442695, %v2171_v40 }
 0x4fc   : > { %v4085_v10 = vpop.eup %4084  ;;  %4104 = vrcp.f32 %v2436_v53  ;;  %v2176_v53 = vpop.f32.mrb[97].mxu1 }
 0x4fd   : > { %v4087_v58 = vpop.eup %4086  ;;  %v3374_v60 = vpack.c.bf16 %v4085_v10, %v4083_v42  ;;  %4106 = vpow2.f32 %v3287_v52  ;;  %v2175_v52 = vadd.f32 %v2174_v29, %v5352_v26  ;;  %v2177_v46 = vadd.f32 %v2176_v53, %v5356_v19 }
 0x4fe   : > { %v4089_v6 = vpop.eup %4088  ;;  %4108 = vpow2.f32 %v3288_v56 }
 0x4ff   : > { %v4091_v54 = vpop.eup %4090  ;;  %2801 = vst [vmem:[%s5379_s20 + $0x60] sm:$0xff] %v3374_v60  ;;  %v3375_v11 = vpack.c.bf16 %v4089_v6, %v4087_v58  ;;  %4110 = vpow2.f32 %v3289_v57  ;;  %v2178_v57 = vpop.f32.mrb[98].mxu1  ;;  %v3300_v13 = vmul.f32 -1.442695, %v2177_v46 }
 0x500   : > { %v4093_v55 = vpop.eup %4092  ;;  %v2437_v14 = vadd.f32 1.0, %v4091_v54  ;;  %4112 = vpow2.f32 %v3290_v33  ;;  %v3299_v33 = vmul.f32 -1.442695, %v2175_v52  ;;  %v2180_v58 = vpop.f32.mrb[99].mxu1  ;;  %v2179_v62 = vadd.f32 %v2178_v57, %v5352_v26 }
 0x501   : > { %v4095_v15 = vpop.eup %4094  ;;  %2802 = vst [vmem:[%s5379_s20 + $0x68] sm:$0xff] %v3375_v11  ;;  %v2438_v16 = vadd.f32 1.0, %v4093_v55  ;;  %4114 = vpow2.f32 %v3291_v4  ;;  %v2181_v8 = vadd.f32 %v2180_v58, %v5356_v19 }
 0x502   : > { %v4097_v17 = vpop.eup %4096  ;;  %4116 = vrcp.f32 %v2437_v14  ;;  %v2439_v20 = vadd.f32 1.0, %v4095_v15  ;;  %v3301_v5 = vmul.f32 -1.442695, %v2179_v62  ;;  %v2184_v15 = vpop.f32.mrb[100].mxu1 }
 0x503   : > { %v4099_v21 = vpop.eup %4098  ;;  %4118 = vrcp.f32 %v2438_v16  ;;  %v2440_v22 = vadd.f32 1.0, %v4097_v17  ;;  %v3302_v17 = vmul.f32 -1.442695, %v2181_v8 }
 0x504   : > { %v4101_v25 = vpop.eup %4100  ;;  %4120 = vrcp.f32 %v2439_v20  ;;  %v2185_v20 = vadd.f32 %v2184_v15, %v5352_v26 }
 0x505   : > { %v4103_v27 = vpop.eup %4102  ;;  %v3376_v30 = vpack.c.bf16 %v4101_v25, %v4099_v21  ;;  %4122 = vrcp.f32 %v2440_v22 }
 0x506   : > { %v4105_v18 = vpop.eup %4104  ;;  %4124 = vpow2.f32 %v3292_v3  ;;  %v2186_v3 = vpop.f32.mrb[101].mxu1  ;;  %v3303_v61 = vmul.f32 -1.442695, %v2185_v20 }
 0x507   : > { %v4107_v34 = vpop.eup %4106  ;;  %2803 = vst [vmem:[%s5379_s20 + $0x70] sm:$0xff] %v3376_v30  ;;  %v3377_v23 = vpack.c.bf16 %v4105_v18, %v4103_v27  ;;  %4126 = vpow2.f32 %v3293_v9  ;;  %v2187_v9 = vadd.f32 %v2186_v3, %v5356_v19  ;;  %v2188_v25 = vpop.f32.mrb[102].mxu1 }
 0x508   : > { %v4109_v2 = vpop.eup %4108  ;;  %v2441_v35 = vadd.f32 1.0, %v4107_v34  ;;  %4128 = vpow2.f32 %v3294_v36  ;;  %v2190_v27 = vpop.f32.mrb[103].mxu1  ;;  %v2189_v18 = vadd.f32 %v2188_v25, %v5352_v26 }
 0x509   : > { %v4111_v37 = vpop.eup %4110  ;;  %2804 = vst [vmem:[%s5379_s20 + $0x78] sm:$0xff] %v3377_v23  ;;  %v2442_v38 = vadd.f32 1.0, %v4109_v2  ;;  %4130 = vpow2.f32 %v3295_v63  ;;  %v3304_v59 = vmul.f32 -1.442695, %v2187_v9  ;;  %v2191_v34 = vadd.f32 %v2190_v27, %v5356_v19 }
 0x50a   : > { %v4113_v41 = vpop.eup %4112  ;;  %4132 = vrcp.f32 %v2441_v35  ;;  %v2443_v43 = vadd.f32 1.0, %v4111_v37  ;;  %v3305_v24 = vmul.f32 -1.442695, %v2189_v18  ;;  %v2194_v37 = vpop.f32.mrb[104].mxu1 }
 0x50b   : > { %v4115_v44 = vpop.eup %4114  ;;  %4134 = vrcp.f32 %v2442_v38  ;;  %v2444_v45 = vadd.f32 1.0, %v4113_v41  ;;  %v3306_v41 = vmul.f32 -1.442695, %v2191_v34 }
 0x50c   : > { %v4117_v47 = vpop.eup %4116  ;;  %4136 = vrcp.f32 %v2443_v43  ;;  %v2445_v48 = vadd.f32 1.0, %v4115_v44  ;;  %v2195_v43 = vadd.f32 %v2194_v37, %v5352_v26  ;;  %v2196_v44 = vpop.f32.mrb[105].mxu1 }
 0x50d   : > { %v4119_v50 = vpop.eup %4118  ;;  %4138 = vrcp.f32 %v2444_v45 }
 0x50e   : > { %v4121_v56 = vpop.eup %4120  ;;  %v3378_v42 = vpack.c.bf16 %v4119_v50, %v4117_v47  ;;  %4140 = vrcp.f32 %v2445_v48  ;;  %v2197_v47 = vadd.f32 %v2196_v44, %v5356_v19  ;;  %v2198_v48 = vpop.f32.mrb[106].mxu1  ;;  %v3307_v29 = vmul.f32 -1.442695, %v2195_v43 }
 0x50f   : > { %v4123_v10 = vpop.eup %4122  ;;  %4142 = vpow2.f32 %v3296_v32  ;;  %v2200_v50 = vpop.f32.mrb[107].mxu1 }
 0x510   : > { %v4125_v60 = vpop.eup %4124  ;;  %2805 = vst [vmem:[%s5379_s20 + $0x80] sm:$0xff] %v3378_v42  ;;  %v3379_v39 = vpack.c.bf16 %v4123_v10, %v4121_v56  ;;  %4144 = vpow2.f32 %v3297_v49  ;;  %v3308_v53 = vmul.f32 -1.442695, %v2197_v47  ;;  %v2199_v42 = vadd.f32 %v2198_v48, %v5352_v26  ;;  %v2204_v62 = vpop.f32.mrb[108].mxu1 }
 0x511   : > { %v4127_v6 = vpop.eup %4126  ;;  %v2446_v7 = vadd.f32 1.0, %v4125_v60  ;;  %4146 = vpow2.f32 %v3298_v51 }
 0x512   : > { %v4129_v54 = vpop.eup %4128  ;;  %2806 = vst [vmem:[%s5379_s20 + $0x88] sm:$0xff] %v3379_v39  ;;  %v2447_v11 = vadd.f32 1.0, %v4127_v6  ;;  %4148 = vpow2.f32 %v3299_v33  ;;  %v2201_v33 = vadd.f32 %v2200_v50, %v5356_v19  ;;  %v3309_v8 = vmul.f32 -1.442695, %v2199_v42 }
 0x513   : > { %v4131_v4 = vpop.eup %4130  ;;  %4150 = vrcp.f32 %v2446_v7  ;;  %v2448_v12 = vadd.f32 1.0, %v4129_v54  ;;  %v2205_v54 = vadd.f32 %v2204_v62, %v5352_v26 }
 0x514   : > { %v4133_v55 = vpop.eup %4132  ;;  %4152 = vrcp.f32 %v2447_v11  ;;  %v2449_v14 = vadd.f32 1.0, %v4131_v4  ;;  %v2206_v11 = vpop.f32.mrb[109].mxu1 }
 0x515   : > { %v4135_v16 = vpop.eup %4134  ;;  %4154 = vrcp.f32 %v2448_v12 }
 0x516   : > { %v4137_v21 = vpop.eup %4136  ;;  %v3380_v22 = vpack.c.bf16 %v4135_v16, %v4133_v55  ;;  %4156 = vrcp.f32 %v2449_v14  ;;  %v2207_v55 = vadd.f32 %v2206_v11, %v5356_v19  ;;  %v2208_v14 = vpop.f32.mrb[110].mxu1  ;;  %v3311_v16 = vmul.f32 -1.442695, %v2205_v54 }
 0x517   : > { %v4139_v36 = vpop.eup %4138  ;;  %4158 = vpow2.f32 %v3300_v13  ;;  %v3310_v13 = vmul.f32 -1.442695, %v2201_v33  ;;  %v2209_v9 = vadd.f32 %v2208_v14, %v5352_v26 }
 0x518   : > { %v4141_v30 = vpop.eup %4140  ;;  %2807 = vst [vmem:[%s5379_s20 + $0x90] sm:$0xff] %v3380_v22  ;;  %v3381_v31 = vpack.c.bf16 %v4139_v36, %v4137_v21  ;;  %4160 = vpow2.f32 %v3301_v5  ;;  %v3312_v3 = vmul.f32 -1.442695, %v2207_v55 }
 0x519   : > { %v4143_v28 = vpop.eup %4142  ;;  %4162 = vpow2.f32 %v3302_v17  ;;  %v2210_v17 = vpop.f32.mrb[111].mxu1 }
 0x51a   : > { %v4145_v23 = vpop.eup %4144  ;;  %2808 = vst [vmem:[%s5379_s20 + $0x98] sm:$0xff] %v3381_v31  ;;  %v2450_v63 = vadd.f32 1.0, %v4143_v28  ;;  %4164 = vpow2.f32 %v3303_v61  ;;  %v2211_v36 = vadd.f32 %v2210_v17, %v5356_v19  ;;  %v3313_v28 = vmul.f32 -1.442695, %v2209_v9 }
 0x51b   : > { %v4147_v1 = vpop.eup %4146  ;;  %v2451_v0 = vadd.f32 1.0, %v4145_v23  ;;  %4166 = vpow2.f32 %v3304_v59 }
 0x51c   : > { %v4149_v2 = vpop.eup %4148  ;;  %4168 = vrcp.f32 %v2450_v63  ;;  %v2452_v35 = vadd.f32 1.0, %v4147_v1  ;;  %v3314_v23 = vmul.f32 -1.442695, %v2211_v36 }
 0x51d   : > { %v4151_v38 = vpop.eup %4150  ;;  %4170 = vrcp.f32 %v2451_v0  ;;  %v2453_v40 = vadd.f32 1.0, %v4149_v2 }
 0x51e   : > { %v4153_v45 = vpop.eup %4152  ;;  %v3382_v32 = vpack.c.bf16 %v4151_v38, %v4141_v30  ;;  %4172 = vrcp.f32 %v2452_v35 }
 0x51f   : > { %v4155_v49 = vpop.eup %4154  ;;  %4174 = vrcp.f32 %v2453_v40 }
 0x520   : > { %v4157_v51 = vpop.eup %4156  ;;  %2809 = vst [vmem:[%s5379_s20 + $0xa0] sm:$0xff] %v3382_v32  ;;  %v3383_v52 = vpack.c.bf16 %v4155_v49, %v4153_v45  ;;  %4176 = vpow2.f32 %v3305_v24 }
 0x521   : > { %v4159_v56 = vpop.eup %4158  ;;  %4178 = vpow2.f32 %v3306_v41 }
 0x522   : > { %v4161_v57 = vpop.eup %4160  ;;  %2810 = vst [vmem:[%s5379_s20 + $0xa8] sm:$0xff] %v3383_v52  ;;  %v2454_v10 = vadd.f32 1.0, %v4159_v56  ;;  %4180 = vpow2.f32 %v3307_v29 }
 0x523   : > { %v4163_v46 = vpop.eup %4162  ;;  %v2455_v58 = vadd.f32 1.0, %v4161_v57  ;;  %4182 = vpow2.f32 %v3308_v53 }
 0x524   : > { %v4165_v60 = vpop.eup %4164  ;;  %4184 = vrcp.f32 %v2454_v10  ;;  %v2456_v39 = vadd.f32 1.0, %v4163_v46 }
 0x525   : > { %v4167_v6 = vpop.eup %4166  ;;  %4186 = vrcp.f32 %v2455_v58  ;;  %v2457_v7 = vadd.f32 1.0, %v4165_v60 }
 0x526   : > { %v4169_v4 = vpop.eup %4168  ;;  %4188 = vrcp.f32 %v2456_v39  ;;  %v2458_v12 = vadd.f32 1.0, %v4167_v6 }
 0x527   : > { %v4171_v5 = vpop.eup %4170  ;;  %v3384_v15 = vpack.c.bf16 %v4169_v4, %v4157_v51  ;;  %4190 = vrcp.f32 %v2457_v7 }
 0x528   : > { %v4173_v20 = vpop.eup %4172  ;;  %4192 = vrcp.f32 %v2458_v12 }
 0x529   : > { %v4175_v21 = vpop.eup %4174  ;;  %2811 = vst [vmem:[%s5379_s20 + $0xb0] sm:$0xff] %v3384_v15  ;;  %v3385_v22 = vpack.c.bf16 %v4173_v20, %v4171_v5  ;;  %4194 = vpow2.f32 %v3309_v8 }
 0x52a   : > { %v4177_v25 = vpop.eup %4176  ;;  %4196 = vpow2.f32 %v3310_v13 }
 0x52b   : > { %v4179_v61 = vpop.eup %4178  ;;  %2812 = vst [vmem:[%s5379_s20 + $0xb8] sm:$0xff] %v3385_v22  ;;  %v2459_v27 = vadd.f32 1.0, %v4177_v25  ;;  %4198 = vpow2.f32 %v3311_v16 }
 0x52c   : > { %v4181_v30 = vpop.eup %4180  ;;  %v2460_v31 = vadd.f32 1.0, %v4179_v61  ;;  %4200 = vpow2.f32 %v3312_v3 }
 0x52d   : > { %v4183_v59 = vpop.eup %4182  ;;  %4202 = vrcp.f32 %v2459_v27  ;;  %v2461_v18 = vadd.f32 1.0, %v4181_v30 }
 0x52e   : > { %v4185_v34 = vpop.eup %4184  ;;  %4204 = vrcp.f32 %v2460_v31  ;;  %v2462_v26 = vadd.f32 1.0, %v4183_v59 }
 0x52f   : > { %v4187_v63 = vpop.eup %4186  ;;  %v3386_v1 = vpack.c.bf16 %v4185_v34, %v4175_v21  ;;  %4206 = vrcp.f32 %v2461_v18 }
 0x530   : > { %v4189_v19 = vpop.eup %4188  ;;  %4208 = vrcp.f32 %v2462_v26 }
 0x531   : > { %v4191_v0 = vpop.eup %4190  ;;  %2813 = vst [vmem:[%s5379_s20 + $0xc0] sm:$0xff] %v3386_v1  ;;  %v3387_v2 = vpack.c.bf16 %v4189_v19, %v4187_v63  ;;  %4210 = vpow2.f32 %v3313_v28 }
 0x532   : > { %v4193_v35 = vpop.eup %4192  ;;  %4212 = vpow2.f32 %v3314_v23 }
 0x533   : > { %v4195_v24 = vpop.eup %4194  ;;  %2814 = vst [vmem:[%s5379_s20 + $0xc8] sm:$0xff] %v3387_v2  ;;  %v3388_v37 = vpack.c.bf16 %v4193_v35, %v4191_v0 }
 0x534   : > { %v4197_v38 = vpop.eup %4196  ;;  %v2463_v40 = vadd.f32 1.0, %v4195_v24 }
 0x535   : > { %v4199_v41 = vpop.eup %4198  ;;  %2815 = vst [vmem:[%s5379_s20 + $0xd0] sm:$0xff] %v3388_v37  ;;  %v2464_v43 = vadd.f32 1.0, %v4197_v38 }
 0x536   : > { %v4201_v44 = vpop.eup %4200  ;;  %4214 = vrcp.f32 %v2463_v40  ;;  %v2465_v45 = vadd.f32 1.0, %v4199_v41 }
 0x537   : > { %v4203_v32 = vpop.eup %4202  ;;  %4216 = vrcp.f32 %v2464_v43  ;;  %v2466_v47 = vadd.f32 1.0, %v4201_v44 }
 0x538   : > { %v4205_v48 = vpop.eup %4204  ;;  %4218 = vrcp.f32 %v2465_v45 }
 0x539   : > { %v4207_v49 = vpop.eup %4206  ;;  %v3389_v29 = vpack.c.bf16 %v4205_v48, %v4203_v32  ;;  %4220 = vrcp.f32 %v2466_v47 }
 0x53a   : > { %v4209_v50 = vpop.eup %4208 }
 0x53b   : > { %v4211_v51 = vpop.eup %4210  ;;  %2816 = vst [vmem:[%s5379_s20 + $0xd8] sm:$0xff] %v3389_v29  ;;  %v3390_v52 = vpack.c.bf16 %v4209_v50, %v4207_v49 }
 0x53c   : > { %v4213_v53 = vpop.eup %4212  ;;  %v2467_v56 = vadd.f32 1.0, %v4211_v51 }
 0x53d   : > { %2817 = vst [vmem:[%s5379_s20 + $0xe0] sm:$0xff] %v3390_v52  ;;  %v2468_v42 = vadd.f32 1.0, %v4213_v53 }
 0x53e   : > { %4222 = vrcp.f32 %v2467_v56 }
 0x53f   : > { %4224 = vrcp.f32 %v2468_v42 }
 0x540   : > { %v4215_v57 = vpop.eup %4214 }
 0x541   : > { %v4217_v10 = vpop.eup %4216 }
 0x542   : > { %v4219_v33 = vpop.eup %4218  ;;  %v3391_v46 = vpack.c.bf16 %v4217_v10, %v4215_v57 }
 0x543   : > { %v4221_v58 = vpop.eup %4220 }
 0x544   : > { %2818 = vst [vmem:[%s5379_s20 + $0xe8] sm:$0xff] %v3391_v46  ;;  %v3392_v60 = vpack.c.bf16 %v4221_v58, %v4219_v33 }
 0x546   : > { %2819 = vst [vmem:[%s5379_s20 + $0xf0] sm:$0xff] %v3392_v60 }
 0x548   : > { %v4223_v39 = vpop.eup %4222 }
 0x549   : > { %v4225_v62 = vpop.eup %4224 }
 0x54a   : > { %v3393_v6 = vpack.c.bf16 %v4225_v62, %v4223_v39 }
 0x54c   : > { %2820 = vst [vmem:[%s5379_s20 + $0xf8] sm:$0xff] %v3393_v6 }
 0x54d   : > { %4467 = shalt.err (!%p4464_p13)
}
 0x54e   : > { %s4468_s4 = scalar_lea.hbm %s5536_s21, 4096  ;;  %s4472_s8 = scalar_lea.hbm %s5658_s27, 8192 }
 0x54f   : > { %p4469_p0 = scmp.ne.s32.totalorder %s5536_s21, %s4468_s4  ;;  %p4473_p10 = scmp.lt.u32.totalorder %s5536_s21, %s5658_s27 }
 0x550   : > { %p4474_p5 = scmp.lt.u32.totalorder %s4472_s8, %s4468_s4  ;;  %p4476_p4 = scmp.lt.u32.totalorder %s4468_s4, %s5536_s21 }
 0x551   : > { %p4470_p6 = pnand %p4469_p0, %p4803_p3 }
 0x552   : > { %p4475_p9 = por %p4474_p5, %p4473_p10 }
 0x553   : > { %p4471_p8 = pneg %p4470_p6 }
 0x554   : > { %p4477_p11 = por %p4476_p4, %p4475_p9 }
 0x556   : > { %p4478_p7 = pnand %p4477_p11, %p4471_p8 }
 0x558   : > { %4481 = shalt.err (!%p4478_p7)
}
 0x559   : > { %3697 = dma.vmem_to_hbm [thread:$0]  (%p4803_p3), %s5538_s18, 4096, %s5536_s21, %s2886_s28, %s4554_s14, %s4554_s14, %s4555_s0  }
 0x55a PF: > { %s5659_s19 = sld [smem:[#allocation24_spill]]  ;;  %s5660_s30 = sld [smem:[#allocation26_spill]] }
 0x55b   : > { %p5662_p1 = scmp.ge.s32.totalorder %s4540_s24, 2 }
 0x560   : > { %s2957_s11 = sand.u32 1, %s5659_s19   ;;  %p5661_p12 = scmp.ne.s32.totalorder %s5660_s30, 0 }
 0x561   : > { %s2958_s15 = scalar_lea.sflag [#allocation4], %s2957_s11 }
 0x562   : > { %p3724_p2 = pnand %p5662_p1, %p5661_p12 }
 0x564   : > { %4519 = dma.done.wait (!%p3724_p2), %s2958_s15, 4096  }
 0x565   : > { %4521 = vsyncadd (!%p3724_p2), %s2958_s15, 4294963200  ;;  %s5663_s13 = sadd.s32 4294967294, %s4540_s24  }
 0x566   : > { %s2966_s16 = sand.u32 1, %s5663_s13  }
 0x567   : > { %s2967_s10 = scalar_lea.sflag [#allocation15], %s2966_s16 }
 0x568   : > { %4523 = dma.done.wait (!%p3724_p2), %s2967_s10, 8192  }
 0x569   : > { %4525 = vsyncadd (!%p3724_p2), %s2967_s10, 4294959104  ;;  %s5664_s23 = sld [smem:[#allocation25_spill]]  ;;  %s5665_s14 = sld [smem:[#allocation27_spill]] }
 0x56a   : > { %p34_p3 = scmp.ge.s32.totalorder %s4790_s26, 4   ;;  %s5666_s21 = smov %s4532_s22 }
 0x56b   : > { %s5669_s24 = smov %s4790_s26 }
 0x56c   :  { %36 = sbr.rel (!%p34_p3) target bundleno = 20 (0x14), region = 166 }
 0x56f   : > { %s5667_s22 = smov %s5664_s23  ;;  %s5668_s23 = smov %s5665_s14 }
 0x573   :  { %2981 = vsyncpa [#allocation3], 1 }
 0x574   :  { %2983 = vsyncpa [#allocation3 + $0x1], 1 }
 0x575   :  { %2984 = vsyncpa [#allocation6], 1 }
 0x576   :  { %2986 = vsyncpa [#allocation6 + $0x1], 1 }
 0x577   :  { %2987 = vsyncpa [#allocation9], 1 }
 0x578   :  { %2988 = vsyncpa [#allocation12], 1 }
 0x579   :  { %2989 = vsyncpa [#allocation4], 1 }
 0x57a   :  { %2991 = vsyncpa [#allocation4 + $0x1], 1 }
 0x57b   :  { %2992 = vsyncpa [#allocation15], 1 }
 0x57c   :  { %2994 = vsyncpa [#allocation15 + $0x1], 1 }

</bundles_post_ra>
